<compile_context>
chip_gen: v7x
topology: tpu7x:2x2x1
jax: 0.10.0
libtpu: 0.0.40
codegen_flags: <defaults>
</compile_context>

<pallas_src>
import functools

import jax
import jax.numpy as jnp
from jax import lax
from jax.experimental import pallas as pl
from jax.experimental.pallas import tpu as pltpu


def _vmem_limit_bytes():
    try:
        cap = int(pltpu.get_tpu_info().vmem_capacity_bytes)
    except Exception:
        cap = 128 * 1024 * 1024
    return int(min(64 * 1024 * 1024, max(16 * 1024 * 1024, cap // 2)))


_VMEM_LIMIT = _vmem_limit_bytes()


def _compiler_params(semantics):
    return pltpu.CompilerParams(dimension_semantics=semantics,
                                vmem_limit_bytes=_VMEM_LIMIT)


def _round_up(x, m):
    return pl.cdiv(x, m) * m


def _pick_tm(M):
    """Row tile for the 1x1-conv matmuls: divides the 8-rounded row count when
    possible (no pad/slice HBM copies), keeps tiles MXU-sized, and yields >=2
    grid steps when M is large enough (multi-core + DMA/compute overlap)."""
    M8 = _round_up(M, 8)
    if M8 <= 256:
        return M8, M8
    for tm in (256, 128, 512, 384, 192, 320, 448, 64):
        if M8 % tm == 0:
            return tm, M8
    tm = 128
    return tm, _round_up(M8, tm)  # fallback: at most one partial tile of pad


def _pick_th(Ho, Wo, target=256):
    """Conv2 output-row block: smallest divisor of Ho with TH*Wo >= target
    (MXU row target on v6e/v7x), else the whole image."""
    for th in range(1, Ho + 1):
        if Ho % th == 0 and th * Wo >= target:
            return th
    return Ho


def _maybe_pad_rows(x2d, rows):
    if x2d.shape[0] == rows:
        return x2d
    return jnp.pad(x2d, ((0, rows - x2d.shape[0]), (0, 0)))


# ----------------------------------------------------------------------------
# Pallas kernels
# ----------------------------------------------------------------------------
def _mm_bias_kernel(relu, x_ref, w_ref, b_ref, o_ref):
    """out = x @ w + bias (BN scale pre-folded into w), optional ReLU."""
    acc = jnp.dot(x_ref[...], w_ref[...], preferred_element_type=jnp.float32)
    out = acc + b_ref[...]
    if relu:
        out = jnp.maximum(out, 0.0)
    o_ref[...] = out.astype(o_ref.dtype)


def _mm_bias_ds_add_relu_kernel(x_ref, w_ref, b_ref, xd_ref, wd_ref, bd_ref, o_ref):
    """out = relu((x @ w3 + b3) + (x_ds @ wd + bd)) -- downsample fused in-tile."""
    main = jnp.dot(x_ref[...], w_ref[...], preferred_element_type=jnp.float32) + b_ref[...]
    res = jnp.dot(xd_ref[...], wd_ref[...], preferred_element_type=jnp.float32) + bd_ref[...]
    o_ref[...] = jnp.maximum(main + res, 0.0).astype(o_ref.dtype)


def _mm_bias_res_add_relu_kernel(x_ref, w_ref, b_ref, r_ref, o_ref):
    """out = relu(x @ w3 + b3 + residual) -- identity skip (bf16 residual)."""
    main = jnp.dot(x_ref[...], w_ref[...], preferred_element_type=jnp.float32) + b_ref[...]
    o_ref[...] = jnp.maximum(main + r_ref[...].astype(jnp.float32), 0.0).astype(o_ref.dtype)


def _conv3x3_s1_kernel(TH, Wo, x_ref, w_ref, b_ref, o_ref):
    """3x3 conv, stride 1, pad=1 (input pre-padded) + folded-BN bias + ReLU.

    Grid = (N, Ho//TH).  Each step computes TH output rows with nine
    (TH*Wo, C) @ (C, Cout) MXU dots, fully unrolled; per kh the input slab is
    loaded once and the three kw shifts are derived with static slices.
    """
    rb = pl.program_id(1)
    r0 = rb * TH
    C = x_ref.shape[-1]
    Cout = o_ref.shape[-1]
    acc = jnp.zeros((TH * Wo, Cout), jnp.float32)
    for kh in range(3):
        slab = x_ref[0, pl.ds(r0 + kh, TH), :, :]           # (TH, W+2, C)
        for kw in range(3):
            xs = slab[:, kw:kw + Wo, :].reshape(TH * Wo, C)
            acc = acc + jnp.dot(xs, w_ref[kh * 3 + kw],
                                preferred_element_type=jnp.float32)
    out = jnp.maximum(acc + b_ref[...], 0.0)
    o_ref[...] = out.reshape(1, TH, Wo, Cout).astype(o_ref.dtype)


def _conv3x3_s2_kernel(TH, Wo, p00_ref, p01_ref, p10_ref, p11_ref,
                       w_ref, b_ref, o_ref):
    """3x3 conv, stride 2, pad=1 + folded-BN bias + ReLU.

    Input is pre-split by (row, col) parity so every tap is a dense
    unit-stride (TH, Wo, C) slab; nine (TH*Wo, C) @ (C, Cout) dots, unrolled.
    """
    rb = pl.program_id(1)
    r0 = rb * TH
    planes = (p00_ref, p01_ref, p10_ref, p11_ref)
    C = p00_ref.shape[-1]
    Cout = o_ref.shape[-1]
    acc = jnp.zeros((TH * Wo, Cout), jnp.float32)
    for kh in range(3):
        for kw in range(3):
            p = planes[(kh % 2) * 2 + (kw % 2)]
            xs = p[0, pl.ds(r0 + kh // 2, TH), pl.ds(kw // 2, Wo), :]
            acc = acc + jnp.dot(xs.reshape(TH * Wo, C), w_ref[kh * 3 + kw],
                                preferred_element_type=jnp.float32)
    out = jnp.maximum(acc + b_ref[...], 0.0)
    o_ref[...] = out.reshape(1, TH, Wo, Cout).astype(o_ref.dtype)


# ----------------------------------------------------------------------------
# pallas_call wrappers
# ----------------------------------------------------------------------------
def matmul_bias(x2d, w, bias, *, relu, out_dtype):
    """x2d: (M, K) bf16, w: (K, N) bf16 with BN scale folded in, bias: (N,) f32."""
    M, K = x2d.shape
    N = w.shape[1]
    tm, Mp = _pick_tm(M)
    xb = _maybe_pad_rows(x2d.astype(jnp.bfloat16), Mp)
    out = pl.pallas_call(
        functools.partial(_mm_bias_kernel, relu),
        out_shape=jax.ShapeDtypeStruct((Mp, N), out_dtype),
        grid=(Mp // tm,),
        in_specs=[
            pl.BlockSpec((tm, K), lambda i: (i, 0)),
            pl.BlockSpec((K, N), lambda i: (0, 0)),
            pl.BlockSpec((1, N), lambda i: (0, 0)),
        ],
        out_specs=pl.BlockSpec((tm, N), lambda i: (i, 0)),
        compiler_params=_compiler_params(("parallel",)),
    )(xb, w.astype(jnp.bfloat16), bias.reshape(1, N).astype(jnp.float32))
    return out[:M] if Mp != M else out


def matmul_bias_downsample_add_relu(x2d, w3, b3, xd2d, wd, bd, *, out_dtype):
    """Fused conv3 + bn3 + downsample(1x1 conv + bn) + add + ReLU."""
    M, K = x2d.shape
    Kd = xd2d.shape[1]
    N = w3.shape[1]
    tm, Mp = _pick_tm(M)
    xb = _maybe_pad_rows(x2d.astype(jnp.bfloat16), Mp)
    xdb = _maybe_pad_rows(xd2d.astype(jnp.bfloat16), Mp)
    out = pl.pallas_call(
        _mm_bias_ds_add_relu_kernel,
        out_shape=jax.ShapeDtypeStruct((Mp, N), out_dtype),
        grid=(Mp // tm,),
        in_specs=[
            pl.BlockSpec((tm, K), lambda i: (i, 0)),
            pl.BlockSpec((K, N), lambda i: (0, 0)),
            pl.BlockSpec((1, N), lambda i: (0, 0)),
            pl.BlockSpec((tm, Kd), lambda i: (i, 0)),
            pl.BlockSpec((Kd, N), lambda i: (0, 0)),
            pl.BlockSpec((1, N), lambda i: (0, 0)),
        ],
        out_specs=pl.BlockSpec((tm, N), lambda i: (i, 0)),
        compiler_params=_compiler_params(("parallel",)),
    )(xb, w3.astype(jnp.bfloat16), b3.reshape(1, N).astype(jnp.float32),
      xdb, wd.astype(jnp.bfloat16), bd.reshape(1, N).astype(jnp.float32))
    return out[:M] if Mp != M else out


def matmul_bias_residual_add_relu(x2d, w3, b3, res2d, *, out_dtype):
    """Fused conv3 + bn3 + identity residual (bf16 stream) + ReLU."""
    M, K = x2d.shape
    N = w3.shape[1]
    tm, Mp = _pick_tm(M)
    xb = _maybe_pad_rows(x2d.astype(jnp.bfloat16), Mp)
    rb = _maybe_pad_rows(res2d.astype(jnp.bfloat16), Mp)
    out = pl.pallas_call(
        _mm_bias_res_add_relu_kernel,
        out_shape=jax.ShapeDtypeStruct((Mp, N), out_dtype),
        grid=(Mp // tm,),
        in_specs=[
            pl.BlockSpec((tm, K), lambda i: (i, 0)),
            pl.BlockSpec((K, N), lambda i: (0, 0)),
            pl.BlockSpec((1, N), lambda i: (0, 0)),
            pl.BlockSpec((tm, N), lambda i: (i, 0)),
        ],
        out_specs=pl.BlockSpec((tm, N), lambda i: (i, 0)),
        compiler_params=_compiler_params(("parallel",)),
    )(xb, w3.astype(jnp.bfloat16), b3.reshape(1, N).astype(jnp.float32), rb)
    return out[:M] if Mp != M else out


def conv3x3_bn_relu(y, w2, b2, stride):
    """3x3 conv (pad=1, stride in {1,2}) + folded-BN bias + ReLU.

    y: (N, H, W, C) bf16.  w2: (3, 3, C, Cout) HWIO bf16 with BN scale folded.
    Returns ((N*Ho*Wo, Cout) bf16, (Ho, Wo)).
    """
    N, H, W, C = y.shape
    Cout = w2.shape[-1]
    Ho = (H + 2 - 3) // stride + 1
    Wo = (W + 2 - 3) // stride + 1
    TH = _pick_th(Ho, Wo)
    n_rb = Ho // TH
    yp = jnp.pad(y, ((0, 0), (1, 1), (1, 1), (0, 0)))
    w2f = w2.reshape(9, C, Cout).astype(jnp.bfloat16)
    b2f = b2.reshape(1, Cout).astype(jnp.float32)

    if stride == 1:
        kernel = functools.partial(_conv3x3_s1_kernel, TH, Wo)
        in_specs = [
            pl.BlockSpec((1, H + 2, W + 2, C), lambda n, rb: (n, 0, 0, 0)),
            pl.BlockSpec((9, C, Cout), lambda n, rb: (0, 0, 0)),
            pl.BlockSpec((1, Cout), lambda n, rb: (0, 0)),
        ]
        args = (yp, w2f, b2f)
    elif stride == 2:
        # Parity split so every tap becomes a dense unit-stride in-kernel slab.
        rows, cols = Ho + 1, Wo + 1
        parts = []
        for ph in range(2):
            for pw in range(2):
                p = yp[:, ph::2, pw::2, :][:, :rows, :cols, :]
                pad_r, pad_c = rows - p.shape[1], cols - p.shape[2]
                if pad_r or pad_c:
                    p = jnp.pad(p, ((0, 0), (0, pad_r), (0, pad_c), (0, 0)))
                parts.append(p)
        kernel = functools.partial(_conv3x3_s2_kernel, TH, Wo)
        in_specs = [pl.BlockSpec((1, rows, cols, C), lambda n, rb: (n, 0, 0, 0))
                    for _ in parts]
        in_specs += [
            pl.BlockSpec((9, C, Cout), lambda n, rb: (0, 0, 0)),
            pl.BlockSpec((1, Cout), lambda n, rb: (0, 0)),
        ]
        args = (*parts, w2f, b2f)
    else:
        raise NotImplementedError("stride must be 1 or 2")

    out = pl.pallas_call(
        kernel,
        out_shape=jax.ShapeDtypeStruct((N, Ho, Wo, Cout), jnp.bfloat16),
        grid=(N, n_rb),
        in_specs=in_specs,
        out_specs=pl.BlockSpec((1, TH, Wo, Cout), lambda n, rb: (n, rb, 0, 0)),
        compiler_params=_compiler_params(("parallel", "arbitrary")),
    )(*args)
    return out.reshape(N * Ho * Wo, Cout), (Ho, Wo)


# ----------------------------------------------------------------------------
# Parameters: conv weights + inference BatchNorm folded into (weight, bias)
# ----------------------------------------------------------------------------
def fold_bn(gamma, beta, mean, var, eps=1e-5):
    scale = gamma / jnp.sqrt(var + eps)
    return scale, beta - mean * scale


def init_params(key, inplanes, planes, stride):
    expansion = 4
    outplanes = planes * expansion
    ks = jax.random.split(key, 8)

    def bn_params(k, c):
        k1, k2, k3, k4 = jax.random.split(k, 4)
        gamma = 1.0 + 0.1 * jax.random.normal(k1, (c,), jnp.float32)
        beta = 0.1 * jax.random.normal(k2, (c,), jnp.float32)
        mean = 0.1 * jax.random.normal(k3, (c,), jnp.float32)
        var = 1.0 + 0.1 * jax.random.uniform(k4, (c,), jnp.float32)
        return fold_bn(gamma, beta, mean, var)

    p = {}
    w1 = 0.1 * jax.random.normal(ks[0], (inplanes, planes), jnp.float32)
    s1, p["b1"] = bn_params(ks[1], planes)
    p["w1"] = (w1 * s1[None, :]).astype(jnp.bfloat16)

    w2 = 0.1 * jax.random.normal(ks[2], (3, 3, planes, planes), jnp.float32)
    s2, p["b2"] = bn_params(ks[3], planes)
    p["w2"] = (w2 * s2[None, None, None, :]).astype(jnp.bfloat16)

    w3 = 0.1 * jax.random.normal(ks[4], (planes, outplanes), jnp.float32)
    s3, p["b3"] = bn_params(ks[5], outplanes)
    p["w3"] = (w3 * s3[None, :]).astype(jnp.bfloat16)

    # Downsample branch only when the PyTorch module would create one.
    if stride != 1 or inplanes != outplanes:
        wd = 0.1 * jax.random.normal(ks[6], (inplanes, outplanes), jnp.float32)
        sd, p["bd"] = bn_params(ks[7], outplanes)
        p["wd"] = (wd * sd[None, :]).astype(jnp.bfloat16)
    return p


# ----------------------------------------------------------------------------
# Bottleneck forward
# ----------------------------------------------------------------------------
def bottleneck_forward(x_nchw, params, stride):
    N, Cin, H, W = x_nchw.shape
    # Single bf16 cast of the input activation, reused by conv1 and the
    # residual / downsample branch.
    x = jnp.transpose(x_nchw, (0, 2, 3, 1)).astype(jnp.bfloat16)  # NHWC bf16
    x2d = x.reshape(N * H * W, Cin)

    planes = params["w1"].shape[1]
    outC = params["w3"].shape[1]

    # conv1 (1x1) + bn1 + relu
    y1 = matmul_bias(x2d, params["w1"], params["b1"], relu=True,
                     out_dtype=jnp.bfloat16)
    y1 = y1.reshape(N, H, W, planes)

    # conv2 (3x3, stride, pad=1) + bn2 + relu -- row-blocked 9-tap MXU dots
    y2, (Ho, Wo) = conv3x3_bn_relu(y1, params["w2"], params["b2"], stride)

    # conv3 (1x1) + bn3 + residual + relu (downsample fused into the kernel)
    if "wd" in params:
        x_ds = x[:, ::stride, ::stride, :] if stride != 1 else x
        xd2d = x_ds.reshape(N * Ho * Wo, Cin)
        out = matmul_bias_downsample_add_relu(
            y2, params["w3"], params["b3"], xd2d, params["wd"], params["bd"],
            out_dtype=jnp.float32)
    else:
        # PyTorch identity skip (stride == 1 and inplanes == 4 * planes).
        out = matmul_bias_residual_add_relu(
            y2, params["w3"], params["b3"], x2d, out_dtype=jnp.float32)

    out = out.reshape(N, Ho, Wo, outC)
    return jnp.transpose(out, (0, 3, 1, 2))  # NCHW


# ----------------------------------------------------------------------------
# Pure-JAX reference (mirrors the kernel's bf16/f32 strategy) for validation
# ----------------------------------------------------------------------------
def reference_forward(x_nchw, params, stride):
    x = jnp.transpose(x_nchw, (0, 2, 3, 1))
    planes = params["w1"].shape[1]
    outC = params["w3"].shape[1]

    def conv(inp, w_hwio, s, padding):
        return lax.conv_general_dilated(
            inp.astype(jnp.bfloat16), w_hwio.astype(jnp.bfloat16),
            window_strides=(s, s), padding=padding,
            dimension_numbers=("NHWC", "HWIO", "NHWC"),
            preferred_element_type=jnp.float32)

    y = conv(x, params["w1"].reshape(1, 1, -1, planes), 1, "VALID") + params["b1"]
    y = jnp.maximum(y, 0.0).astype(jnp.bfloat16)
    y = conv(y, params["w2"], stride, [(1, 1), (1, 1)]) + params["b2"]
    y = jnp.maximum(y, 0.0).astype(jnp.bfloat16)
    y = conv(y, params["w3"].reshape(1, 1, -1, outC), 1, "VALID") + params["b3"]
    if "wd" in params:
        r = conv(x, params["wd"].reshape(1, 1, -1, outC), stride, "VALID") + params["bd"]
    else:
        r = x.astype(jnp.bfloat16).astype(jnp.float32)  # mirror bf16 residual stream
    y = jnp.maximum(y + r, 0.0)
    return jnp.transpose(y, (0, 3, 1, 2))


if __name__ == "__main__":
    fwd = jax.jit(bottleneck_forward, static_argnums=2)
    key = jax.random.PRNGKey(0)
    kx_a, kp_a, kx_b, kp_b = jax.random.split(key, 4)

    # Config A: stride-2 bottleneck with a downsample branch (lane-dense channels).
    N, Cin, H, W = 2, 64, 16, 16
    planes, stride, expansion = 128, 2, 4
    x_a = jax.random.normal(kx_a, (N, Cin, H, W), jnp.float32)
    params_a = init_params(kp_a, Cin, planes, stride)
    out_a = jax.block_until_ready(fwd(x_a, params_a, stride))
    assert out_a.shape == (N, planes * expansion, H // stride, W // stride), out_a.shape
    assert bool(jnp.all(out_a >= 0.0))
    ref_a = reference_forward(x_a, params_a, stride)
    assert bool(jnp.allclose(out_a, ref_a, atol=5e-2, rtol=5e-2))

    # Config B: stride-1, inplanes == 4*planes -> identity skip (downsample=None).
    Cin_b, planes_b, Hb = 512, 128, 8
    x_b = jax.random.normal(kx_b, (N, Cin_b, Hb, Hb), jnp.float32)
    params_b = init_params(kp_b, Cin_b, planes_b, 1)
    out_b = jax.block_until_ready(fwd(x_b, params_b, 1))
    assert out_b.shape == (N, planes_b * expansion, Hb, Hb), out_b.shape
    assert bool(jnp.all(out_b >= 0.0))
    ref_b = reference_forward(x_b, params_b, 1)
    assert bool(jnp.allclose(out_b, ref_b, atol=5e-2, rtol=5e-2))

    print("KERNEL_OK")
</pallas_src>

<mosaic_0001>
module attributes {stable_mosaic.version = 11 : i64} {
  func.func @_mm_bias_kernel(%arg0: i32, %arg1: memref<256x64xbf16, #tpu.memory_space<vmem>>, %arg2: memref<64x128xbf16, #tpu.memory_space<vmem>>, %arg3: memref<1x128xf32, #tpu.memory_space<vmem>>, %arg4: memref<256x128xbf16, #tpu.memory_space<vmem>>) attributes {dimension_semantics = [#tpu.dimension_semantics<parallel>], iteration_bounds = array<i64: 2>, scalar_prefetch = 0 : i64, scratch_operands = 0 : i64, tpu.core_type = #tpu.core_type<tc>, window_params = [{transform_indices = @transform_0, window_bounds = array<i64: 256, 64>}, {pipeline_mode = #tpu.pipeline_mode<synchronous>, transform_indices = @transform_1, window_bounds = array<i64: 64, 128>}, {pipeline_mode = #tpu.pipeline_mode<synchronous>, transform_indices = @transform_2, window_bounds = array<i64: 1, 128>}, {transform_indices = @transform_3, window_bounds = array<i64: 256, 128>}]} {
    %c0 = arith.constant 0 : index
    %c0_0 = arith.constant 0 : index
    %0 = vector.load %arg1[%c0, %c0_0] : memref<256x64xbf16, #tpu.memory_space<vmem>>, vector<256x64xbf16>
    %c0_1 = arith.constant 0 : index
    %c0_2 = arith.constant 0 : index
    %1 = vector.load %arg2[%c0_1, %c0_2] : memref<64x128xbf16, #tpu.memory_space<vmem>>, vector<64x128xbf16>
    %cst = arith.constant dense<0.000000e+00> : vector<256x128xf32>
    %2 = tpu.matmul %0, %1, %cst {dimension_numbers = #tpu.dot_dimension_numbers<[1], [0], [0], [1], [0, 0, 1, 1], [], []>} : vector<256x64xbf16>, vector<64x128xbf16>, vector<256x128xf32> -> vector<256x128xf32>
    %c0_3 = arith.constant 0 : index
    %c0_4 = arith.constant 0 : index
    %3 = vector.load %arg3[%c0_3, %c0_4] : memref<1x128xf32, #tpu.memory_space<vmem>>, vector<1x128xf32>
    %4 = vector.broadcast %3 : vector<1x128xf32> to vector<256x128xf32>
    %5 = arith.addf %2, %4 : vector<256x128xf32>
    %cst_5 = arith.constant 0.000000e+00 : f32
    %6 = vector.broadcast %cst_5 : f32 to vector<256x128xf32>
    %7 = arith.maximumf %5, %6 : vector<256x128xf32>
    %8 = arith.truncf %7 : vector<256x128xf32> to vector<256x128xbf16>
    %c0_6 = arith.constant 0 : index
    %c0_7 = arith.constant 0 : index
    %9 = vector.load %arg4[%c0_6, %c0_7] : memref<256x128xbf16, #tpu.memory_space<vmem>>, vector<256x128xbf16>
    tpu.vector_store %arg4[%c0_6, %c0_7], %8 {strides = array<i32>} : memref<256x128xbf16, #tpu.memory_space<vmem>>, vector<256x128xbf16>,
    return
  }
  func.func @transform_0(%arg0: i32) -> (i32, i32) {
    %c0_i32 = arith.constant 0 : i32
    %c0_i32_0 = arith.constant 0 : i32
    return %arg0, %c0_i32 : i32, i32
  }
  func.func @transform_1(%arg0: i32) -> (i32, i32) {
    %c0_i32 = arith.constant 0 : i32
    %c0_i32_0 = arith.constant 0 : i32
    %c0_i32_1 = arith.constant 0 : i32
    return %c0_i32, %c0_i32_0 : i32, i32
  }
  func.func @transform_2(%arg0: i32) -> (i32, i32) {
    %c0_i32 = arith.constant 0 : i32
    %c0_i32_0 = arith.constant 0 : i32
    %c0_i32_1 = arith.constant 0 : i32
    return %c0_i32, %c0_i32_0 : i32, i32
  }
  func.func @transform_3(%arg0: i32) -> (i32, i32) {
    %c0_i32 = arith.constant 0 : i32
    %c0_i32_0 = arith.constant 0 : i32
    return %arg0, %c0_i32 : i32, i32
  }
}

module attributes {stable_mosaic.version = 11 : i64} {
  func.func @_conv3x3_s2_kernel(%arg0: i32, %arg1: i32, %arg2: memref<1x9x9x128xbf16, #tpu.memory_space<vmem>>, %arg3: memref<1x9x9x128xbf16, #tpu.memory_space<vmem>>, %arg4: memref<1x9x9x128xbf16, #tpu.memory_space<vmem>>, %arg5: memref<1x9x9x128xbf16, #tpu.memory_space<vmem>>, %arg6: memref<9x128x128xbf16, #tpu.memory_space<vmem>>, %arg7: memref<1x128xf32, #tpu.memory_space<vmem>>, %arg8: memref<1x8x8x128xbf16, #tpu.memory_space<vmem>>) attributes {dimension_semantics = [#tpu.dimension_semantics<parallel>, #tpu.dimension_semantics<arbitrary>], iteration_bounds = array<i64: 2, 1>, scalar_prefetch = 0 : i64, scratch_operands = 0 : i64, tpu.core_type = #tpu.core_type<tc>, window_params = [{transform_indices = @transform_0, window_bounds = array<i64: 1, 9, 9, 128>}, {transform_indices = @transform_1, window_bounds = array<i64: 1, 9, 9, 128>}, {transform_indices = @transform_2, window_bounds = array<i64: 1, 9, 9, 128>}, {transform_indices = @transform_3, window_bounds = array<i64: 1, 9, 9, 128>}, {pipeline_mode = #tpu.pipeline_mode<synchronous>, transform_indices = @transform_4, window_bounds = array<i64: 9, 128, 128>}, {pipeline_mode = #tpu.pipeline_mode<synchronous>, transform_indices = @transform_5, window_bounds = array<i64: 1, 128>}, {transform_indices = @transform_6, window_bounds = array<i64: 1, 8, 8, 128>}]} {
    %c8_i32 = arith.constant 8 : i32
    %0 = arith.muli %arg1, %c8_i32 : i32
    %cst = arith.constant 0.000000e+00 : f32
    %1 = vector.broadcast %cst : f32 to vector<64x128xf32>
    %c0_i32 = arith.constant 0 : i32
    %2 = arith.addi %0, %c0_i32 : i32
    %c0 = arith.constant 0 : index
    %3 = arith.index_cast %2 : i32 to index
    %c0_0 = arith.constant 0 : index
    %c0_1 = arith.constant 0 : index
    %4 = vector.load %arg2[%c0, %3, %c0_0, %c0_1] : memref<1x9x9x128xbf16, #tpu.memory_space<vmem>>, vector<1x8x8x128xbf16>
    %5 = vector.shape_cast %4 : vector<1x8x8x128xbf16> to vector<8x8x128xbf16>
    %6 = vector.shape_cast %5 : vector<8x8x128xbf16> to vector<64x128xbf16>
    %c0_2 = arith.constant 0 : index
    %c0_3 = arith.constant 0 : index
    %c0_4 = arith.constant 0 : index
    %7 = vector.load %arg6[%c0_2, %c0_3, %c0_4] : memref<9x128x128xbf16, #tpu.memory_space<vmem>>, vector<1x128x128xbf16>
    %8 = vector.shape_cast %7 : vector<1x128x128xbf16> to vector<128x128xbf16>
    %cst_5 = arith.constant dense<0.000000e+00> : vector<64x128xf32>
    %9 = tpu.matmul %6, %8, %cst_5 {dimension_numbers = #tpu.dot_dimension_numbers<[1], [0], [0], [1], [0, 0, 1, 1], [], []>} : vector<64x128xbf16>, vector<128x128xbf16>, vector<64x128xf32> -> vector<64x128xf32>
    %10 = arith.addf %1, %9 : vector<64x128xf32>
    %c0_i32_6 = arith.constant 0 : i32
    %11 = arith.addi %0, %c0_i32_6 : i32
    %c0_7 = arith.constant 0 : index
    %12 = arith.index_cast %11 : i32 to index
    %c0_8 = arith.constant 0 : index
    %c0_9 = arith.constant 0 : index
    %13 = vector.load %arg3[%c0_7, %12, %c0_8, %c0_9] : memref<1x9x9x128xbf16, #tpu.memory_space<vmem>>, vector<1x8x8x128xbf16>
    %14 = vector.shape_cast %13 : vector<1x8x8x128xbf16> to vector<8x8x128xbf16>
    %15 = vector.shape_cast %14 : vector<8x8x128xbf16> to vector<64x128xbf16>
    %c1 = arith.constant 1 : index
    %c0_10 = arith.constant 0 : index
    %c0_11 = arith.constant 0 : index
    %16 = vector.load %arg6[%c1, %c0_10, %c0_11] : memref<9x128x128xbf16, #tpu.memory_space<vmem>>, vector<1x128x128xbf16>
    %17 = vector.shape_cast %16 : vector<1x128x128xbf16> to vector<128x128xbf16>
    %cst_12 = arith.constant dense<0.000000e+00> : vector<64x128xf32>
    %18 = tpu.matmul %15, %17, %cst_12 {dimension_numbers = #tpu.dot_dimension_numbers<[1], [0], [0], [1], [0, 0, 1, 1], [], []>} : vector<64x128xbf16>, vector<128x128xbf16>, vector<64x128xf32> -> vector<64x128xf32>
    %19 = arith.addf %10, %18 : vector<64x128xf32>
    %c0_i32_13 = arith.constant 0 : i32
    %20 = arith.addi %0, %c0_i32_13 : i32
    %c0_14 = arith.constant 0 : index
    %21 = arith.index_cast %20 : i32 to index
    %c1_15 = arith.constant 1 : index
    %c0_16 = arith.constant 0 : index
    %22 = vector.load %arg2[%c0_14, %21, %c1_15, %c0_16] : memref<1x9x9x128xbf16, #tpu.memory_space<vmem>>, vector<1x8x8x128xbf16>
    %23 = vector.shape_cast %22 : vector<1x8x8x128xbf16> to vector<8x8x128xbf16>
    %24 = vector.shape_cast %23 : vector<8x8x128xbf16> to vector<64x128xbf16>
    %c2 = arith.constant 2 : index
    %c0_17 = arith.constant 0 : index
    %c0_18 = arith.constant 0 : index
    %25 = vector.load %arg6[%c2, %c0_17, %c0_18] : memref<9x128x128xbf16, #tpu.memory_space<vmem>>, vector<1x128x128xbf16>
    %26 = vector.shape_cast %25 : vector<1x128x128xbf16> to vector<128x128xbf16>
    %cst_19 = arith.constant dense<0.000000e+00> : vector<64x128xf32>
    %27 = tpu.matmul %24, %26, %cst_19 {dimension_numbers = #tpu.dot_dimension_numbers<[1], [0], [0], [1], [0, 0, 1, 1], [], []>} : vector<64x128xbf16>, vector<128x128xbf16>, vector<64x128xf32> -> vector<64x128xf32>
    %28 = arith.addf %19, %27 : vector<64x128xf32>
    %c0_i32_20 = arith.constant 0 : i32
    %29 = arith.addi %0, %c0_i32_20 : i32
    %c0_21 = arith.constant 0 : index
    %30 = arith.index_cast %29 : i32 to index
    %c0_22 = arith.constant 0 : index
    %c0_23 = arith.constant 0 : index
    %31 = vector.load %arg4[%c0_21, %30, %c0_22, %c0_23] : memref<1x9x9x128xbf16, #tpu.memory_space<vmem>>, vector<1x8x8x128xbf16>
    %32 = vector.shape_cast %31 : vector<1x8x8x128xbf16> to vector<8x8x128xbf16>
    %33 = vector.shape_cast %32 : vector<8x8x128xbf16> to vector<64x128xbf16>
    %c3 = arith.constant 3 : index
    %c0_24 = arith.constant 0 : index
    %c0_25 = arith.constant 0 : index
    %34 = vector.load %arg6[%c3, %c0_24, %c0_25] : memref<9x128x128xbf16, #tpu.memory_space<vmem>>, vector<1x128x128xbf16>
    %35 = vector.shape_cast %34 : vector<1x128x128xbf16> to vector<128x128xbf16>
    %cst_26 = arith.constant dense<0.000000e+00> : vector<64x128xf32>
    %36 = tpu.matmul %33, %35, %cst_26 {dimension_numbers = #tpu.dot_dimension_numbers<[1], [0], [0], [1], [0, 0, 1, 1], [], []>} : vector<64x128xbf16>, vector<128x128xbf16>, vector<64x128xf32> -> vector<64x128xf32>
    %37 = arith.addf %28, %36 : vector<64x128xf32>
    %c0_i32_27 = arith.constant 0 : i32
    %38 = arith.addi %0, %c0_i32_27 : i32
    %c0_28 = arith.constant 0 : index
    %39 = arith.index_cast %38 : i32 to index
    %c0_29 = arith.constant 0 : index
    %c0_30 = arith.constant 0 : index
    %40 = vector.load %arg5[%c0_28, %39, %c0_29, %c0_30] : memref<1x9x9x128xbf16, #tpu.memory_space<vmem>>, vector<1x8x8x128xbf16>
    %41 = vector.shape_cast %40 : vector<1x8x8x128xbf16> to vector<8x8x128xbf16>
    %42 = vector.shape_cast %41 : vector<8x8x128xbf16> to vector<64x128xbf16>
    %c4 = arith.constant 4 : index
    %c0_31 = arith.constant 0 : index
    %c0_32 = arith.constant 0 : index
    %43 = vector.load %arg6[%c4, %c0_31, %c0_32] : memref<9x128x128xbf16, #tpu.memory_space<vmem>>, vector<1x128x128xbf16>
    %44 = vector.shape_cast %43 : vector<1x128x128xbf16> to vector<128x128xbf16>
    %cst_33 = arith.constant dense<0.000000e+00> : vector<64x128xf32>
    %45 = tpu.matmul %42, %44, %cst_33 {dimension_numbers = #tpu.dot_dimension_numbers<[1], [0], [0], [1], [0, 0, 1, 1], [], []>} : vector<64x128xbf16>, vector<128x128xbf16>, vector<64x128xf32> -> vector<64x128xf32>
    %46 = arith.addf %37, %45 : vector<64x128xf32>
    %c0_i32_34 = arith.constant 0 : i32
    %47 = arith.addi %0, %c0_i32_34 : i32
    %c0_35 = arith.constant 0 : index
    %48 = arith.index_cast %47 : i32 to index
    %c1_36 = arith.constant 1 : index
    %c0_37 = arith.constant 0 : index
    %49 = vector.load %arg4[%c0_35, %48, %c1_36, %c0_37] : memref<1x9x9x128xbf16, #tpu.memory_space<vmem>>, vector<1x8x8x128xbf16>
    %50 = vector.shape_cast %49 : vector<1x8x8x128xbf16> to vector<8x8x128xbf16>
    %51 = vector.shape_cast %50 : vector<8x8x128xbf16> to vector<64x128xbf16>
    %c5 = arith.constant 5 : index
    %c0_38 = arith.constant 0 : index
    %c0_39 = arith.constant 0 : index
    %52 = vector.load %arg6[%c5, %c0_38, %c0_39] : memref<9x128x128xbf16, #tpu.memory_space<vmem>>, vector<1x128x128xbf16>
    %53 = vector.shape_cast %52 : vector<1x128x128xbf16> to vector<128x128xbf16>
    %cst_40 = arith.constant dense<0.000000e+00> : vector<64x128xf32>
    %54 = tpu.matmul %51, %53, %cst_40 {dimension_numbers = #tpu.dot_dimension_numbers<[1], [0], [0], [1], [0, 0, 1, 1], [], []>} : vector<64x128xbf16>, vector<128x128xbf16>, vector<64x128xf32> -> vector<64x128xf32>
    %55 = arith.addf %46, %54 : vector<64x128xf32>
    %c1_i32 = arith.constant 1 : i32
    %56 = arith.addi %0, %c1_i32 : i32
    %c0_41 = arith.constant 0 : index
    %57 = arith.index_cast %56 : i32 to index
    %c0_42 = arith.constant 0 : index
    %c0_43 = arith.constant 0 : index
    %58 = vector.load %arg2[%c0_41, %57, %c0_42, %c0_43] : memref<1x9x9x128xbf16, #tpu.memory_space<vmem>>, vector<1x8x8x128xbf16>
    %59 = vector.shape_cast %58 : vector<1x8x8x128xbf16> to vector<8x8x128xbf16>
    %60 = vector.shape_cast %59 : vector<8x8x128xbf16> to vector<64x128xbf16>
    %c6 = arith.constant 6 : index
    %c0_44 = arith.constant 0 : index
    %c0_45 = arith.constant 0 : index
    %61 = vector.load %arg6[%c6, %c0_44, %c0_45] : memref<9x128x128xbf16, #tpu.memory_space<vmem>>, vector<1x128x128xbf16>
    %62 = vector.shape_cast %61 : vector<1x128x128xbf16> to vector<128x128xbf16>
    %cst_46 = arith.constant dense<0.000000e+00> : vector<64x128xf32>
    %63 = tpu.matmul %60, %62, %cst_46 {dimension_numbers = #tpu.dot_dimension_numbers<[1], [0], [0], [1], [0, 0, 1, 1], [], []>} : vector<64x128xbf16>, vector<128x128xbf16>, vector<64x128xf32> -> vector<64x128xf32>
    %64 = arith.addf %55, %63 : vector<64x128xf32>
    %c1_i32_47 = arith.constant 1 : i32
    %65 = arith.addi %0, %c1_i32_47 : i32
    %c0_48 = arith.constant 0 : index
    %66 = arith.index_cast %65 : i32 to index
    %c0_49 = arith.constant 0 : index
    %c0_50 = arith.constant 0 : index
    %67 = vector.load %arg3[%c0_48, %66, %c0_49, %c0_50] : memref<1x9x9x128xbf16, #tpu.memory_space<vmem>>, vector<1x8x8x128xbf16>
    %68 = vector.shape_cast %67 : vector<1x8x8x128xbf16> to vector<8x8x128xbf16>
    %69 = vector.shape_cast %68 : vector<8x8x128xbf16> to vector<64x128xbf16>
    %c7 = arith.constant 7 : index
    %c0_51 = arith.constant 0 : index
    %c0_52 = arith.constant 0 : index
    %70 = vector.load %arg6[%c7, %c0_51, %c0_52] : memref<9x128x128xbf16, #tpu.memory_space<vmem>>, vector<1x128x128xbf16>
    %71 = vector.shape_cast %70 : vector<1x128x128xbf16> to vector<128x128xbf16>
    %cst_53 = arith.constant dense<0.000000e+00> : vector<64x128xf32>
    %72 = tpu.matmul %69, %71, %cst_53 {dimension_numbers = #tpu.dot_dimension_numbers<[1], [0], [0], [1], [0, 0, 1, 1], [], []>} : vector<64x128xbf16>, vector<128x128xbf16>, vector<64x128xf32> -> vector<64x128xf32>
    %73 = arith.addf %64, %72 : vector<64x128xf32>
    %c1_i32_54 = arith.constant 1 : i32
    %74 = arith.addi %0, %c1_i32_54 : i32
    %c0_55 = arith.constant 0 : index
    %75 = arith.index_cast %74 : i32 to index
    %c1_56 = arith.constant 1 : index
    %c0_57 = arith.constant 0 : index
    %76 = vector.load %arg2[%c0_55, %75, %c1_56, %c0_57] : memref<1x9x9x128xbf16, #tpu.memory_space<vmem>>, vector<1x8x8x128xbf16>
    %77 = vector.shape_cast %76 : vector<1x8x8x128xbf16> to vector<8x8x128xbf16>
    %78 = vector.shape_cast %77 : vector<8x8x128xbf16> to vector<64x128xbf16>
    %c8 = arith.constant 8 : index
    %c0_58 = arith.constant 0 : index
    %c0_59 = arith.constant 0 : index
    %79 = vector.load %arg6[%c8, %c0_58, %c0_59] : memref<9x128x128xbf16, #tpu.memory_space<vmem>>, vector<1x128x128xbf16>
    %80 = vector.shape_cast %79 : vector<1x128x128xbf16> to vector<128x128xbf16>
    %cst_60 = arith.constant dense<0.000000e+00> : vector<64x128xf32>
    %81 = tpu.matmul %78, %80, %cst_60 {dimension_numbers = #tpu.dot_dimension_numbers<[1], [0], [0], [1], [0, 0, 1, 1], [], []>} : vector<64x128xbf16>, vector<128x128xbf16>, vector<64x128xf32> -> vector<64x128xf32>
    %82 = arith.addf %73, %81 : vector<64x128xf32>
    %c0_61 = arith.constant 0 : index
    %c0_62 = arith.constant 0 : index
    %83 = vector.load %arg7[%c0_61, %c0_62] : memref<1x128xf32, #tpu.memory_space<vmem>>, vector<1x128xf32>
    %84 = vector.broadcast %83 : vector<1x128xf32> to vector<64x128xf32>
    %85 = arith.addf %82, %84 : vector<64x128xf32>
    %cst_63 = arith.constant 0.000000e+00 : f32
    %86 = vector.broadcast %cst_63 : f32 to vector<64x128xf32>
    %87 = arith.maximumf %85, %86 : vector<64x128xf32>
    %88 = vector.shape_cast %87 : vector<64x128xf32> to vector<1x8x8x128xf32>
    %89 = arith.truncf %88 : vector<1x8x8x128xf32> to vector<1x8x8x128xbf16>
    %c0_64 = arith.constant 0 : index
    %c0_65 = arith.constant 0 : index
    %c0_66 = arith.constant 0 : index
    %c0_67 = arith.constant 0 : index
    %90 = vector.load %arg8[%c0_64, %c0_65, %c0_66, %c0_67] : memref<1x8x8x128xbf16, #tpu.memory_space<vmem>>, vector<1x8x8x128xbf16>
    tpu.vector_store %arg8[%c0_64, %c0_65, %c0_66, %c0_67], %89 {strides = array<i32>} : memref<1x8x8x128xbf16, #tpu.memory_space<vmem>>, vector<1x8x8x128xbf16>,
    return
  }
  func.func @transform_0(%arg0: i32, %arg1: i32) -> (i32, i32, i32, i32) {
    %c0_i32 = arith.constant 0 : i32
    %c0_i32_0 = arith.constant 0 : i32
    %c0_i32_1 = arith.constant 0 : i32
    %c0_i32_2 = arith.constant 0 : i32
    return %arg0, %c0_i32, %c0_i32_0, %c0_i32_1 : i32, i32, i32, i32
  }
  func.func @transform_1(%arg0: i32, %arg1: i32) -> (i32, i32, i32, i32) {
    %c0_i32 = arith.constant 0 : i32
    %c0_i32_0 = arith.constant 0 : i32
    %c0_i32_1 = arith.constant 0 : i32
    %c0_i32_2 = arith.constant 0 : i32
    return %arg0, %c0_i32, %c0_i32_0, %c0_i32_1 : i32, i32, i32, i32
  }
  func.func @transform_2(%arg0: i32, %arg1: i32) -> (i32, i32, i32, i32) {
    %c0_i32 = arith.constant 0 : i32
    %c0_i32_0 = arith.constant 0 : i32
    %c0_i32_1 = arith.constant 0 : i32
    %c0_i32_2 = arith.constant 0 : i32
    return %arg0, %c0_i32, %c0_i32_0, %c0_i32_1 : i32, i32, i32, i32
  }
  func.func @transform_3(%arg0: i32, %arg1: i32) -> (i32, i32, i32, i32) {
    %c0_i32 = arith.constant 0 : i32
    %c0_i32_0 = arith.constant 0 : i32
    %c0_i32_1 = arith.constant 0 : i32
    %c0_i32_2 = arith.constant 0 : i32
    return %arg0, %c0_i32, %c0_i32_0, %c0_i32_1 : i32, i32, i32, i32
  }
  func.func @transform_4(%arg0: i32, %arg1: i32) -> (i32, i32, i32) {
    %c0_i32 = arith.constant 0 : i32
    %c0_i32_0 = arith.constant 0 : i32
    %c0_i32_1 = arith.constant 0 : i32
    %c0_i32_2 = arith.constant 0 : i32
    return %c0_i32, %c0_i32_0, %c0_i32_1 : i32, i32, i32
  }
  func.func @transform_5(%arg0: i32, %arg1: i32) -> (i32, i32) {
    %c0_i32 = arith.constant 0 : i32
    %c0_i32_0 = arith.constant 0 : i32
    %c0_i32_1 = arith.constant 0 : i32
    return %c0_i32, %c0_i32_0 : i32, i32
  }
  func.func @transform_6(%arg0: i32, %arg1: i32) -> (i32, i32, i32, i32) {
    %c0_i32 = arith.constant 0 : i32
    %c0_i32_0 = arith.constant 0 : i32
    %c0_i32_1 = arith.constant 0 : i32
    return %arg0, %arg1, %c0_i32, %c0_i32_0 : i32, i32, i32, i32
  }
}

module attributes {stable_mosaic.version = 11 : i64} {
  func.func @_mm_bias_ds_add_relu_kernel(%arg0: i32, %arg1: memref<128x128xbf16, #tpu.memory_space<vmem>>, %arg2: memref<128x512xbf16, #tpu.memory_space<vmem>>, %arg3: memref<1x512xf32, #tpu.memory_space<vmem>>, %arg4: memref<128x64xbf16, #tpu.memory_space<vmem>>, %arg5: memref<64x512xbf16, #tpu.memory_space<vmem>>, %arg6: memref<1x512xf32, #tpu.memory_space<vmem>>, %arg7: memref<128x512xf32, #tpu.memory_space<vmem>>) attributes {dimension_semantics = [#tpu.dimension_semantics<parallel>], iteration_bounds = array<i64: 1>, scalar_prefetch = 0 : i64, scratch_operands = 0 : i64, tpu.core_type = #tpu.core_type<tc>, window_params = [{transform_indices = @transform_0, window_bounds = array<i64: 128, 128>}, {pipeline_mode = #tpu.pipeline_mode<synchronous>, transform_indices = @transform_1, window_bounds = array<i64: 128, 512>}, {pipeline_mode = #tpu.pipeline_mode<synchronous>, transform_indices = @transform_2, window_bounds = array<i64: 1, 512>}, {transform_indices = @transform_3, window_bounds = array<i64: 128, 64>}, {pipeline_mode = #tpu.pipeline_mode<synchronous>, transform_indices = @transform_4, window_bounds = array<i64: 64, 512>}, {pipeline_mode = #tpu.pipeline_mode<synchronous>, transform_indices = @transform_5, window_bounds = array<i64: 1, 512>}, {transform_indices = @transform_6, window_bounds = array<i64: 128, 512>}]} {
    %c0 = arith.constant 0 : index
    %c0_0 = arith.constant 0 : index
    %0 = vector.load %arg1[%c0, %c0_0] : memref<128x128xbf16, #tpu.memory_space<vmem>>, vector<128x128xbf16>
    %c0_1 = arith.constant 0 : index
    %c0_2 = arith.constant 0 : index
    %1 = vector.load %arg2[%c0_1, %c0_2] : memref<128x512xbf16, #tpu.memory_space<vmem>>, vector<128x512xbf16>
    %cst = arith.constant dense<0.000000e+00> : vector<128x512xf32>
    %2 = tpu.matmul %0, %1, %cst {dimension_numbers = #tpu.dot_dimension_numbers<[1], [0], [0], [1], [0, 0, 1, 1], [], []>} : vector<128x128xbf16>, vector<128x512xbf16>, vector<128x512xf32> -> vector<128x512xf32>
    %c0_3 = arith.constant 0 : index
    %c0_4 = arith.constant 0 : index
    %3 = vector.load %arg3[%c0_3, %c0_4] : memref<1x512xf32, #tpu.memory_space<vmem>>, vector<1x512xf32>
    %4 = vector.broadcast %3 : vector<1x512xf32> to vector<128x512xf32>
    %5 = arith.addf %2, %4 : vector<128x512xf32>
    %c0_5 = arith.constant 0 : index
    %c0_6 = arith.constant 0 : index
    %6 = vector.load %arg4[%c0_5, %c0_6] : memref<128x64xbf16, #tpu.memory_space<vmem>>, vector<128x64xbf16>
    %c0_7 = arith.constant 0 : index
    %c0_8 = arith.constant 0 : index
    %7 = vector.load %arg5[%c0_7, %c0_8] : memref<64x512xbf16, #tpu.memory_space<vmem>>, vector<64x512xbf16>
    %cst_9 = arith.constant dense<0.000000e+00> : vector<128x512xf32>
    %8 = tpu.matmul %6, %7, %cst_9 {dimension_numbers = #tpu.dot_dimension_numbers<[1], [0], [0], [1], [0, 0, 1, 1], [], []>} : vector<128x64xbf16>, vector<64x512xbf16>, vector<128x512xf32> -> vector<128x512xf32>
    %c0_10 = arith.constant 0 : index
    %c0_11 = arith.constant 0 : index
    %9 = vector.load %arg6[%c0_10, %c0_11] : memref<1x512xf32, #tpu.memory_space<vmem>>, vector<1x512xf32>
    %10 = vector.broadcast %9 : vector<1x512xf32> to vector<128x512xf32>
    %11 = arith.addf %8, %10 : vector<128x512xf32>
    %12 = arith.addf %5, %11 : vector<128x512xf32>
    %cst_12 = arith.constant 0.000000e+00 : f32
    %13 = vector.broadcast %cst_12 : f32 to vector<128x512xf32>
    %14 = arith.maximumf %12, %13 : vector<128x512xf32>
    %c0_13 = arith.constant 0 : index
    %c0_14 = arith.constant 0 : index
    %15 = vector.load %arg7[%c0_13, %c0_14] : memref<128x512xf32, #tpu.memory_space<vmem>>, vector<128x512xf32>
    tpu.vector_store %arg7[%c0_13, %c0_14], %14 {strides = array<i32>} : memref<128x512xf32, #tpu.memory_space<vmem>>, vector<128x512xf32>,
    return
  }
  func.func @transform_0(%arg0: i32) -> (i32, i32) {
    %c0_i32 = arith.constant 0 : i32
    %c0_i32_0 = arith.constant 0 : i32
    return %arg0, %c0_i32 : i32, i32
  }
  func.func @transform_1(%arg0: i32) -> (i32, i32) {
    %c0_i32 = arith.constant 0 : i32
    %c0_i32_0 = arith.constant 0 : i32
    %c0_i32_1 = arith.constant 0 : i32
    return %c0_i32, %c0_i32_0 : i32, i32
  }
  func.func @transform_2(%arg0: i32) -> (i32, i32) {
    %c0_i32 = arith.constant 0 : i32
    %c0_i32_0 = arith.constant 0 : i32
    %c0_i32_1 = arith.constant 0 : i32
    return %c0_i32, %c0_i32_0 : i32, i32
  }
  func.func @transform_3(%arg0: i32) -> (i32, i32) {
    %c0_i32 = arith.constant 0 : i32
    %c0_i32_0 = arith.constant 0 : i32
    return %arg0, %c0_i32 : i32, i32
  }
  func.func @transform_4(%arg0: i32) -> (i32, i32) {
    %c0_i32 = arith.constant 0 : i32
    %c0_i32_0 = arith.constant 0 : i32
    %c0_i32_1 = arith.constant 0 : i32
    return %c0_i32, %c0_i32_0 : i32, i32
  }
  func.func @transform_5(%arg0: i32) -> (i32, i32) {
    %c0_i32 = arith.constant 0 : i32
    %c0_i32_0 = arith.constant 0 : i32
    %c0_i32_1 = arith.constant 0 : i32
    return %c0_i32, %c0_i32_0 : i32, i32
  }
  func.func @transform_6(%arg0: i32) -> (i32, i32) {
    %c0_i32 = arith.constant 0 : i32
    %c0_i32_0 = arith.constant 0 : i32
    return %arg0, %c0_i32 : i32, i32
  }
}

</mosaic_0001>

<bundles_post_ra>
// kernel: bottleneck_forward.3
= control target key start
LH: loop header
LB: loop body
LE: loop exit
PB: predicated region body
PF: predicated region fallthrough
CT: control target
= control target key end

     0   :  { %8 = vsyncpa [#allocation3], 0  ;;  %s1771_s0 = inlined_call_operand.hbm [shape: bf16[512,64], index: 0, kind: input, shape index: {}]   ;;  %s1772_s1 = inlined_call_operand.hbm [shape: bf16[64,128], index: 1, kind: input, shape index: {}]   ;;  %s1773_s2 = inlined_call_operand.hbm [shape: f32[1,128], index: 2, kind: input, shape index: {}]   ;;  %s1774_s3 = inlined_call_operand.hbm [shape: bf16[512,128], index: 3, kind: output, shape index: {}]  }
   0x1   :  { %10 = vsyncpa [#allocation3 + $0x1], 0 }
   0x2   :  { %11 = vsyncpa [#allocation6], 0 }
   0x3   :  { %12 = vsyncpa [#allocation4], 0 }
   0x4   :  { %14 = vsyncpa [#allocation4 + $0x1], 0  ;;  %s1439_s12 = smov 0   ;;  %s1441_s13 = smov 0  }
   0x5   :  { %s1443_s14 = smov 0   ;;  %s1445_s15 = smov 0  }
   0x6 LB: > { %s1460_s16 = sadd.s32 4294967295, %s1409_s15   ;;  %s878_s17 = sadd.s32 4294967294, %s1409_s15   ;;  %s1409_s15 = sphi %s1445_s15, %s1794_s15   ;;  %s1405_s14 = sphi %s1443_s14, %s1793_s14   ;;  %s1401_s13 = sphi %s1441_s13, %s1792_s13   ;;  %s1397_s12 = sphi %s1439_s12, %s1791_s12  }
   0x7   : > { %p40_p0 = scmp.ne.s32.totalorder %s1401_s13, %s1397_s12  ;;  %p1775_p1 = scmp.eq.s32.totalorder %s1460_s16, 0 }
   0x8   : > { %p112_p3 = scmp.eq.s32.totalorder %s878_s17, 1  ;;  %p879_p5 = scmp.ge.s32.totalorder %s1409_s15, 1 }
   0x9   : > { %p1469_p4 = por %p1775_p1, %p40_p0  ;;  %p119_p7 = scmp.lt.s32.totalorder %s1409_s15, 3 }
   0xa   : > { %p1474_p6 = por %p112_p3, %p40_p0  ;;  %s1411_s21 = smov [#allocation5]  }
   0xb   : > { %s1778_s18 = scalar_select %p1469_p4, 1, 0 }
   0xc   : > { %s1779_s19 = scalar_select %p1474_p6, 1, 0 }
   0xd   : > { %p1479_p8 = pnand %p879_p5, %p119_p7  ;;  %s131_s22 = sshll.u32 %s1411_s21, 4  ;;  %s1483_s22 = int_to_ptr.vmem [resolvable:$true] %s131_s22 }
   0xe   : > { %s1412_s24 = smov [#allocation7]   ;;  %s1253_s28 = scalar_lea.hbm %s1772_s1, 512 }
   0xf   : > { %p1174_p9 = pneg %p1479_p8  ;;  %s145_s25 = sshll.u32 %s1412_s24, 4  ;;  %s1494_s25 = int_to_ptr.vmem [resolvable:$true] %s145_s25 }
  0x10   : > { %p1254_p12 = scmp.ne.s32.totalorder %s1772_s1, %s1253_s28  ;;  %p1260_p5 = scmp.lt.u32.totalorder %s1253_s28, %s1772_s1 }
  0x11   : > { %p1490_p11 = pnand %p1174_p9, %p1775_p1 }
  0x13   : > { %p1255_p13 = pneg %p1490_p11 }
  0x15   : > { %p1256_p0 = pnand %p1255_p13, %p1254_p12 }
  0x17   : > { %p1257_p3 = pneg %p1256_p0 }
  0x19   : > { %p1262_p7 = pnand %p1260_p5, %p1257_p3 }
  0x1b   : > { %1265 = shalt.err (!%p1262_p7)
}
  0x1c   : > { %s1266_s6 = scalar_lea.vmem %s1483_s22, 512  ;;  %p1274_p2 = scmp.lt.s32.totalorder %s1483_s22, %s1483_s22 }
  0x1d   : > { %p1267_p9 = scmp.ne.s32.totalorder %s1483_s22, %s1266_s6  ;;  %p1275_p12 = scmp.lt.s32.totalorder %s1266_s6, %s1266_s6 }
  0x1f   : > { %p1269_p10 = pnand %p1267_p9, %p1255_p13  ;;  %p1276_p0 = por %p1275_p12, %p1274_p2 }
  0x21   : > { %p1270_p1 = pneg %p1269_p10 }
  0x23   : > { %p1277_p6 = pnand %p1276_p0, %p1270_p1 }
  0x25   : > { %1280 = shalt.err (!%p1277_p6)
}
  0x26   : > { %s1413_s7 = smov 64   ;;  %s1414_s8 = smov 4  }
  0x27   : > { %1177 = dma.hbm_to_vmem [thread:$0]  (!%p1490_p11), %s1772_s1, 512, %s1483_s22, [#allocation6], %s1413_s7, %s1413_s7, %s1414_s8  }
  0x28   : > { %s1281_s21 = scalar_lea.hbm %s1773_s2, 16 }
  0x29   : > { %p1282_p1 = scmp.ne.s32.totalorder %s1773_s2, %s1281_s21  ;;  %p1288_p10 = scmp.lt.u32.totalorder %s1281_s21, %s1773_s2 }
  0x2b   : > { %p1284_p2 = pnand %p1282_p1, %p1255_p13 }
  0x2d   : > { %p1285_p6 = pneg %p1284_p2 }
  0x2f   : > { %p1290_p3 = pnand %p1288_p10, %p1285_p6 }
  0x31   : > { %1293 = shalt.err (!%p1290_p3)
}
  0x32   : > { %s1294_s22 = scalar_lea.vmem %s1494_s25, 16  ;;  %s1301_s29 = scalar_lea.vmem %s1494_s25, 32 }
  0x33   : > { %p1295_p5 = scmp.ne.s32.totalorder %s1494_s25, %s1294_s22  ;;  %p1302_p12 = scmp.lt.s32.totalorder %s1494_s25, %s1494_s25 }
  0x34   : > { %p1303_p0 = scmp.lt.s32.totalorder %s1301_s29, %s1294_s22 }
  0x35   : > { %p1297_p7 = pnand %p1295_p5, %p1255_p13 }
  0x36   : > { %p1304_p1 = por %p1303_p0, %p1302_p12 }
  0x37   : > { %p1298_p9 = pneg %p1297_p7 }
  0x39   : > { %p1305_p2 = pnand %p1304_p1, %p1298_p9 }
  0x3b   : > { %1308 = shalt.err (!%p1305_p2)
}
  0x3c   : > { %1180 = dma.hbm_to_vmem [thread:$0]  (!%p1490_p11), %s1773_s2, 16, %s1494_s25, [#allocation6]  }
  0x3d   : > { %s1553_s5 = sadd.s32 1, %s1409_s15   ;;  %s27_s23 = sadd.s32 1, %s1405_s14 }
  0x3e   : > { %s24_s6 = ssub.s32 %s1409_s15, %s1553_s5  ;;  %p34_p13 = scmp.ne.s32.totalorder %s1405_s14, %s1401_s13 }
  0x3f   : > { %p25_p6 = scmp.eq.s32.totalorder %s24_s6, 0  ;;  %p35_p10 = scmp.eq.s32.totalorder %s1409_s15, 0 }
  0x40   : > { %p1782_p3 = scmp.eq.s32.totalorder %s1460_s16, 1  ;;  %p1191_p7 = scmp.lt.s32.totalorder %s1409_s15, 2 }
  0x41   : > { %s1569_s10 = scalar_select %p25_p6, %s1405_s14, %s27_s23  }
  0x42   : > { %p1563_p5 = por %p1782_p3, %p34_p13  ;;  %p36_p9 = por %p35_p10, %p34_p13 }
  0x43   : > { %s156_s11 = sand.u32 1, %s1405_s14   ;;  %s965_s25 = sshll.u32 %s1409_s15, 11 }
  0x44   : > { %s1783_s9 = scalar_select %p1563_p5, 1, 0 }
  0x45   : > { %s883_s17 = sshll.u32 %s156_s11, 7  ;;  %s1576_s26 = scalar_lea.hbm %s1771_s0, %s965_s25 }
  0x46   : > { %s160_s27 = scalar_lea.vmem [#allocation2], %s883_s17  ;;  %p1580_p11 = pnand %p1191_p7, %p36_p9 }
  0x47   : > { %s167_s28 = sshll.u32 %s160_s27, 4  ;;  %s1584_s29 = scalar_lea.sflag [#allocation3], %s156_s11  ;;  %s1578_s28 = int_to_ptr.vmem [resolvable:$true] %s167_s28 }
  0x48   : > { %s1309_s30 = scalar_lea.hbm %s1576_s26, 2048  ;;  %p1311_p0 = pneg %p1580_p11 }
  0x49   : > { %p1310_p12 = scmp.ne.s32.totalorder %s1576_s26, %s1309_s30  ;;  %s1314_s6 = scalar_lea.hbm %s1771_s0, 4096 }
  0x4a   : > { %p1315_p13 = scmp.lt.u32.totalorder %s1576_s26, %s1771_s0  ;;  %p1316_p6 = scmp.lt.u32.totalorder %s1314_s6, %s1309_s30 }
  0x4b   : > { %p1312_p1 = pnand %p1311_p0, %p1310_p12  ;;  %p1318_p3 = scmp.lt.u32.totalorder %s1309_s30, %s1576_s26 }
  0x4c   : > { %p1317_p10 = por %p1316_p6, %p1315_p13 }
  0x4d   : > { %p1313_p2 = pneg %p1312_p1 }
  0x4e   : > { %p1319_p7 = por %p1318_p3, %p1317_p10 }
  0x50   : > { %p1320_p9 = pnand %p1319_p7, %p1313_p2 }
  0x52   : > { %1323 = shalt.err (!%p1320_p9)
}
  0x53   : > { %s1324_s11 = scalar_lea.vmem %s1578_s28, 2048  ;;  %s1415_s21 = smov [#allocation2]  }
  0x54   : > { %p1325_p12 = scmp.ne.s32.totalorder %s1578_s28, %s1324_s11  ;;  %s1329_s24 = sshll.u32 %s1415_s21, 4  ;;  %s1330_s24 = int_to_ptr.vmem [resolvable:$false] %s1329_s24 }
  0x55   : > { %s1331_s27 = scalar_lea.vmem %s1330_s24, 4096  ;;  %p1332_p4 = scmp.lt.s32.totalorder %s1578_s28, %s1330_s24 }
  0x56   : > { %p1327_p1 = pnand %p1325_p12, %p1311_p0  ;;  %p1333_p13 = scmp.lt.s32.totalorder %s1331_s27, %s1324_s11 }
  0x58   : > { %p1328_p5 = pneg %p1327_p1  ;;  %p1334_p6 = por %p1333_p13, %p1332_p4 }
  0x5a   : > { %p1335_p10 = pnand %p1334_p6, %p1328_p5 }
  0x5c   : > { %1338 = shalt.err (!%p1335_p10)
}
  0x5d   : > { %1184 = dma.hbm_to_vmem [thread:$0]  (!%p1580_p11), %s1576_s26, 2048, %s1578_s28, %s1584_s29, %s1413_s7, %s1413_s7, %s1414_s8  }
  0x5e   : > { %179 = sbr.rel (%p1479_p8) target bundleno = 382 (0x17e), region = 32  ;;  %s1618_s30 = sand.u32 (!%p1479_p8), 1, %s1401_s13  }
  0x5f   : > { %s887_s4 = sshll.u32 (!%p1479_p8), %s1618_s30, 7  ;;  %s182_s23 = scalar_lea.sflag (!%p1479_p8), [#allocation3], %s1618_s30 }
  0x60   : > { %s1624_s22 = scalar_lea.vmem (!%p1479_p8), [#allocation2], %s887_s4  ;;  %p1785_p4 = scmp.ne.s32.totalorder (!%p1479_p8), %s1778_s18, 0 }
  0x65   : > { %1384 = dma.done.wait (%p1785_p4), %s182_s23, 2048  }
  0x66   : > { %1386 = vsyncadd (%p1785_p4), %s182_s23, 4294965248  ;;  %p1786_p5 = scmp.eq.s32.totalorder %s1460_s16, 0 }
  0x68   : > { %1388 = dma.done.wait (%p1786_p5), [#allocation6], 528   ;;  %p1787_p8 = pmov %p1786_p5 }
  0x69   : > { %v1233_v0 = vld [vmem:[#allocation5] sm:$0xff]   ;;  %v1234_v1 = vld [vmem:[#allocation5 + $0x8] sm:$0xff]   ;;  %v1235_v2 = vld [vmem:[#allocation5 + $0x10] sm:$0xff]   ;;  %vm370_vm0 = vcmask 523264   ;;  %s1678_s18 = scalar_lea.vmem [#allocation8], %s887_s4  ;;  %s998_s20 = sshll.u32 %s1460_s16, 11 }
  0x6a   : > { %1390 = vsyncadd (%p1787_p8), [#allocation6], 4294966768  ;;  %1114 = vmatprep.subr.bf16.mxu0 %v1233_v0  ;;  %1154 = vmatprep.subr.bf16.mxu1 %v1233_v0  ;;  %v1237_v3 = vld [vmem:[%s1624_s22] sm:$0xff]   ;;  %v1236_v5 = vld [vmem:[#allocation5 + $0x18] sm:$0xff]   ;;  %s786_s7 = sshll.u32 %s1678_s18, 4  ;;  %s1721_s16 = scalar_lea.hbm %s1774_s3, %s998_s20  ;;  %s1723_s7 = int_to_ptr.vmem [resolvable:$true] %s786_s7 }
  0x6b   : > { %1115 = vmatpush3.bf16.msra.mxu0 %v1233_v0  ;;  %1158 = vmatpush3.bf16.msra.mxu1 %v1233_v0  ;;  %v1238_v4 = vld [vmem:[%s1624_s22 + $0x40] sm:$0xff]   ;;  %v1239_v6 = vld [vmem:[%s1624_s22 + $0x8] sm:$0xff]   ;;  %v1241_v8 = vld [vmem:[%s1624_s22 + $0x10] sm:$0xff]   ;;  %s773_s28 = scalar_lea.sflag [#allocation4], %s1618_s30  ;;  %s1339_s29 = scalar_lea.vmem %s1723_s7, 2048 }
  0x6c   : > { %1116 = vmatprep.subr.bf16.mxu0 %v1234_v1  ;;  %1155 = vmatprep.subr.bf16.mxu1 %v1234_v1  ;;  %v1240_v7 = vld [vmem:[%s1624_s22 + $0x48] sm:$0xff]   ;;  %v1242_v9 = vld [vmem:[%s1624_s22 + $0x50] sm:$0xff]   ;;  %v1243_v10 = vld [vmem:[%s1624_s22 + $0x18] sm:$0xff]   ;;  %p1340_p11 = scmp.ne.s32.totalorder %s1723_s7, %s1339_s29  ;;  %p1788_p0 = scmp.ne.s32.totalorder %s1783_s9, 0 }
  0x6d   : > { %1122 = vmatprep.mubr.msk.bf16.mxu0 %vm370_vm0, %v1237_v3  ;;  %1138 = vmatprep.mubr.msk.bf16.mxu1 %vm370_vm0, %v1238_v4  ;;  %v1244_v11 = vld [vmem:[%s1624_s22 + $0x58] sm:$0xff]   ;;  %v1245_v12 = vld [vmem:[%s1624_s22 + $0x20] sm:$0xff]   ;;  %v1247_v14 = vld [vmem:[%s1624_s22 + $0x28] sm:$0xff]   ;;  %s1416_s6 = smov [#allocation8]  }
  0x6e   : > { %v1246_v13 = vld [vmem:[%s1624_s22 + $0x60] sm:$0xff]   ;;  %v1248_v15 = vld [vmem:[%s1624_s22 + $0x68] sm:$0xff]   ;;  %v1249_v16 = vld [vmem:[%s1624_s22 + $0x30] sm:$0xff]   ;;  %p1341_p2 = pnand %p1340_p11, %p1788_p0  ;;  %s1343_s17 = sshll.u32 %s1416_s6, 4  ;;  %s1344_s17 = int_to_ptr.vmem [resolvable:$false] %s1343_s17 }
  0x6f   : > { %1117 = vmatpush3.bf16.msra.mxu0 %v1234_v1  ;;  %1159 = vmatpush3.bf16.msra.mxu1 %v1234_v1  ;;  %v1250_v17 = vld [vmem:[%s1624_s22 + $0x70] sm:$0xff]   ;;  %v1251_v18 = vld [vmem:[%s1624_s22 + $0x38] sm:$0xff]   ;;  %v1666_v20 = vld [vmem:[#allocation7] ss:$0 sm:$0xff]  ;;  %s1345_s25 = scalar_lea.vmem %s1344_s17, 4096  ;;  %p1346_p7 = scmp.lt.s32.totalorder %s1723_s7, %s1344_s17 }
  0x70   : > { %1118 = vmatprep.subr.bf16.mxu0 %v1235_v2  ;;  %1156 = vmatprep.subr.bf16.mxu1 %v1235_v2  ;;  %v1252_v19 = vld [vmem:[%s1624_s22 + $0x78] sm:$0xff]   ;;  %p1342_p3 = pneg %p1341_p2  ;;  %p1347_p9 = scmp.lt.s32.totalorder %s1345_s25, %s1339_s29 }
  0x72   : > { %p1348_p12 = por %p1347_p9, %p1346_p7 }
  0x73   : > { %1119 = vmatpush3.bf16.msra.mxu0 %v1235_v2  ;;  %1160 = vmatpush3.bf16.msra.mxu1 %v1235_v2 }
  0x74   : > { %1120 = vmatprep.subr.bf16.mxu0 %v1236_v5  ;;  %1157 = vmatprep.subr.bf16.mxu1 %v1236_v5  ;;  %p1349_p1 = pnand %p1348_p12, %p1342_p3 }
  0x77   : > { %1121 = vmatpush3.bf16.msra.mxu0 %v1236_v5  ;;  %1161 = vmatpush3.bf16.msra.mxu1 %v1236_v5 }
  0x7a   : > { %1123 = vmatmul.mubr.msk.bf16.vlgmr.msra.gmra.mrb[0].mxu0 %vm370_vm0, %v1239_v6  ;;  %1139 = vmatmul.mubr.msk.bf16.vlgmr.msra.gmra.mrb[0].mxu1 %vm370_vm0, %v1240_v7 }
  0x7b   : > { %1126 = vmatprep.mubr.msk.bf16.mxu0 %vm370_vm0, %v1241_v8  ;;  %1142 = vmatprep.mubr.msk.bf16.mxu1 %vm370_vm0, %v1242_v9 }
  0x82   : > { %1127 = vmatmul.mubr.msk.bf16.gmra.mrb[4].mxu0 %vm370_vm0, %v1243_v10  ;;  %1143 = vmatmul.mubr.msk.bf16.gmra.mrb[4].mxu1 %vm370_vm0, %v1244_v11 }
  0x83   : > { %1130 = vmatprep.mubr.msk.bf16.mxu0 %vm370_vm0, %v1245_v12  ;;  %1146 = vmatprep.mubr.msk.bf16.mxu1 %vm370_vm0, %v1246_v13 }
  0x8a   : > { %1131 = vmatmul.mubr.msk.bf16.gmra.mrb[8].mxu0 %vm370_vm0, %v1247_v14  ;;  %1147 = vmatmul.mubr.msk.bf16.gmra.mrb[8].mxu1 %vm370_vm0, %v1248_v15 }
  0x8b   : > { %1134 = vmatprep.mubr.msk.bf16.mxu0 %vm370_vm0, %v1249_v16  ;;  %1150 = vmatprep.mubr.msk.bf16.mxu1 %vm370_vm0, %v1250_v17 }
  0x92   : > { %1135 = vmatmul.mubr.msk.bf16.gmra.mrb[12].mxu0 %vm370_vm0, %v1251_v18  ;;  %1151 = vmatmul.mubr.msk.bf16.gmra.mrb[12].mxu1 %vm370_vm0, %v1252_v19 }
 0x14d   : > { %v1124_v21 = vpop.f32.mrb[0].mxu0  ;;  %v1140_v22 = vpop.f32.mrb[0].mxu1 }
 0x14e   : > { %v462_v23 = vadd.f32 %v1124_v21, %v1666_v20  ;;  %v526_v24 = vadd.f32 %v1140_v22, %v1666_v20  ;;  %v453_v25 = vpop.f32.mrb[1].mxu0  ;;  %v517_v26 = vpop.f32.mrb[1].mxu1 }
 0x14f   : > { %v454_v27 = vadd.f32 %v1666_v20, %v453_v25  ;;  %v518_v28 = vadd.f32 %v1666_v20, %v517_v26  ;;  %v1125_v29 = vpop.f32.mrb[2].mxu0  ;;  %v1141_v30 = vpop.f32.mrb[2].mxu1 }
 0x150   : > { %v465_v31 = vadd.f32 %v1125_v29, %v1666_v20  ;;  %v529_v32 = vadd.f32 %v1141_v30, %v1666_v20  ;;  %v456_v33 = vpop.f32.mrb[3].mxu0  ;;  %v520_v34 = vpop.f32.mrb[3].mxu1  ;;  %v582_v37 = vmax.f32 %v462_v23, 0.0  ;;  %v598_v38 = vmax.f32 %v526_v24, 0.0 }
 0x151   : > { %v457_v35 = vadd.f32 %v1666_v20, %v456_v33  ;;  %v521_v36 = vadd.f32 %v1666_v20, %v520_v34  ;;  %v580_v41 = vmax.f32 %v454_v27, 0.0  ;;  %v596_v42 = vmax.f32 %v518_v28, 0.0 }
 0x152   : > { %v583_v39 = vmax.f32 %v465_v31, 0.0  ;;  %v599_v40 = vmax.f32 %v529_v32, 0.0 }
 0x153   : > { %v581_v43 = vmax.f32 %v457_v35, 0.0  ;;  %v597_v44 = vmax.f32 %v521_v36, 0.0 }
 0x154   : > { %v1007_v45 = vpack.c.bf16 %v583_v39, %v582_v37  ;;  %v1047_v46 = vpack.c.bf16 %v599_v40, %v598_v38 }
 0x155   : > { %v1002_v47 = vpack.c.bf16 %v581_v43, %v580_v41  ;;  %v1042_v48 = vpack.c.bf16 %v597_v44, %v596_v42  ;;  %v1128_v49 = vpop.f32.mrb[4].mxu0  ;;  %v1144_v50 = vpop.f32.mrb[4].mxu1 }
 0x156   : > { %1079 = vst [vmem:[%s1678_s18 + $0x8] sm:$0xff] %v1007_v45   ;;  %1087 = vst [vmem:[%s1678_s18 + $0x48] sm:$0xff] %v1047_v46   ;;  %v478_v51 = vadd.f32 %v1128_v49, %v1666_v20  ;;  %v542_v52 = vadd.f32 %v1144_v50, %v1666_v20  ;;  %v469_v53 = vpop.f32.mrb[5].mxu0  ;;  %v533_v54 = vpop.f32.mrb[5].mxu1 }
 0x157   : > { %1003 = vst [vmem:[%s1678_s18] sm:$0xff] %v1002_v47   ;;  %1086 = vst [vmem:[%s1678_s18 + $0x40] sm:$0xff] %v1042_v48   ;;  %v470_v55 = vadd.f32 %v1666_v20, %v469_v53  ;;  %v534_v56 = vadd.f32 %v1666_v20, %v533_v54  ;;  %v1129_v57 = vpop.f32.mrb[6].mxu0  ;;  %v1145_v58 = vpop.f32.mrb[6].mxu1 }
 0x158   : > { %v481_v59 = vadd.f32 %v1129_v57, %v1666_v20  ;;  %v545_v60 = vadd.f32 %v1145_v58, %v1666_v20  ;;  %v472_v61 = vpop.f32.mrb[7].mxu0  ;;  %v536_v62 = vpop.f32.mrb[7].mxu1  ;;  %v586_v1 = vmax.f32 %v478_v51, 0.0  ;;  %v602_v2 = vmax.f32 %v542_v52, 0.0 }
 0x159   : > { %v473_v63 = vadd.f32 %v1666_v20, %v472_v61  ;;  %v537_v0 = vadd.f32 %v1666_v20, %v536_v62  ;;  %v584_v5 = vmax.f32 %v470_v55, 0.0  ;;  %v600_v6 = vmax.f32 %v534_v56, 0.0 }
 0x15a   : > { %v587_v3 = vmax.f32 %v481_v59, 0.0  ;;  %v603_v4 = vmax.f32 %v545_v60, 0.0 }
 0x15b   : > { %v585_v7 = vmax.f32 %v473_v63, 0.0  ;;  %v601_v8 = vmax.f32 %v537_v0, 0.0 }
 0x15c   : > { %v1017_v9 = vpack.c.bf16 %v587_v3, %v586_v1  ;;  %v1057_v10 = vpack.c.bf16 %v603_v4, %v602_v2 }
 0x15d   : > { %v1012_v11 = vpack.c.bf16 %v585_v7, %v584_v5  ;;  %v1052_v12 = vpack.c.bf16 %v601_v8, %v600_v6  ;;  %v1132_v13 = vpop.f32.mrb[8].mxu0  ;;  %v1148_v14 = vpop.f32.mrb[8].mxu1 }
 0x15e   : > { %1081 = vst [vmem:[%s1678_s18 + $0x18] sm:$0xff] %v1017_v9   ;;  %1089 = vst [vmem:[%s1678_s18 + $0x58] sm:$0xff] %v1057_v10   ;;  %v494_v15 = vadd.f32 %v1132_v13, %v1666_v20  ;;  %v558_v16 = vadd.f32 %v1148_v14, %v1666_v20  ;;  %v485_v17 = vpop.f32.mrb[9].mxu0  ;;  %v549_v18 = vpop.f32.mrb[9].mxu1 }
 0x15f   : > { %1080 = vst [vmem:[%s1678_s18 + $0x10] sm:$0xff] %v1012_v11   ;;  %1088 = vst [vmem:[%s1678_s18 + $0x50] sm:$0xff] %v1052_v12   ;;  %v486_v19 = vadd.f32 %v1666_v20, %v485_v17  ;;  %v550_v21 = vadd.f32 %v1666_v20, %v549_v18  ;;  %v1133_v22 = vpop.f32.mrb[10].mxu0  ;;  %v1149_v23 = vpop.f32.mrb[10].mxu1 }
 0x160   : > { %v497_v24 = vadd.f32 %v1133_v22, %v1666_v20  ;;  %v561_v25 = vadd.f32 %v1149_v23, %v1666_v20  ;;  %v488_v26 = vpop.f32.mrb[11].mxu0  ;;  %v552_v27 = vpop.f32.mrb[11].mxu1  ;;  %v590_v30 = vmax.f32 %v494_v15, 0.0  ;;  %v606_v31 = vmax.f32 %v558_v16, 0.0 }
 0x161   : > { %v489_v28 = vadd.f32 %v1666_v20, %v488_v26  ;;  %v553_v29 = vadd.f32 %v1666_v20, %v552_v27  ;;  %v588_v34 = vmax.f32 %v486_v19, 0.0  ;;  %v604_v35 = vmax.f32 %v550_v21, 0.0 }
 0x162   : > { %v591_v32 = vmax.f32 %v497_v24, 0.0  ;;  %v607_v33 = vmax.f32 %v561_v25, 0.0 }
 0x163   : > { %v589_v36 = vmax.f32 %v489_v28, 0.0  ;;  %v605_v37 = vmax.f32 %v553_v29, 0.0 }
 0x164   : > { %v1027_v38 = vpack.c.bf16 %v591_v32, %v590_v30  ;;  %v1067_v39 = vpack.c.bf16 %v607_v33, %v606_v31 }
 0x165   : > { %v1022_v40 = vpack.c.bf16 %v589_v36, %v588_v34  ;;  %v1062_v41 = vpack.c.bf16 %v605_v37, %v604_v35  ;;  %v1136_v42 = vpop.f32.mrb[12].mxu0  ;;  %v1152_v43 = vpop.f32.mrb[12].mxu1 }
 0x166   : > { %1083 = vst [vmem:[%s1678_s18 + $0x28] sm:$0xff] %v1027_v38   ;;  %1091 = vst [vmem:[%s1678_s18 + $0x68] sm:$0xff] %v1067_v39   ;;  %v510_v44 = vadd.f32 %v1136_v42, %v1666_v20  ;;  %v574_v45 = vadd.f32 %v1152_v43, %v1666_v20  ;;  %v501_v46 = vpop.f32.mrb[13].mxu0  ;;  %v565_v47 = vpop.f32.mrb[13].mxu1 }
 0x167   : > { %1082 = vst [vmem:[%s1678_s18 + $0x20] sm:$0xff] %v1022_v40   ;;  %1090 = vst [vmem:[%s1678_s18 + $0x60] sm:$0xff] %v1062_v41   ;;  %v502_v48 = vadd.f32 %v1666_v20, %v501_v46  ;;  %v566_v49 = vadd.f32 %v1666_v20, %v565_v47  ;;  %v1137_v50 = vpop.f32.mrb[14].mxu0  ;;  %v1153_v51 = vpop.f32.mrb[14].mxu1 }
 0x168   : > { %v513_v52 = vadd.f32 %v1137_v50, %v1666_v20  ;;  %v577_v53 = vadd.f32 %v1153_v51, %v1666_v20  ;;  %v504_v54 = vpop.f32.mrb[15].mxu0  ;;  %v568_v55 = vpop.f32.mrb[15].mxu1  ;;  %v594_v58 = vmax.f32 %v510_v44, 0.0  ;;  %v610_v59 = vmax.f32 %v574_v45, 0.0 }
 0x169   : > { %v505_v56 = vadd.f32 %v1666_v20, %v504_v54  ;;  %v569_v57 = vadd.f32 %v1666_v20, %v568_v55  ;;  %v592_v62 = vmax.f32 %v502_v48, 0.0  ;;  %v608_v63 = vmax.f32 %v566_v49, 0.0 }
 0x16a   : > { %v595_v60 = vmax.f32 %v513_v52, 0.0  ;;  %v611_v61 = vmax.f32 %v577_v53, 0.0 }
 0x16b   : > { %v593_v0 = vmax.f32 %v505_v56, 0.0  ;;  %v609_v1 = vmax.f32 %v569_v57, 0.0 }
 0x16c   : > { %v1037_v2 = vpack.c.bf16 %v595_v60, %v594_v58  ;;  %v1077_v3 = vpack.c.bf16 %v611_v61, %v610_v59 }
 0x16d   : > { %v1032_v20 = vpack.c.bf16 %v593_v0, %v592_v62  ;;  %v1072_v4 = vpack.c.bf16 %v609_v1, %v608_v63 }
 0x16e   : > { %1085 = vst [vmem:[%s1678_s18 + $0x38] sm:$0xff] %v1037_v2   ;;  %1093 = vst [vmem:[%s1678_s18 + $0x78] sm:$0xff] %v1077_v3  }
 0x16f   : > { %1084 = vst [vmem:[%s1678_s18 + $0x30] sm:$0xff] %v1032_v20   ;;  %1092 = vst [vmem:[%s1678_s18 + $0x70] sm:$0xff] %v1072_v4  }
 0x170   : > { %1352 = shalt.err (!%p1349_p1)
}
 0x171   : > { %s1353_s11 = scalar_lea.hbm %s1721_s16, 2048  ;;  %s1357_s27 = scalar_lea.hbm %s1774_s3, 4096 }
 0x172   : > { %p1354_p13 = scmp.ne.s32.totalorder %s1721_s16, %s1353_s11  ;;  %p1358_p4 = scmp.lt.u32.totalorder %s1721_s16, %s1774_s3 }
 0x173   : > { %p1359_p5 = scmp.lt.u32.totalorder %s1357_s27, %s1353_s11  ;;  %p1361_p11 = scmp.lt.u32.totalorder %s1353_s11, %s1721_s16 }
 0x174   : > { %p1355_p6 = pnand %p1354_p13, %p1788_p0 }
 0x175   : > { %p1360_p8 = por %p1359_p5, %p1358_p4 }
 0x176   : > { %p1356_p10 = pneg %p1355_p6 }
 0x177   : > { %p1362_p2 = por %p1361_p11, %p1360_p8 }
 0x179   : > { %p1363_p3 = pnand %p1362_p2, %p1356_p10 }
 0x17b   : > { %1366 = shalt.err (!%p1363_p3)
}
 0x17c   : > { %s1417_s22 = smov 64   ;;  %s1418_s18 = smov 4  }
 0x17d   : > { %1172 = dma.vmem_to_hbm [thread:$0]  (%p1788_p0), %s1723_s7, 2048, %s1721_s16, %s773_s28, %s1417_s22, %s1417_s22, %s1418_s18  }
 0x17e PF: > { %s801_s20 = sand.u32 1, %s1397_s12   ;;  %p1789_p7 = scmp.ne.s32.totalorder %s1779_s19, 0 }
 0x17f   : > { %p1790_p9 = scmp.ge.s32.totalorder %s1409_s15, 2  ;;  %s802_s8 = scalar_lea.sflag [#allocation4], %s801_s20 }
 0x181   : > { %p1186_p12 = pnand %p1790_p9, %p1789_p7 }
 0x183   : > { %1392 = dma.done.wait (!%p1186_p12), %s802_s8, 2048  }
 0x184   : > { %1394 = vsyncadd (!%p1186_p12), %s802_s8, 4294965248  ;;  %p17_p1 = scmp.ge.s32.totalorder %s1553_s5, 4   ;;  %s1791_s12 = smov %s1401_s13 }
 0x185   : > { %s1792_s13 = smov %s1405_s14  ;;  %s1793_s14 = smov %s1569_s10 }
 0x186   : > { %s1794_s15 = smov %s1553_s5  ;;  %19 = sbr.rel (!%p17_p1) target bundleno = 6 (0x6), region = 85 }
 0x18d   :  { %807 = vsyncpa [#allocation3], 1 }
 0x18e   :  { %809 = vsyncpa [#allocation3 + $0x1], 1 }
 0x18f   :  { %810 = vsyncpa [#allocation6], 1 }
 0x190   :  { %811 = vsyncpa [#allocation4], 1 }
 0x191   :  { %813 = vsyncpa [#allocation4 + $0x1], 1 }

// kernel: bottleneck_forward.5
= control target key start
LH: loop header
LB: loop body
LE: loop exit
PB: predicated region body
PF: predicated region fallthrough
CT: control target
= control target key end

     0   :  { %11 = vsyncpa [#allocation3], 0  ;;  %s2041_s0 = inlined_call_operand.hbm [shape: bf16[128,128], index: 0, kind: input, shape index: {}]   ;;  %s2042_s1 = inlined_call_operand.hbm [shape: bf16[128,512], index: 1, kind: input, shape index: {}]   ;;  %s2043_s2 = inlined_call_operand.hbm [shape: f32[1,512], index: 2, kind: input, shape index: {}]   ;;  %s2044_s3 = inlined_call_operand.hbm [shape: bf16[128,64], index: 3, kind: input, shape index: {}]   ;;  %s2045_s4 = inlined_call_operand.hbm [shape: bf16[64,512], index: 4, kind: input, shape index: {}]   ;;  %s2046_s5 = inlined_call_operand.hbm [shape: f32[1,512], index: 5, kind: input, shape index: {}]   ;;  %s2047_s6 = inlined_call_operand.hbm [shape: f32[128,512], index: 6, kind: output, shape index: {}]  }
   0x1   :  { %12 = vsyncpa [#allocation6], 0 }
   0x2   :  { %13 = vsyncpa [#allocation9], 0 }
   0x3   :  { %14 = vsyncpa [#allocation12], 0 }
   0x4   :  { %15 = vsyncpa [#allocation4], 0  ;;  %s1782_s21 = smov [#allocation5]   ;;  %s1618_s25 = scalar_lea.hbm %s2042_s1, 4096 }
   0x5   :  { %s33_s22 = sshll.u32 %s1782_s21, 4  ;;  %p1619_p0 = scmp.ne.s32.totalorder %s2042_s1, %s1618_s25  ;;  %s34_s22 = int_to_ptr.vmem [resolvable:$true] %s33_s22 }
   0x6   :  { %p1622_p1 = scmp.lt.u32.totalorder %s1618_s25, %s2042_s1 }
   0x8   :  { %p1624_p2 = pnand %p1622_p1, %p1619_p0 }
   0xa   :  { %1627 = shalt.err (!%p1624_p2)
}
   0xb   :  { %s1628_s30 = scalar_lea.vmem %s34_s22, 4096  ;;  %p1633_p4 = scmp.lt.s32.totalorder %s34_s22, %s34_s22 }
   0xc   :  { %p1629_p3 = scmp.ne.s32.totalorder %s34_s22, %s1628_s30  ;;  %p1634_p5 = scmp.lt.s32.totalorder %s1628_s30, %s1628_s30 }
   0xe   :  { %p1635_p6 = por %p1634_p5, %p1633_p4 }
  0x10   :  { %p1636_p7 = pnand %p1635_p6, %p1629_p3 }
  0x12   :  { %1639 = shalt.err (!%p1636_p7)
}
  0x13   :  { %s1783_s7 = smov 256   ;;  %s1784_s8 = smov 16  }
  0x14   :  { %39 = dma.hbm_to_vmem [thread:$0]  %s2042_s1, 4096, %s34_s22, [#allocation6], %s1783_s7, %s1783_s7, %s1784_s8  }
  0x15   :  { %s1785_s11 = smov [#allocation8]   ;;  %s1786_s13 = smov [#allocation2]  }
  0x16   :  { %s55_s12 = sshll.u32 %s1785_s11, 4  ;;  %s21_s14 = sshll.u32 %s1786_s13, 4  ;;  %s56_s12 = int_to_ptr.vmem [resolvable:$true] %s55_s12  ;;  %s22_s14 = int_to_ptr.vmem [resolvable:$true] %s21_s14 }
  0x17   :  { %s1640_s17 = scalar_lea.hbm %s2044_s3, 1024 }
  0x18   :  { %p1641_p8 = scmp.ne.s32.totalorder %s2044_s3, %s1640_s17  ;;  %p1644_p9 = scmp.lt.u32.totalorder %s1640_s17, %s2044_s3 }
  0x1a   :  { %p1646_p10 = pnand %p1644_p9, %p1641_p8 }
  0x1c   :  { %1649 = shalt.err (!%p1646_p10)
}
  0x1d   :  { %s1650_s1 = scalar_lea.vmem %s56_s12, 1024  ;;  %p1655_p12 = scmp.lt.s32.totalorder %s56_s12, %s56_s12 }
  0x1e   :  { %p1651_p11 = scmp.ne.s32.totalorder %s56_s12, %s1650_s1  ;;  %p1656_p13 = scmp.lt.s32.totalorder %s1650_s1, %s1650_s1 }
  0x20   :  { %p1657_p0 = por %p1656_p13, %p1655_p12 }
  0x22   :  { %p1658_p1 = pnand %p1657_p0, %p1651_p11 }
  0x24   :  { %1661 = shalt.err (!%p1658_p1)
}
  0x25   :  { %s1787_s22 = smov 64   ;;  %s1788_s23 = smov 4  }
  0x26   :  { %61 = dma.hbm_to_vmem [thread:$0]  %s2044_s3, 1024, %s56_s12, [#allocation9], %s1787_s22, %s1787_s22, %s1788_s23  }
  0x27   :  { %s1662_s28 = scalar_lea.hbm %s2041_s0, 1024 }
  0x28   :  { %p1663_p2 = scmp.ne.s32.totalorder %s2041_s0, %s1662_s28  ;;  %p1666_p3 = scmp.lt.u32.totalorder %s1662_s28, %s2041_s0 }
  0x2a   :  { %p1668_p4 = pnand %p1666_p3, %p1663_p2 }
  0x2c   :  { %1671 = shalt.err (!%p1668_p4)
}
  0x2d   :  { %s1672_s11 = scalar_lea.vmem %s22_s14, 1024  ;;  %p1677_p6 = scmp.lt.s32.totalorder %s22_s14, %s22_s14 }
  0x2e   :  { %p1673_p5 = scmp.ne.s32.totalorder %s22_s14, %s1672_s11  ;;  %p1678_p7 = scmp.lt.s32.totalorder %s1672_s11, %s1672_s11 }
  0x30   :  { %p1679_p8 = por %p1678_p7, %p1677_p6 }
  0x32   :  { %p1680_p9 = pnand %p1679_p8, %p1673_p5 }
  0x34   :  { %1683 = shalt.err (!%p1680_p9)
}
  0x35   :  { %27 = dma.hbm_to_vmem [thread:$0]  %s2041_s0, 1024, %s22_s14, [#allocation3], %s1787_s22, %s1787_s22, %s1788_s23  }
  0x36   :  { %s1789_s13 = smov [#allocation7]   ;;  %s1790_s16 = smov [#allocation10]  }
  0x37   :  { %s46_s15 = sshll.u32 %s1789_s13, 4  ;;  %s67_s17 = sshll.u32 %s1790_s16, 4  ;;  %s47_s15 = int_to_ptr.vmem [resolvable:$true] %s46_s15  ;;  %s68_s17 = int_to_ptr.vmem [resolvable:$true] %s67_s17 }
  0x38   :  { %s1684_s20 = scalar_lea.hbm %s2043_s2, 64 }
  0x39   :  { %p1685_p10 = scmp.ne.s32.totalorder %s2043_s2, %s1684_s20  ;;  %p1688_p11 = scmp.lt.u32.totalorder %s1684_s20, %s2043_s2 }
  0x3b   :  { %p1690_p12 = pnand %p1688_p11, %p1685_p10 }
  0x3d   :  { %1693 = shalt.err (!%p1690_p12)
}
  0x3e   :  { %s1694_s0 = scalar_lea.vmem %s47_s15, 64  ;;  %p1699_p0 = scmp.lt.s32.totalorder %s47_s15, %s47_s15 }
  0x3f   :  { %p1695_p13 = scmp.ne.s32.totalorder %s47_s15, %s1694_s0  ;;  %p1700_p1 = scmp.lt.s32.totalorder %s1694_s0, %s1694_s0 }
  0x41   :  { %p1701_p2 = por %p1700_p1, %p1699_p0 }
  0x43   :  { %p1702_p3 = pnand %p1701_p2, %p1695_p13 }
  0x45   :  { %1705 = shalt.err (!%p1702_p3)
}
  0x46   :  { %49 = dma.hbm_to_vmem [thread:$0]  %s2043_s2, 64, %s47_s15, [#allocation6]  }
  0x47   :  { %s1706_s27 = scalar_lea.hbm %s2045_s4, 2048 }
  0x48   :  { %p1707_p4 = scmp.ne.s32.totalorder %s2045_s4, %s1706_s27  ;;  %p1710_p5 = scmp.lt.u32.totalorder %s1706_s27, %s2045_s4 }
  0x4a   :  { %p1712_p6 = pnand %p1710_p5, %p1707_p4 }
  0x4c   :  { %1715 = shalt.err (!%p1712_p6)
}
  0x4d   :  { %s1716_s10 = scalar_lea.vmem %s68_s17, 2048  ;;  %p1721_p8 = scmp.lt.s32.totalorder %s68_s17, %s68_s17 }
  0x4e   :  { %p1717_p7 = scmp.ne.s32.totalorder %s68_s17, %s1716_s10  ;;  %p1722_p9 = scmp.lt.s32.totalorder %s1716_s10, %s1716_s10 }
  0x50   :  { %p1723_p10 = por %p1722_p9, %p1721_p8 }
  0x52   :  { %p1724_p11 = pnand %p1723_p10, %p1717_p7 }
  0x54   :  { %1727 = shalt.err (!%p1724_p11)
}
  0x55   :  { %73 = dma.hbm_to_vmem [thread:$0]  %s2045_s4, 2048, %s68_s17, [#allocation9], %s1783_s7, %s1783_s7, %s1784_s8  }
  0x56   :  { %s1791_s3 = smov [#allocation11]   ;;  %s1728_s16 = scalar_lea.hbm %s2046_s5, 64 }
  0x57   :  { %s80_s12 = sshll.u32 %s1791_s3, 4  ;;  %p1729_p12 = scmp.ne.s32.totalorder %s2046_s5, %s1728_s16  ;;  %s81_s12 = int_to_ptr.vmem [resolvable:$true] %s80_s12 }
  0x58   :  { %p1732_p13 = scmp.lt.u32.totalorder %s1728_s16, %s2046_s5 }
  0x5a   :  { %p1734_p0 = pnand %p1732_p13, %p1729_p12 }
  0x5c   :  { %1737 = shalt.err (!%p1734_p0)
}
  0x5d   :  { %s1738_s1 = scalar_lea.vmem %s81_s12, 64  ;;  %p1743_p2 = scmp.lt.s32.totalorder %s81_s12, %s81_s12 }
  0x5e   :  { %p1739_p1 = scmp.ne.s32.totalorder %s81_s12, %s1738_s1  ;;  %p1744_p3 = scmp.lt.s32.totalorder %s1738_s1, %s1738_s1 }
  0x60   :  { %p1745_p4 = por %p1744_p3, %p1743_p2 }
  0x62   :  { %p1746_p5 = pnand %p1745_p4, %p1739_p1 }
  0x64   :  { %1749 = shalt.err (!%p1746_p5)
}
  0x65   :  { %83 = dma.hbm_to_vmem [thread:$0]  %s2046_s5, 64, %s81_s12, [#allocation12]  }
  0x66   :  { %1772 = dma.done.wait [#allocation3], 1024  }
  0x67   :  { %1773 = vsyncadd [#allocation3], 4294966272 }
  0x68   :  { %1774 = dma.done.wait [#allocation6], 4160  }
  0x69   :  { %1775 = vsyncadd [#allocation6], 4294963136 }
  0x6a   :  { %1776 = dma.done.wait [#allocation9], 3072  }
  0x6b   :  { %1777 = vsyncadd [#allocation9], 4294964224 }
  0x6c   :  { %1778 = dma.done.wait [#allocation12], 64  }
  0x6d   :  { %1779 = vsyncadd [#allocation12], 4294967232  ;;  %v1792_v0 = vmov 0   ;;  %v1530_v1 = vld [vmem:[#allocation5 + $0x4] ss:$16 sps:$4 sm:$0xff]   ;;  %v1585_v44 = vld [vmem:[#allocation2 + $0x8] sm:$0xff]  }
  0x6e   :  { %413 = vmatprep.mubr.bf16.mxu0 %v1792_v0  ;;  %526 = vmatprep.mubr.bf16.mxu1 %v1792_v0  ;;  %v1532_v2 = vld [vmem:[#allocation5 + $0xc] ss:$16 sps:$4 sm:$0xff]   ;;  %v1534_v3 = vld [vmem:[#allocation5] ss:$16 sps:$4 sm:$0xff]   ;;  %v1535_v4 = vld [vmem:[#allocation5 + $0x8] ss:$16 sps:$4 sm:$0xff]  }
  0x6f   :  { %381 = vmatprep.subr.bf16.mxu0 %v1530_v1  ;;  %494 = vmatprep.subr.bf16.mxu1 %v1532_v2  ;;  %v1536_v5 = vld [vmem:[#allocation5 + $0x24] ss:$16 sps:$4 sm:$0xff]   ;;  %v1538_v6 = vld [vmem:[#allocation5 + $0x2c] ss:$16 sps:$4 sm:$0xff]   ;;  %v1540_v7 = vld [vmem:[#allocation5 + $0x20] ss:$16 sps:$4 sm:$0xff]   ;;  %v153_v2 = vlaneseq }
  0x70   :  { %382 = vmatpush1.bf16.msra.mxu0 %v1534_v3  ;;  %495 = vmatpush1.bf16.msra.mxu1 %v1535_v4  ;;  %v1541_v8 = vld [vmem:[#allocation5 + $0x28] ss:$16 sps:$4 sm:$0xff]   ;;  %v1542_v9 = vld [vmem:[#allocation5 + $0x44] ss:$16 sps:$4 sm:$0xff]   ;;  %v1544_v10 = vld [vmem:[#allocation5 + $0x4c] ss:$16 sps:$4 sm:$0xff]  }
  0x71   :  { %383 = vmatprep.subr.bf16.mxu0 %v1536_v5  ;;  %496 = vmatprep.subr.bf16.mxu1 %v1538_v6  ;;  %v1546_v11 = vld [vmem:[#allocation5 + $0x40] ss:$16 sps:$4 sm:$0xff]   ;;  %v1547_v12 = vld [vmem:[#allocation5 + $0x48] ss:$16 sps:$4 sm:$0xff]   ;;  %v1548_v13 = vld [vmem:[#allocation5 + $0x64] ss:$16 sps:$4 sm:$0xff]  }
  0x72   :  { %v1550_v14 = vld [vmem:[#allocation5 + $0x6c] ss:$16 sps:$4 sm:$0xff]   ;;  %v1552_v15 = vld [vmem:[#allocation5 + $0x60] ss:$16 sps:$4 sm:$0xff]   ;;  %v1553_v16 = vld [vmem:[#allocation5 + $0x68] ss:$16 sps:$4 sm:$0xff]  }
  0x73   :  { %v1554_v17 = vld [vmem:[#allocation5 + $0x84] ss:$16 sps:$4 sm:$0xff]   ;;  %v1556_v18 = vld [vmem:[#allocation5 + $0x8c] ss:$16 sps:$4 sm:$0xff]   ;;  %v1558_v19 = vld [vmem:[#allocation5 + $0x80] ss:$16 sps:$4 sm:$0xff]  }
  0x74   :  { %384 = vmatpush1.bf16.msra.mxu0 %v1540_v7  ;;  %497 = vmatpush1.bf16.msra.mxu1 %v1541_v8  ;;  %v1559_v20 = vld [vmem:[#allocation5 + $0x88] ss:$16 sps:$4 sm:$0xff]   ;;  %v1560_v21 = vld [vmem:[#allocation5 + $0xa4] ss:$16 sps:$4 sm:$0xff]   ;;  %v1562_v22 = vld [vmem:[#allocation5 + $0xac] ss:$16 sps:$4 sm:$0xff]  }
  0x75   :  { %385 = vmatprep.subr.bf16.mxu0 %v1542_v9  ;;  %498 = vmatprep.subr.bf16.mxu1 %v1544_v10  ;;  %v1564_v23 = vld [vmem:[#allocation5 + $0xa0] ss:$16 sps:$4 sm:$0xff]   ;;  %v1565_v24 = vld [vmem:[#allocation5 + $0xa8] ss:$16 sps:$4 sm:$0xff]   ;;  %v1566_v25 = vld [vmem:[#allocation5 + $0xc4] ss:$16 sps:$4 sm:$0xff]  }
  0x76   :  { %v1568_v26 = vld [vmem:[#allocation5 + $0xcc] ss:$16 sps:$4 sm:$0xff]   ;;  %v1570_v27 = vld [vmem:[#allocation5 + $0xc0] ss:$16 sps:$4 sm:$0xff]   ;;  %v1571_v28 = vld [vmem:[#allocation5 + $0xc8] ss:$16 sps:$4 sm:$0xff]  }
  0x77   :  { %v1572_v29 = vld [vmem:[#allocation5 + $0xe4] ss:$16 sps:$4 sm:$0xff]   ;;  %v1574_v30 = vld [vmem:[#allocation5 + $0xec] ss:$16 sps:$4 sm:$0xff]   ;;  %v1576_v31 = vld [vmem:[#allocation5 + $0xe0] ss:$16 sps:$4 sm:$0xff]  }
  0x78   :  { %386 = vmatpush1.bf16.msra.mxu0 %v1546_v11  ;;  %499 = vmatpush1.bf16.msra.mxu1 %v1547_v12  ;;  %v1577_v32 = vld [vmem:[#allocation5 + $0xe8] ss:$16 sps:$4 sm:$0xff]   ;;  %v1584_v34 = vld [vmem:[#allocation10 + $0xc] ss:$16 sps:$4 sm:$0xff]   ;;  %v1579_v36 = vld [vmem:[#allocation10] ss:$16 sps:$4 sm:$0xff]  }
  0x79   :  { %387 = vmatprep.subr.bf16.mxu0 %v1548_v13  ;;  %500 = vmatprep.subr.bf16.mxu1 %v1550_v14  ;;  %v1581_v33 = vld [vmem:[#allocation10 + $0x4] ss:$16 sps:$4 sm:$0xff]   ;;  %v1578_v35 = vld [vmem:[#allocation2] sm:$0xff]   ;;  %v1582_v37 = vld [vmem:[#allocation10 + $0x8] ss:$16 sps:$4 sm:$0xff]   ;;  %vm781_vm0 = vcmask 523264  }
  0x7a   :  { %v1589_v38 = vld [vmem:[#allocation10 + $0x24] ss:$16 sps:$4 sm:$0xff]   ;;  %v1592_v39 = vld [vmem:[#allocation10 + $0x2c] ss:$16 sps:$4 sm:$0xff]   ;;  %v1587_v40 = vld [vmem:[#allocation10 + $0x20] ss:$16 sps:$4 sm:$0xff]  }
  0x7b   :  { %v1590_v41 = vld [vmem:[#allocation10 + $0x28] ss:$16 sps:$4 sm:$0xff]   ;;  %v1597_v42 = vld [vmem:[#allocation10 + $0x44] ss:$16 sps:$4 sm:$0xff]   ;;  %v1600_v43 = vld [vmem:[#allocation10 + $0x4c] ss:$16 sps:$4 sm:$0xff]  }
  0x7c   :  { %388 = vmatpush1.bf16.msra.mxu0 %v1552_v15  ;;  %501 = vmatpush1.bf16.msra.mxu1 %v1553_v16  ;;  %v1595_v45 = vld [vmem:[#allocation10 + $0x40] ss:$16 sps:$4 sm:$0xff]   ;;  %v1598_v46 = vld [vmem:[#allocation10 + $0x48] ss:$16 sps:$4 sm:$0xff]   ;;  %v1605_v47 = vld [vmem:[#allocation10 + $0x64] ss:$16 sps:$4 sm:$0xff]  }
  0x7d   :  { %389 = vmatprep.subr.bf16.mxu0 %v1554_v17  ;;  %502 = vmatprep.subr.bf16.mxu1 %v1556_v18  ;;  %v1608_v48 = vld [vmem:[#allocation10 + $0x6c] ss:$16 sps:$4 sm:$0xff]   ;;  %v1603_v49 = vld [vmem:[#allocation10 + $0x60] ss:$16 sps:$4 sm:$0xff]   ;;  %v1606_v50 = vld [vmem:[#allocation10 + $0x68] ss:$16 sps:$4 sm:$0xff]  }
  0x7e   :  { %v1586_v51 = vld [vmem:[#allocation2 + $0x10] sm:$0xff]   ;;  %v1593_v52 = vld [vmem:[#allocation2 + $0x18] sm:$0xff]   ;;  %v1594_v53 = vld [vmem:[#allocation2 + $0x20] sm:$0xff]   ;;  %v154_v3 = vshrl.u32 %v153_v2, 7  ;;  %s1793_s5 = smov [#allocation13]  }
  0x7f   :  { %v1601_v54 = vld [vmem:[#allocation2 + $0x28] sm:$0xff]   ;;  %v1602_v55 = vld [vmem:[#allocation2 + $0x30] sm:$0xff]   ;;  %v1609_v56 = vld [vmem:[#allocation2 + $0x38] sm:$0xff]   ;;  %s1229_s8 = sshll.u32 %s1793_s5, 4  ;;  %s1230_s8 = int_to_ptr.vmem [resolvable:$true] %s1229_s8 }
  0x80   :  { %390 = vmatpush1.bf16.msra.mxu0 %v1558_v19  ;;  %503 = vmatpush1.bf16.msra.mxu1 %v1559_v20  ;;  %v1610_v57 = vld [vmem:[#allocation8] sm:$0xff]   ;;  %v1611_v58 = vld [vmem:[#allocation8 + $0x8] sm:$0xff]   ;;  %v1612_v59 = vld [vmem:[#allocation8 + $0x10] sm:$0xff]   ;;  %v155_v4 = vsub.s32 0, %v154_v3  ;;  %v163_v5 = vsub.s32 2, %v154_v3  ;;  %v159_v8 = vsub.s32 1, %v154_v3  ;;  %p1755_p7 = scmp.lt.s32.totalorder %s1230_s8, %s1230_s8 }
  0x81   :  { %391 = vmatprep.subr.bf16.mxu0 %v1560_v21  ;;  %504 = vmatprep.subr.bf16.mxu1 %v1562_v22  ;;  %v1613_v60 = vld [vmem:[#allocation8 + $0x18] sm:$0xff]   ;;  %v1614_v61 = vld [vmem:[#allocation8 + $0x20] sm:$0xff]   ;;  %v1615_v62 = vld [vmem:[#allocation8 + $0x28] sm:$0xff]   ;;  %v167_v9 = vsub.s32 3, %v154_v3  ;;  %s1750_s17 = scalar_lea.vmem %s1230_s8, 8192 }
  0x82   :  { %v1616_v63 = vld [vmem:[#allocation8 + $0x30] sm:$0xff]   ;;  %v1617_v1 = vld [vmem:[#allocation8 + $0x38] sm:$0xff]   ;;  %v639_v7 = vld [vmem:[#allocation11] sm:$0xf]  ;;  %p1751_p6 = scmp.ne.s32.totalorder %s1230_s8, %s1750_s17  ;;  %p1756_p8 = scmp.lt.s32.totalorder %s1750_s17, %s1750_s17 }
  0x83   :  { %v151_v6 = vld [vmem:[#allocation7] sm:$0xf]  ;;  %v644_v11 = vrot.slane %v639_v7, %v155_v4  ;;  %v652_v13 = vrot.slane %v639_v7, %v163_v5  ;;  %v648_v15 = vrot.slane %v639_v7, %v159_v8  ;;  %v656_v16 = vrot.slane %v639_v7, %v167_v9 }
  0x84   :  { %392 = vmatpush1.bf16.msra.mxu0 %v1564_v23  ;;  %505 = vmatpush1.bf16.msra.mxu1 %v1565_v24  ;;  %v156_v10 = vrot.slane %v151_v6, %v155_v4  ;;  %v164_v12 = vrot.slane %v151_v6, %v163_v5  ;;  %v160_v14 = vrot.slane %v151_v6, %v159_v8  ;;  %p1757_p9 = por %p1756_p8, %p1755_p7 }
  0x85   :  { %393 = vmatprep.subr.bf16.mxu0 %v1566_v25  ;;  %506 = vmatprep.subr.bf16.mxu1 %v1568_v26 }
  0x86   :  { %v1957_v17 = vadd.f32 %v644_v11, %v156_v10  ;;  %v1959_v18 = vadd.f32 %v652_v13, %v164_v12  ;;  %v1961_v19 = vadd.f32 %v648_v15, %v160_v14  ;;  %p1758_p10 = pnand %p1757_p9, %p1751_p6 }
  0x88   :  { %394 = vmatpush1.bf16.msra.mxu0 %v1570_v27  ;;  %507 = vmatpush1.bf16.msra.mxu1 %v1571_v28 }
  0x89   :  { %395 = vmatprep.subr.bf16.mxu0 %v1572_v29  ;;  %508 = vmatprep.subr.bf16.mxu1 %v1574_v30 }
  0x8c   :  { %396 = vmatpush1.bf16.msra.mxu0 %v1576_v31  ;;  %509 = vmatpush1.bf16.msra.mxu1 %v1577_v32 }
  0x8d   :  { %806 = vmatprep.subr.bf16.mxu0 %v1581_v33  ;;  %919 = vmatprep.subr.bf16.mxu1 %v1584_v34 }
  0x8f   :  { %414 = vmatmul.mubr.bf16.vlgmr.msra.gmra.mrb[0].mxu0 %v1578_v35  ;;  %527 = vmatmul.mubr.bf16.vlgmr.msra.gmra.mrb[0].mxu1 %v1578_v35 }
  0x90   :  { %807 = vmatpush1.bf16.msra.mxu0 %v1579_v36  ;;  %920 = vmatpush1.bf16.msra.mxu1 %v1582_v37 }
  0x91   :  { %423 = vmatprep.mubr.bf16.mxu0 %v1792_v0  ;;  %536 = vmatprep.mubr.bf16.mxu1 %v1792_v0 }
  0x92   :  { %808 = vmatprep.subr.bf16.mxu0 %v1589_v38  ;;  %921 = vmatprep.subr.bf16.mxu1 %v1592_v39 }
  0x94   :  { %809 = vmatpush1.bf16.msra.mxu0 %v1587_v40  ;;  %922 = vmatpush1.bf16.msra.mxu1 %v1590_v41 }
  0x95   :  { %810 = vmatprep.subr.bf16.mxu0 %v1597_v42  ;;  %923 = vmatprep.subr.bf16.mxu1 %v1600_v43 }
  0x97   :  { %424 = vmatmul.mubr.bf16.gmra.mrb[4].mxu0 %v1585_v44  ;;  %537 = vmatmul.mubr.bf16.gmra.mrb[4].mxu1 %v1585_v44 }
  0x98   :  { %433 = vmatprep.mubr.bf16.mxu0 %v1792_v0  ;;  %546 = vmatprep.mubr.bf16.mxu1 %v1792_v0 }
  0x99   :  { %811 = vmatpush1.bf16.msra.mxu0 %v1595_v45  ;;  %924 = vmatpush1.bf16.msra.mxu1 %v1598_v46 }
  0x9a   :  { %812 = vmatprep.subr.bf16.mxu0 %v1605_v47  ;;  %925 = vmatprep.subr.bf16.mxu1 %v1608_v48 }
  0x9d   :  { %813 = vmatpush1.bf16.msra.mxu0 %v1603_v49  ;;  %926 = vmatpush1.bf16.msra.mxu1 %v1606_v50 }
  0x9f   :  { %434 = vmatmul.mubr.bf16.gmra.mrb[8].mxu0 %v1586_v51  ;;  %547 = vmatmul.mubr.bf16.gmra.mrb[8].mxu1 %v1586_v51 }
  0xa0   :  { %443 = vmatprep.mubr.bf16.mxu0 %v1792_v0  ;;  %556 = vmatprep.mubr.bf16.mxu1 %v1792_v0 }
  0xa7   :  { %444 = vmatmul.mubr.bf16.gmra.mrb[12].mxu0 %v1593_v52  ;;  %557 = vmatmul.mubr.bf16.gmra.mrb[12].mxu1 %v1593_v52 }
  0xa8   :  { %453 = vmatprep.mubr.bf16.mxu0 %v1792_v0  ;;  %566 = vmatprep.mubr.bf16.mxu1 %v1792_v0 }
  0xaf   :  { %454 = vmatmul.mubr.bf16.gmra.mrb[16].mxu0 %v1594_v53  ;;  %567 = vmatmul.mubr.bf16.gmra.mrb[16].mxu1 %v1594_v53 }
  0xb0   :  { %463 = vmatprep.mubr.bf16.mxu0 %v1792_v0  ;;  %576 = vmatprep.mubr.bf16.mxu1 %v1792_v0 }
  0xb7   :  { %464 = vmatmul.mubr.bf16.gmra.mrb[20].mxu0 %v1601_v54  ;;  %577 = vmatmul.mubr.bf16.gmra.mrb[20].mxu1 %v1601_v54 }
  0xb8   :  { %473 = vmatprep.mubr.bf16.mxu0 %v1792_v0  ;;  %586 = vmatprep.mubr.bf16.mxu1 %v1792_v0 }
  0xbf   :  { %474 = vmatmul.mubr.bf16.gmra.mrb[24].mxu0 %v1602_v55  ;;  %587 = vmatmul.mubr.bf16.gmra.mrb[24].mxu1 %v1602_v55 }
  0xc0   :  { %483 = vmatprep.mubr.bf16.mxu0 %v1792_v0  ;;  %596 = vmatprep.mubr.bf16.mxu1 %v1792_v0 }
  0xc7   :  { %484 = vmatmul.mubr.bf16.gmra.mrb[28].mxu0 %v1609_v56  ;;  %597 = vmatmul.mubr.bf16.gmra.mrb[28].mxu1 %v1609_v56 }
  0xc8   :  { %838 = vmatprep.mubr.bf16.mxu0 %v1792_v0  ;;  %951 = vmatprep.mubr.bf16.mxu1 %v1792_v0 }
  0xcf   :  { %1308 = vmatmul.mubr.msk.bf16.vlgmr.msra.gmra.mrb[0].mxu0 %vm781_vm0, %v1610_v57  ;;  %1316 = vmatmul.mubr.msk.bf16.vlgmr.msra.gmra.mrb[0].mxu1 %vm781_vm0, %v1610_v57 }
  0xd0   :  { %848 = vmatprep.mubr.bf16.mxu0 %v1792_v0  ;;  %961 = vmatprep.mubr.bf16.mxu1 %v1792_v0 }
  0xd7   :  { %1309 = vmatmul.mubr.msk.bf16.gmra.mrb[4].mxu0 %vm781_vm0, %v1611_v58  ;;  %1317 = vmatmul.mubr.msk.bf16.gmra.mrb[4].mxu1 %vm781_vm0, %v1611_v58 }
  0xd8   :  { %858 = vmatprep.mubr.bf16.mxu0 %v1792_v0  ;;  %971 = vmatprep.mubr.bf16.mxu1 %v1792_v0 }
  0xdf   :  { %1310 = vmatmul.mubr.msk.bf16.gmra.mrb[8].mxu0 %vm781_vm0, %v1612_v59  ;;  %1318 = vmatmul.mubr.msk.bf16.gmra.mrb[8].mxu1 %vm781_vm0, %v1612_v59 }
  0xe0   :  { %868 = vmatprep.mubr.bf16.mxu0 %v1792_v0  ;;  %981 = vmatprep.mubr.bf16.mxu1 %v1792_v0 }
  0xe7   :  { %1311 = vmatmul.mubr.msk.bf16.gmra.mrb[12].mxu0 %vm781_vm0, %v1613_v60  ;;  %1319 = vmatmul.mubr.msk.bf16.gmra.mrb[12].mxu1 %vm781_vm0, %v1613_v60 }
  0xe8   :  { %878 = vmatprep.mubr.bf16.mxu0 %v1792_v0  ;;  %991 = vmatprep.mubr.bf16.mxu1 %v1792_v0 }
  0xef   :  { %1312 = vmatmul.mubr.msk.bf16.gmra.mrb[16].mxu0 %vm781_vm0, %v1614_v61  ;;  %1320 = vmatmul.mubr.msk.bf16.gmra.mrb[16].mxu1 %vm781_vm0, %v1614_v61 }
  0xf0   :  { %888 = vmatprep.mubr.bf16.mxu0 %v1792_v0  ;;  %1001 = vmatprep.mubr.bf16.mxu1 %v1792_v0 }
  0xf7   :  { %1313 = vmatmul.mubr.msk.bf16.gmra.mrb[20].mxu0 %vm781_vm0, %v1615_v62  ;;  %1321 = vmatmul.mubr.msk.bf16.gmra.mrb[20].mxu1 %vm781_vm0, %v1615_v62 }
  0xf8   :  { %898 = vmatprep.mubr.bf16.mxu0 %v1792_v0  ;;  %1011 = vmatprep.mubr.bf16.mxu1 %v1792_v0 }
  0xff   :  { %1314 = vmatmul.mubr.msk.bf16.gmra.mrb[24].mxu0 %vm781_vm0, %v1616_v63  ;;  %1322 = vmatmul.mubr.msk.bf16.gmra.mrb[24].mxu1 %vm781_vm0, %v1616_v63 }
 0x100   :  { %908 = vmatprep.mubr.bf16.mxu0 %v1792_v0  ;;  %1021 = vmatprep.mubr.bf16.mxu1 %v1792_v0  ;;  %v168_v0 = vrot.slane %v151_v6, %v167_v9 }
 0x102   :  { %v1963_v20 = vadd.f32 %v656_v16, %v168_v0 }
 0x107   :  { %1315 = vmatmul.mubr.msk.bf16.gmra.mrb[28].mxu0 %vm781_vm0, %v1617_v1  ;;  %1323 = vmatmul.mubr.msk.bf16.gmra.mrb[28].mxu1 %vm781_vm0, %v1617_v1 }
 0x1a2   :  { %v840_v21 = vpop.f32.mrb[0].mxu0  ;;  %v953_v22 = vpop.f32.mrb[0].mxu1 }
 0x1a3   :  { %v1325_v23 = vadd.f32 %v1957_v17, %v840_v21  ;;  %v1389_v24 = vadd.f32 %v1959_v18, %v953_v22  ;;  %v842_v25 = vpop.f32.mrb[1].mxu0  ;;  %v955_v26 = vpop.f32.mrb[1].mxu1 }
 0x1a4   :  { %v1327_v27 = vadd.f32 %v1961_v19, %v842_v25  ;;  %v1391_v28 = vadd.f32 %v1963_v20, %v955_v26  ;;  %v844_v29 = vpop.f32.mrb[2].mxu0  ;;  %v957_v30 = vpop.f32.mrb[2].mxu1 }
 0x1a5   :  { %v1096_v31 = vmax.f32 %v1325_v23, 0.0  ;;  %v1098_v32 = vmax.f32 %v1389_v24, 0.0  ;;  %v1329_v33 = vadd.f32 %v1957_v17, %v844_v29  ;;  %v1393_v34 = vadd.f32 %v1959_v18, %v957_v30  ;;  %v846_v35 = vpop.f32.mrb[3].mxu0  ;;  %v959_v36 = vpop.f32.mrb[3].mxu1 }
 0x1a6   :  { %v1097_v37 = vmax.f32 %v1327_v27, 0.0  ;;  %v1099_v38 = vmax.f32 %v1391_v28, 0.0  ;;  %v1331_v39 = vadd.f32 %v1961_v19, %v846_v35  ;;  %v1395_v40 = vadd.f32 %v1963_v20, %v959_v36 }
 0x1a7   :  { %1160 = vst [vmem:[#allocation13] sm:$0xff] %v1096_v31  ;;  %1162 = vst [vmem:[#allocation13 + $0x10] sm:$0xff] %v1098_v32  ;;  %v1100_v41 = vmax.f32 %v1329_v33, 0.0  ;;  %v1102_v42 = vmax.f32 %v1393_v34, 0.0 }
 0x1a8   :  { %1161 = vst [vmem:[#allocation13 + $0x8] sm:$0xff] %v1097_v37  ;;  %1163 = vst [vmem:[#allocation13 + $0x18] sm:$0xff] %v1099_v38  ;;  %v1101_v43 = vmax.f32 %v1331_v39, 0.0  ;;  %v1103_v44 = vmax.f32 %v1395_v40, 0.0 }
 0x1a9   :  { %1164 = vst [vmem:[#allocation13 + $0x20] sm:$0xff] %v1100_v41  ;;  %1166 = vst [vmem:[#allocation13 + $0x30] sm:$0xff] %v1102_v42 }
 0x1aa   :  { %1165 = vst [vmem:[#allocation13 + $0x28] sm:$0xff] %v1101_v43  ;;  %1167 = vst [vmem:[#allocation13 + $0x38] sm:$0xff] %v1103_v44  ;;  %v850_v45 = vpop.f32.mrb[4].mxu0  ;;  %v963_v46 = vpop.f32.mrb[4].mxu1 }
 0x1ab   :  { %v1333_v47 = vadd.f32 %v1957_v17, %v850_v45  ;;  %v1397_v48 = vadd.f32 %v1959_v18, %v963_v46  ;;  %v852_v49 = vpop.f32.mrb[5].mxu0  ;;  %v965_v50 = vpop.f32.mrb[5].mxu1 }
 0x1ac   :  { %v1335_v51 = vadd.f32 %v1961_v19, %v852_v49  ;;  %v1399_v52 = vadd.f32 %v1963_v20, %v965_v50  ;;  %v854_v53 = vpop.f32.mrb[6].mxu0  ;;  %v967_v54 = vpop.f32.mrb[6].mxu1 }
 0x1ad   :  { %v1104_v55 = vmax.f32 %v1333_v47, 0.0  ;;  %v1106_v56 = vmax.f32 %v1397_v48, 0.0  ;;  %v1337_v57 = vadd.f32 %v1957_v17, %v854_v53  ;;  %v1401_v58 = vadd.f32 %v1959_v18, %v967_v54  ;;  %v856_v59 = vpop.f32.mrb[7].mxu0  ;;  %v969_v60 = vpop.f32.mrb[7].mxu1 }
 0x1ae   :  { %v1105_v61 = vmax.f32 %v1335_v51, 0.0  ;;  %v1107_v62 = vmax.f32 %v1399_v52, 0.0  ;;  %v1339_v63 = vadd.f32 %v1961_v19, %v856_v59  ;;  %v1403_v1 = vadd.f32 %v1963_v20, %v969_v60 }
 0x1af   :  { %1168 = vst [vmem:[#allocation13 + $0x40] sm:$0xff] %v1104_v55  ;;  %1170 = vst [vmem:[#allocation13 + $0x50] sm:$0xff] %v1106_v56  ;;  %v1108_v2 = vmax.f32 %v1337_v57, 0.0  ;;  %v1110_v3 = vmax.f32 %v1401_v58, 0.0 }
 0x1b0   :  { %1169 = vst [vmem:[#allocation13 + $0x48] sm:$0xff] %v1105_v61  ;;  %1171 = vst [vmem:[#allocation13 + $0x58] sm:$0xff] %v1107_v62  ;;  %v1109_v4 = vmax.f32 %v1339_v63, 0.0  ;;  %v1111_v5 = vmax.f32 %v1403_v1, 0.0 }
 0x1b1   :  { %1172 = vst [vmem:[#allocation13 + $0x60] sm:$0xff] %v1108_v2  ;;  %1174 = vst [vmem:[#allocation13 + $0x70] sm:$0xff] %v1110_v3 }
 0x1b2   :  { %1173 = vst [vmem:[#allocation13 + $0x68] sm:$0xff] %v1109_v4  ;;  %1175 = vst [vmem:[#allocation13 + $0x78] sm:$0xff] %v1111_v5  ;;  %v860_v6 = vpop.f32.mrb[8].mxu0  ;;  %v973_v7 = vpop.f32.mrb[8].mxu1 }
 0x1b3   :  { %v1341_v8 = vadd.f32 %v1957_v17, %v860_v6  ;;  %v1405_v9 = vadd.f32 %v1959_v18, %v973_v7  ;;  %v862_v10 = vpop.f32.mrb[9].mxu0  ;;  %v975_v11 = vpop.f32.mrb[9].mxu1 }
 0x1b4   :  { %v1343_v12 = vadd.f32 %v1961_v19, %v862_v10  ;;  %v1407_v13 = vadd.f32 %v1963_v20, %v975_v11  ;;  %v864_v14 = vpop.f32.mrb[10].mxu0  ;;  %v977_v15 = vpop.f32.mrb[10].mxu1 }
 0x1b5   :  { %v1112_v0 = vmax.f32 %v1341_v8, 0.0  ;;  %v1114_v16 = vmax.f32 %v1405_v9, 0.0  ;;  %v1345_v21 = vadd.f32 %v1957_v17, %v864_v14  ;;  %v1409_v22 = vadd.f32 %v1959_v18, %v977_v15  ;;  %v866_v23 = vpop.f32.mrb[11].mxu0  ;;  %v979_v24 = vpop.f32.mrb[11].mxu1 }
 0x1b6   :  { %v1113_v25 = vmax.f32 %v1343_v12, 0.0  ;;  %v1115_v26 = vmax.f32 %v1407_v13, 0.0  ;;  %v1347_v27 = vadd.f32 %v1961_v19, %v866_v23  ;;  %v1411_v28 = vadd.f32 %v1963_v20, %v979_v24 }
 0x1b7   :  { %1176 = vst [vmem:[#allocation13 + $0x80] sm:$0xff] %v1112_v0  ;;  %1178 = vst [vmem:[#allocation13 + $0x90] sm:$0xff] %v1114_v16  ;;  %v1116_v29 = vmax.f32 %v1345_v21, 0.0  ;;  %v1118_v30 = vmax.f32 %v1409_v22, 0.0 }
 0x1b8   :  { %1177 = vst [vmem:[#allocation13 + $0x88] sm:$0xff] %v1113_v25  ;;  %1179 = vst [vmem:[#allocation13 + $0x98] sm:$0xff] %v1115_v26  ;;  %v1117_v31 = vmax.f32 %v1347_v27, 0.0  ;;  %v1119_v32 = vmax.f32 %v1411_v28, 0.0 }
 0x1b9   :  { %1180 = vst [vmem:[#allocation13 + $0xa0] sm:$0xff] %v1116_v29  ;;  %1182 = vst [vmem:[#allocation13 + $0xb0] sm:$0xff] %v1118_v30 }
 0x1ba   :  { %1181 = vst [vmem:[#allocation13 + $0xa8] sm:$0xff] %v1117_v31  ;;  %1183 = vst [vmem:[#allocation13 + $0xb8] sm:$0xff] %v1119_v32  ;;  %v870_v33 = vpop.f32.mrb[12].mxu0  ;;  %v983_v34 = vpop.f32.mrb[12].mxu1 }
 0x1bb   :  { %v1349_v35 = vadd.f32 %v1957_v17, %v870_v33  ;;  %v1413_v36 = vadd.f32 %v1959_v18, %v983_v34  ;;  %v872_v37 = vpop.f32.mrb[13].mxu0  ;;  %v985_v38 = vpop.f32.mrb[13].mxu1 }
 0x1bc   :  { %v1351_v39 = vadd.f32 %v1961_v19, %v872_v37  ;;  %v1415_v40 = vadd.f32 %v1963_v20, %v985_v38  ;;  %v874_v41 = vpop.f32.mrb[14].mxu0  ;;  %v987_v42 = vpop.f32.mrb[14].mxu1 }
 0x1bd   :  { %v1120_v43 = vmax.f32 %v1349_v35, 0.0  ;;  %v1122_v44 = vmax.f32 %v1413_v36, 0.0  ;;  %v1353_v45 = vadd.f32 %v1957_v17, %v874_v41  ;;  %v1417_v46 = vadd.f32 %v1959_v18, %v987_v42  ;;  %v876_v47 = vpop.f32.mrb[15].mxu0  ;;  %v989_v48 = vpop.f32.mrb[15].mxu1 }
 0x1be   :  { %v1121_v49 = vmax.f32 %v1351_v39, 0.0  ;;  %v1123_v50 = vmax.f32 %v1415_v40, 0.0  ;;  %v1355_v51 = vadd.f32 %v1961_v19, %v876_v47  ;;  %v1419_v52 = vadd.f32 %v1963_v20, %v989_v48 }
 0x1bf   :  { %1184 = vst [vmem:[#allocation13 + $0xc0] sm:$0xff] %v1120_v43  ;;  %1186 = vst [vmem:[#allocation13 + $0xd0] sm:$0xff] %v1122_v44  ;;  %v1124_v53 = vmax.f32 %v1353_v45, 0.0  ;;  %v1126_v54 = vmax.f32 %v1417_v46, 0.0 }
 0x1c0   :  { %1185 = vst [vmem:[#allocation13 + $0xc8] sm:$0xff] %v1121_v49  ;;  %1187 = vst [vmem:[#allocation13 + $0xd8] sm:$0xff] %v1123_v50  ;;  %v1125_v55 = vmax.f32 %v1355_v51, 0.0  ;;  %v1127_v56 = vmax.f32 %v1419_v52, 0.0 }
 0x1c1   :  { %1188 = vst [vmem:[#allocation13 + $0xe0] sm:$0xff] %v1124_v53  ;;  %1190 = vst [vmem:[#allocation13 + $0xf0] sm:$0xff] %v1126_v54 }
 0x1c2   :  { %1189 = vst [vmem:[#allocation13 + $0xe8] sm:$0xff] %v1125_v55  ;;  %1191 = vst [vmem:[#allocation13 + $0xf8] sm:$0xff] %v1127_v56  ;;  %v880_v57 = vpop.f32.mrb[16].mxu0  ;;  %v993_v58 = vpop.f32.mrb[16].mxu1 }
 0x1c3   :  { %v1357_v59 = vadd.f32 %v1957_v17, %v880_v57  ;;  %v1421_v60 = vadd.f32 %v1959_v18, %v993_v58  ;;  %v882_v61 = vpop.f32.mrb[17].mxu0  ;;  %v995_v62 = vpop.f32.mrb[17].mxu1 }
 0x1c4   :  { %v1359_v63 = vadd.f32 %v1961_v19, %v882_v61  ;;  %v1423_v1 = vadd.f32 %v1963_v20, %v995_v62  ;;  %v884_v2 = vpop.f32.mrb[18].mxu0  ;;  %v997_v3 = vpop.f32.mrb[18].mxu1 }
 0x1c5   :  { %v1128_v4 = vmax.f32 %v1357_v59, 0.0  ;;  %v1130_v5 = vmax.f32 %v1421_v60, 0.0  ;;  %v1361_v6 = vadd.f32 %v1957_v17, %v884_v2  ;;  %v1425_v7 = vadd.f32 %v1959_v18, %v997_v3  ;;  %v886_v8 = vpop.f32.mrb[19].mxu0  ;;  %v999_v9 = vpop.f32.mrb[19].mxu1 }
 0x1c6   :  { %v1129_v10 = vmax.f32 %v1359_v63, 0.0  ;;  %v1131_v11 = vmax.f32 %v1423_v1, 0.0  ;;  %v1363_v12 = vadd.f32 %v1961_v19, %v886_v8  ;;  %v1427_v13 = vadd.f32 %v1963_v20, %v999_v9 }
 0x1c7   :  { %1192 = vst [vmem:[#allocation13 + $0x100] sm:$0xff] %v1128_v4  ;;  %1194 = vst [vmem:[#allocation13 + $0x110] sm:$0xff] %v1130_v5  ;;  %v1132_v14 = vmax.f32 %v1361_v6, 0.0  ;;  %v1134_v15 = vmax.f32 %v1425_v7, 0.0 }
 0x1c8   :  { %1193 = vst [vmem:[#allocation13 + $0x108] sm:$0xff] %v1129_v10  ;;  %1195 = vst [vmem:[#allocation13 + $0x118] sm:$0xff] %v1131_v11  ;;  %v1133_v0 = vmax.f32 %v1363_v12, 0.0  ;;  %v1135_v16 = vmax.f32 %v1427_v13, 0.0 }
 0x1c9   :  { %1196 = vst [vmem:[#allocation13 + $0x120] sm:$0xff] %v1132_v14  ;;  %1198 = vst [vmem:[#allocation13 + $0x130] sm:$0xff] %v1134_v15 }
 0x1ca   :  { %1197 = vst [vmem:[#allocation13 + $0x128] sm:$0xff] %v1133_v0  ;;  %1199 = vst [vmem:[#allocation13 + $0x138] sm:$0xff] %v1135_v16  ;;  %v890_v21 = vpop.f32.mrb[20].mxu0  ;;  %v1003_v22 = vpop.f32.mrb[20].mxu1 }
 0x1cb   :  { %v1365_v23 = vadd.f32 %v1957_v17, %v890_v21  ;;  %v1429_v24 = vadd.f32 %v1959_v18, %v1003_v22  ;;  %v892_v25 = vpop.f32.mrb[21].mxu0  ;;  %v1005_v26 = vpop.f32.mrb[21].mxu1 }
 0x1cc   :  { %v1367_v27 = vadd.f32 %v1961_v19, %v892_v25  ;;  %v1431_v28 = vadd.f32 %v1963_v20, %v1005_v26  ;;  %v894_v29 = vpop.f32.mrb[22].mxu0  ;;  %v1007_v30 = vpop.f32.mrb[22].mxu1 }
 0x1cd   :  { %v1136_v31 = vmax.f32 %v1365_v23, 0.0  ;;  %v1138_v32 = vmax.f32 %v1429_v24, 0.0  ;;  %v1369_v33 = vadd.f32 %v1957_v17, %v894_v29  ;;  %v1433_v34 = vadd.f32 %v1959_v18, %v1007_v30  ;;  %v896_v35 = vpop.f32.mrb[23].mxu0  ;;  %v1009_v36 = vpop.f32.mrb[23].mxu1 }
 0x1ce   :  { %v1137_v37 = vmax.f32 %v1367_v27, 0.0  ;;  %v1139_v38 = vmax.f32 %v1431_v28, 0.0  ;;  %v1371_v39 = vadd.f32 %v1961_v19, %v896_v35  ;;  %v1435_v40 = vadd.f32 %v1963_v20, %v1009_v36 }
 0x1cf   :  { %1200 = vst [vmem:[#allocation13 + $0x140] sm:$0xff] %v1136_v31  ;;  %1202 = vst [vmem:[#allocation13 + $0x150] sm:$0xff] %v1138_v32  ;;  %v1140_v41 = vmax.f32 %v1369_v33, 0.0  ;;  %v1142_v42 = vmax.f32 %v1433_v34, 0.0 }
 0x1d0   :  { %1201 = vst [vmem:[#allocation13 + $0x148] sm:$0xff] %v1137_v37  ;;  %1203 = vst [vmem:[#allocation13 + $0x158] sm:$0xff] %v1139_v38  ;;  %v1141_v43 = vmax.f32 %v1371_v39, 0.0  ;;  %v1143_v44 = vmax.f32 %v1435_v40, 0.0 }
 0x1d1   :  { %1204 = vst [vmem:[#allocation13 + $0x160] sm:$0xff] %v1140_v41  ;;  %1206 = vst [vmem:[#allocation13 + $0x170] sm:$0xff] %v1142_v42 }
 0x1d2   :  { %1205 = vst [vmem:[#allocation13 + $0x168] sm:$0xff] %v1141_v43  ;;  %1207 = vst [vmem:[#allocation13 + $0x178] sm:$0xff] %v1143_v44  ;;  %v900_v45 = vpop.f32.mrb[24].mxu0  ;;  %v1013_v46 = vpop.f32.mrb[24].mxu1 }
 0x1d3   :  { %v1373_v47 = vadd.f32 %v1957_v17, %v900_v45  ;;  %v1437_v48 = vadd.f32 %v1959_v18, %v1013_v46  ;;  %v902_v49 = vpop.f32.mrb[25].mxu0  ;;  %v1015_v50 = vpop.f32.mrb[25].mxu1 }
 0x1d4   :  { %v1375_v51 = vadd.f32 %v1961_v19, %v902_v49  ;;  %v1439_v52 = vadd.f32 %v1963_v20, %v1015_v50  ;;  %v904_v53 = vpop.f32.mrb[26].mxu0  ;;  %v1017_v54 = vpop.f32.mrb[26].mxu1 }
 0x1d5   :  { %v1144_v55 = vmax.f32 %v1373_v47, 0.0  ;;  %v1146_v56 = vmax.f32 %v1437_v48, 0.0  ;;  %v1377_v57 = vadd.f32 %v1957_v17, %v904_v53  ;;  %v1441_v58 = vadd.f32 %v1959_v18, %v1017_v54  ;;  %v906_v59 = vpop.f32.mrb[27].mxu0  ;;  %v1019_v60 = vpop.f32.mrb[27].mxu1 }
 0x1d6   :  { %v1145_v61 = vmax.f32 %v1375_v51, 0.0  ;;  %v1147_v62 = vmax.f32 %v1439_v52, 0.0  ;;  %v1379_v63 = vadd.f32 %v1961_v19, %v906_v59  ;;  %v1443_v1 = vadd.f32 %v1963_v20, %v1019_v60 }
 0x1d7   :  { %1208 = vst [vmem:[#allocation13 + $0x180] sm:$0xff] %v1144_v55  ;;  %1210 = vst [vmem:[#allocation13 + $0x190] sm:$0xff] %v1146_v56  ;;  %v1148_v2 = vmax.f32 %v1377_v57, 0.0  ;;  %v1150_v3 = vmax.f32 %v1441_v58, 0.0 }
 0x1d8   :  { %1209 = vst [vmem:[#allocation13 + $0x188] sm:$0xff] %v1145_v61  ;;  %1211 = vst [vmem:[#allocation13 + $0x198] sm:$0xff] %v1147_v62  ;;  %v1149_v4 = vmax.f32 %v1379_v63, 0.0  ;;  %v1151_v5 = vmax.f32 %v1443_v1, 0.0 }
 0x1d9   :  { %1212 = vst [vmem:[#allocation13 + $0x1a0] sm:$0xff] %v1148_v2  ;;  %1214 = vst [vmem:[#allocation13 + $0x1b0] sm:$0xff] %v1150_v3 }
 0x1da   :  { %1213 = vst [vmem:[#allocation13 + $0x1a8] sm:$0xff] %v1149_v4  ;;  %1215 = vst [vmem:[#allocation13 + $0x1b8] sm:$0xff] %v1151_v5  ;;  %v910_v6 = vpop.f32.mrb[28].mxu0  ;;  %v1023_v7 = vpop.f32.mrb[28].mxu1 }
 0x1db   :  { %v1381_v8 = vadd.f32 %v1957_v17, %v910_v6  ;;  %v1445_v9 = vadd.f32 %v1959_v18, %v1023_v7  ;;  %v912_v10 = vpop.f32.mrb[29].mxu0  ;;  %v1025_v11 = vpop.f32.mrb[29].mxu1 }
 0x1dc   :  { %v1383_v12 = vadd.f32 %v1961_v19, %v912_v10  ;;  %v1447_v13 = vadd.f32 %v1963_v20, %v1025_v11  ;;  %v914_v14 = vpop.f32.mrb[30].mxu0  ;;  %v1027_v15 = vpop.f32.mrb[30].mxu1 }
 0x1dd   :  { %v1152_v0 = vmax.f32 %v1381_v8, 0.0  ;;  %v1154_v16 = vmax.f32 %v1445_v9, 0.0  ;;  %v1385_v21 = vadd.f32 %v1957_v17, %v914_v14  ;;  %v1449_v22 = vadd.f32 %v1959_v18, %v1027_v15  ;;  %v916_v23 = vpop.f32.mrb[31].mxu0  ;;  %v1029_v24 = vpop.f32.mrb[31].mxu1 }
 0x1de   :  { %v1153_v25 = vmax.f32 %v1383_v12, 0.0  ;;  %v1155_v26 = vmax.f32 %v1447_v13, 0.0  ;;  %v1387_v27 = vadd.f32 %v1961_v19, %v916_v23  ;;  %v1451_v28 = vadd.f32 %v1963_v20, %v1029_v24 }
 0x1df   :  { %1216 = vst [vmem:[#allocation13 + $0x1c0] sm:$0xff] %v1152_v0  ;;  %1218 = vst [vmem:[#allocation13 + $0x1d0] sm:$0xff] %v1154_v16  ;;  %v1156_v29 = vmax.f32 %v1385_v21, 0.0  ;;  %v1158_v30 = vmax.f32 %v1449_v22, 0.0 }
 0x1e0   :  { %1217 = vst [vmem:[#allocation13 + $0x1c8] sm:$0xff] %v1153_v25  ;;  %1219 = vst [vmem:[#allocation13 + $0x1d8] sm:$0xff] %v1155_v26  ;;  %v1157_v31 = vmax.f32 %v1387_v27, 0.0  ;;  %v1159_v32 = vmax.f32 %v1451_v28, 0.0 }
 0x1e1   :  { %1220 = vst [vmem:[#allocation13 + $0x1e0] sm:$0xff] %v1156_v29  ;;  %1222 = vst [vmem:[#allocation13 + $0x1f0] sm:$0xff] %v1158_v30 }
 0x1e2   :  { %1221 = vst [vmem:[#allocation13 + $0x1e8] sm:$0xff] %v1157_v31  ;;  %1223 = vst [vmem:[#allocation13 + $0x1f8] sm:$0xff] %v1159_v32 }
 0x1e3   :  { %1761 = shalt.err (!%p1758_p10)
}
 0x1e4   :  { %s1762_s0 = scalar_lea.hbm %s2047_s6, 8192 }
 0x1e5   :  { %p1763_p11 = scmp.ne.s32.totalorder %s2047_s6, %s1762_s0  ;;  %p1766_p12 = scmp.lt.u32.totalorder %s1762_s0, %s2047_s6 }
 0x1e7   :  { %p1768_p13 = pnand %p1766_p12, %p1763_p11 }
 0x1e9   :  { %1771 = shalt.err (!%p1768_p13)
}
 0x1ea   :  { %s1794_s27 = smov 512   ;;  %s1795_s28 = smov 32  }
 0x1eb   :  { %1235 = dma.vmem_to_hbm [thread:$0]  %s1230_s8, 8192, %s2047_s6, [#allocation4], %s1794_s27, %s1794_s27, %s1795_s28  }
 0x1ec   :  { %1780 = dma.done.wait [#allocation4], 8192  }
 0x1ed   :  { %1781 = vsyncadd [#allocation4], 4294959104 }
 0x1ee   :  { %1239 = vsyncpa [#allocation3], 1 }
 0x1ef   :  { %1240 = vsyncpa [#allocation6], 1 }
 0x1f0   :  { %1241 = vsyncpa [#allocation9], 1 }
 0x1f1   :  { %1242 = vsyncpa [#allocation12], 1 }
 0x1f2   :  { %1243 = vsyncpa [#allocation4], 1 }

// kernel: bottleneck_forward.4
= control target key start
LH: loop header
LB: loop body
LE: loop exit
PB: predicated region body
PF: predicated region fallthrough
CT: control target
= control target key end

     0   :  { %s4187_s0 = inlined_call_operand.hbm [shape: bf16[2,9,9,128], index: 0, kind: input, shape index: {}]   ;;  %s4188_s1 = inlined_call_operand.hbm [shape: bf16[2,9,9,128], index: 1, kind: input, shape index: {}]   ;;  %s4189_s2 = inlined_call_operand.hbm [shape: bf16[2,9,9,128], index: 2, kind: input, shape index: {}]   ;;  %s4190_s3 = inlined_call_operand.hbm [shape: bf16[2,9,9,128], index: 3, kind: input, shape index: {}]   ;;  %s4191_s4 = inlined_call_operand.hbm [shape: bf16[9,128,128], index: 4, kind: input, shape index: {}]   ;;  %s4192_s5 = inlined_call_operand.hbm [shape: f32[1,128], index: 5, kind: input, shape index: {}]   ;;  %s4193_s6 = inlined_call_operand.hbm [shape: bf16[2,8,8,128], index: 6, kind: output, shape index: {}]  }
   0x1   :  { %4216 = sst [smem:[#allocation25_spill]] %s4188_s1 }
   0x2   :  { %4217 = sst [smem:[#allocation26_spill]] %s4191_s4 }
   0x3   :  { %4218 = sst [smem:[#allocation27_spill]] %s4193_s6 }
   0x4   :  { %11 = vsyncpa [#allocation3], 0 }
   0x5   :  { %13 = vsyncpa [#allocation3 + $0x1], 0 }
   0x6   :  { %14 = vsyncpa [#allocation6], 0 }
   0x7   :  { %16 = vsyncpa [#allocation6 + $0x1], 0 }
   0x8   :  { %17 = vsyncpa [#allocation9], 0 }
   0x9   :  { %19 = vsyncpa [#allocation9 + $0x1], 0 }
   0xa   :  { %20 = vsyncpa [#allocation12], 0 }
   0xb   :  { %21 = vsyncpa [#allocation4], 0 }
   0xc   :  { %23 = vsyncpa [#allocation4 + $0x1], 0  ;;  %s3655_s21 = smov 0   ;;  %s3657_s22 = smov 0  }
   0xd   :  { %s3659_s23 = smov 0   ;;  %s3661_s24 = smov 0  }
   0xe   :  { %s3663_s25 = smov 0   ;;  %s3665_s26 = smov 0  }
   0xf LB: > { %4219 = sst [smem:[#allocation20_spill]] %s3587_s21  ;;  %s3686_s27 = sadd.s32 4294967295, %s3607_s26   ;;  %s3607_s26 = sphi %s3665_s26, %s29_s26   ;;  %s3603_s25 = sphi %s3663_s25, %s4263_s25   ;;  %s3599_s24 = sphi %s3661_s24, %s4262_s24   ;;  %s3595_s23 = sphi %s3659_s23, %s4266_s23   ;;  %s3591_s22 = sphi %s3657_s22, %s4265_s22   ;;  %s3587_s21 = sphi %s3655_s21, %s4264_s21  }
  0x10   : > { %4220 = sst [smem:[#allocation21_spill]] %s3603_s25  ;;  %s2539_s28 = sadd.s32 4294967294, %s3607_s26  }
  0x11   : > { %p55_p0 = scmp.ne.s32.totalorder %s3595_s23, %s3591_s22  ;;  %p56_p1 = scmp.eq.s32.totalorder %s3607_s26, 0 }
  0x12   : > { %p61_p2 = scmp.ne.s32.totalorder %s3591_s22, %s3587_s21  ;;  %p4194_p3 = scmp.eq.s32.totalorder %s3686_s27, 0 }
  0x13   : > { %p207_p4 = scmp.eq.s32.totalorder %s3686_s27, 1  ;;  %p3697_p5 = por %p56_p1, %p55_p0 }
  0x14   : > { %p213_p6 = scmp.eq.s32.totalorder %s2539_s28, 1  ;;  %p3703_p7 = por %p4194_p3, %p61_p2 }
  0x15   : > { %p3707_p8 = por %p207_p4, %p55_p0  ;;  %p2540_p10 = scmp.ge.s32.totalorder %s3607_s26, 1 }
  0x16   : > { %s4222_s7 = scalar_select %p3703_p7, 1, 0 }
  0x17   : > { %s4223_s8 = scalar_select %p3707_p8, 1, 0 }
  0x18   : > { %p3711_p9 = por %p213_p6, %p61_p2  ;;  %p220_p11 = scmp.lt.s32.totalorder %s3607_s26, 3 }
  0x19   : > { %s3609_s11 = smov [#allocation10]   ;;  %s41_s14 = sadd.s32 1, %s3603_s25 }
  0x1a   : > { %s4224_s9 = scalar_select %p3711_p9, 1, 0 }
  0x1b   : > { %p3717_p12 = pnand %p2540_p10, %p220_p11  ;;  %s232_s12 = sshll.u32 %s3609_s11, 4  ;;  %s3721_s12 = int_to_ptr.vmem [resolvable:$true] %s232_s12 }
  0x1c   : > { %4225 = sst [smem:[#allocation22_spill]] %s4224_s9  ;;  %s4199_s15 = sand.u32 1, %s3595_s23  }
  0x1d   : > { %s4226_s10 = scalar_select %p3717_p12, 1, 0 }
  0x1e   : > { %p3153_p13 = pneg %p3717_p12  ;;  %p3735_p4 = scmp.ge.s32.totalorder %s41_s14, 2 }
  0x1f   : > { %s4229_s4 = sld [smem:[#allocation26_spill]] }
  0x20   : > { %p3729_p2 = pnand %p3153_p13, %p4194_p3 }
  0x22   : > { %s4227_s13 = scalar_select %p3729_p2, 1, 0 }
  0x23   : > { %p4207_p10 = pneg %p3729_p2 }
  0x25   : > { %s3333_s19 = scalar_lea.hbm %s4229_s4, 9216 }
  0x26   : > { %p3334_p6 = scmp.ne.s32.totalorder %s4229_s4, %s3333_s19  ;;  %p3340_p0 = scmp.lt.u32.totalorder %s3333_s19, %s4229_s4 }
  0x28   : > { %p3336_p11 = pnand %p4207_p10, %p3334_p6 }
  0x2a   : > { %p3337_p13 = pneg %p3336_p11 }
  0x2c   : > { %p3342_p3 = pnand %p3340_p0, %p3337_p13 }
  0x2e   : > { %3345 = shalt.err (!%p3342_p3)
}
  0x2f   : > { %s3346_s17 = scalar_lea.vmem %s3721_s12, 9216  ;;  %p3354_p7 = scmp.lt.s32.totalorder %s3721_s12, %s3721_s12 }
  0x30   : > { %p3347_p1 = scmp.ne.s32.totalorder %s3721_s12, %s3346_s17  ;;  %p3355_p6 = scmp.lt.s32.totalorder %s3346_s17, %s3346_s17 }
  0x32   : > { %p3349_p9 = pnand %p3347_p1, %p4207_p10  ;;  %p3356_p11 = por %p3355_p6, %p3354_p7 }
  0x34   : > { %p3350_p8 = pneg %p3349_p9 }
  0x36   : > { %p3357_p12 = pnand %p3356_p11, %p3350_p8 }
  0x38   : > { %3360 = shalt.err (!%p3357_p12)
}
  0x39   : > { %s4200_s29 = smov 64   ;;  %s4202_s18 = smov 4  }
  0x3a   : > { %3156 = dma.hbm_to_vmem [thread:$0]  (!%p3729_p2), %s4229_s4, 9216, %s3721_s12, [#allocation9], %s4200_s29, %s4200_s29, %s4202_s18  }
  0x3b   : > { %s4268_s14 = smov (%p3735_p4, %s41_s14), 0  ;;  %s3775_s28 = smul.u32 72, %s4199_s15 }
  0x3c   : > { %4230 = sst [smem:[#allocation23_spill]] %s4268_s14  ;;  %p4231_p3 = scmp.lt.s32.totalorder %s3607_s26, 2 }
  0x3d   : > { %s45_s17 = ssub.s32 %s3603_s25, %s4268_s14  ;;  %s3788_s9 = smul.u32 1152, %s3603_s25 }
  0x3e   : > { %p3781_p7 = pnand %p4231_p3, %p3697_p5  ;;  %p46_p8 = scmp.eq.s32.totalorder %s45_s17, 0 }
  0x3f   : > { %s4206_s12 = sand.u32 1, %s3607_s26   ;;  %s4233_s16 = sadd.s32 1, %s3595_s23 }
  0x40   : > { %s4232_s11 = scalar_select %p3781_p7, 1, 0 }
  0x41   : > { %s3794_s19 = scalar_select %p46_p8, %s3595_s23, %s4233_s16  }
  0x42   : > { %s4235_s1 = sld [smem:[#allocation25_spill]]  ;;  %s282_s29 = scalar_lea.vmem [#allocation5], %s3775_s28 }
  0x43   : > { %4234 = sst [smem:[#allocation24_spill]] %s3794_s19  ;;  %s289_s18 = sshll.u32 %s282_s29, 4  ;;  %s3803_s18 = int_to_ptr.vmem [resolvable:$true] %s289_s18 }
  0x44   : > { %s3807_s4 = scalar_lea.sflag [#allocation6], %s4206_s12  ;;  %p3813_p9 = pneg %p3781_p7 }
  0x46   : > { %s4236_s16 = scalar_select %p3813_p9, 1, 0 }
  0x48   : > { %s3800_s30 = scalar_lea.hbm %s4235_s1, %s3788_s9  ;;  %s3366_s29 = scalar_lea.hbm %s4235_s1, 2304 }
  0x49   : > { %s3361_s17 = scalar_lea.hbm %s3800_s30, 1152  ;;  %p3367_p1 = scmp.lt.u32.totalorder %s3800_s30, %s4235_s1 }
  0x4a   : > { %p3362_p5 = scmp.ne.s32.totalorder %s3800_s30, %s3361_s17  ;;  %p3368_p4 = scmp.lt.u32.totalorder %s3366_s29, %s3361_s17 }
  0x4b   : > { %p3370_p6 = scmp.lt.u32.totalorder %s3361_s17, %s3800_s30 }
  0x4c   : > { %p3364_p12 = pnand %p3813_p9, %p3362_p5  ;;  %p3369_p13 = por %p3368_p4, %p3367_p1 }
  0x4e   : > { %p3365_p0 = pneg %p3364_p12  ;;  %p3371_p11 = por %p3370_p6, %p3369_p13 }
  0x50   : > { %p3372_p3 = pnand %p3371_p11, %p3365_p0 }
  0x52   : > { %3375 = shalt.err (!%p3372_p3)
}
  0x53   : > { %s3376_s12 = scalar_lea.vmem %s3803_s18, 1152  ;;  %s3612_s15 = smov [#allocation5]  }
  0x54   : > { %p3377_p8 = scmp.ne.s32.totalorder %s3803_s18, %s3376_s12  ;;  %s3381_s20 = sshll.u32 %s3612_s15, 4  ;;  %s3382_s20 = int_to_ptr.vmem [resolvable:$false] %s3381_s20 }
  0x55   : > { %s3383_s25 = scalar_lea.vmem %s3382_s20, 2304  ;;  %p3384_p10 = scmp.lt.s32.totalorder %s3803_s18, %s3382_s20 }
  0x56   : > { %p3379_p5 = pnand %p3377_p8, %p3813_p9  ;;  %p3385_p2 = scmp.lt.s32.totalorder %s3383_s25, %s3376_s12 }
  0x58   : > { %p3380_p12 = pneg %p3379_p5  ;;  %p3386_p1 = por %p3385_p2, %p3384_p10 }
  0x5a   : > { %p3387_p4 = pnand %p3386_p1, %p3380_p12 }
  0x5c   : > { %3390 = shalt.err (!%p3387_p4)
}
  0x5d   : > { %s4237_s14 = smov 4   ;;  %s4238_s17 = smov 64  }
  0x5e   : > { %3166 = dma.hbm_to_vmem [thread:$0]  (!%p3781_p7), %s3800_s30, 1152, %s3803_s18, %s3807_s4, %s4238_s17, %s4238_s17, %s4237_s14  }
  0x5f   : > { %s3613_s29 = smov [#allocation11]   ;;  %s3391_s12 = scalar_lea.hbm %s4192_s5, 16 }
  0x60   : > { %s246_s1 = sshll.u32 %s3613_s29, 4  ;;  %p3392_p2 = scmp.ne.s32.totalorder %s4192_s5, %s3391_s12  ;;  %s247_s1 = int_to_ptr.vmem [resolvable:$true] %s246_s1 }
  0x61   : > { %p4239_p10 = scmp.ne.s32.totalorder %s4227_s13, 0  ;;  %p3398_p11 = scmp.lt.u32.totalorder %s3391_s12, %s4192_s5 }
  0x63   : > { %p4240_p0 = pneg %p4239_p10 }
  0x65   : > { %p3394_p13 = pnand %p3392_p2, %p4240_p0 }
  0x67   : > { %p3395_p6 = pneg %p3394_p13 }
  0x69   : > { %p3400_p3 = pnand %p3398_p11, %p3395_p6 }
  0x6b   : > { %3403 = shalt.err (!%p3400_p3)
}
  0x6c   : > { %s3404_s18 = scalar_lea.vmem %s247_s1, 16  ;;  %p4241_p5 = pmov %p4240_p0 }
  0x6d   : > { %p3405_p8 = scmp.ne.s32.totalorder %s247_s1, %s3404_s18  ;;  %s3411_s19 = scalar_lea.vmem %s247_s1, 32 }
  0x6e   : > { %p3412_p4 = scmp.lt.s32.totalorder %s247_s1, %s247_s1  ;;  %p3413_p7 = scmp.lt.s32.totalorder %s3411_s19, %s3404_s18 }
  0x6f   : > { %p3407_p12 = pnand %p3405_p8, %p4241_p5 }
  0x70   : > { %p3414_p9 = por %p3413_p7, %p3412_p4 }
  0x71   : > { %p3408_p1 = pneg %p3407_p12 }
  0x73   : > { %p3415_p0 = pnand %p3414_p9, %p3408_p1 }
  0x75   : > { %3418 = shalt.err (!%p3415_p0)
}
  0x76   : > { %3159 = dma.hbm_to_vmem [thread:$0]  (!%p4239_p10), %s4192_s5, 16, %s247_s1, [#allocation12]  }
  0x77   : > { %s3864_s15 = scalar_lea.hbm %s4187_s0, %s3788_s9  ;;  %s261_s12 = scalar_lea.vmem [#allocation2], %s3775_s28 }
  0x78   : > { %s268_s20 = sshll.u32 %s261_s12, 4  ;;  %s4242_s13 = sand.u32 1, %s3595_s23   ;;  %s3867_s20 = int_to_ptr.vmem [resolvable:$true] %s268_s20 }
  0x79   : > { %s3871_s25 = scalar_lea.sflag [#allocation3], %s4242_s13  ;;  %s3419_s18 = scalar_lea.hbm %s3864_s15, 1152 }
  0x7a   : > { %p3420_p7 = scmp.ne.s32.totalorder %s3864_s15, %s3419_s18  ;;  %p4243_p9 = scmp.ne.s32.totalorder %s4236_s16, 0 }
  0x7b   : > { %s3424_s30 = scalar_lea.hbm %s4187_s0, 2304  ;;  %p3425_p13 = scmp.lt.u32.totalorder %s3864_s15, %s4187_s0 }
  0x7c   : > { %p3422_p2 = pnand %p3420_p7, %p4243_p9  ;;  %p3426_p6 = scmp.lt.u32.totalorder %s3424_s30, %s3419_s18 }
  0x7d   : > { %p3428_p3 = scmp.lt.u32.totalorder %s3419_s18, %s3864_s15 }
  0x7e   : > { %p3423_p10 = pneg %p3422_p2  ;;  %p3427_p11 = por %p3426_p6, %p3425_p13 }
  0x80   : > { %p3429_p8 = por %p3428_p3, %p3427_p11 }
  0x82   : > { %p3430_p5 = pnand %p3429_p8, %p3423_p10 }
  0x84   : > { %3433 = shalt.err (!%p3430_p5)
}
  0x85   : > { %s3434_s29 = scalar_lea.vmem %s3867_s20, 1152  ;;  %s3614_s12 = smov [#allocation2]  }
  0x86   : > { %p3435_p12 = scmp.ne.s32.totalorder %s3867_s20, %s3434_s29  ;;  %s3439_s13 = sshll.u32 %s3614_s12, 4  ;;  %s3440_s13 = int_to_ptr.vmem [resolvable:$false] %s3439_s13 }
  0x87   : > { %s3441_s1 = scalar_lea.vmem %s3440_s13, 2304  ;;  %p3442_p0 = scmp.lt.s32.totalorder %s3867_s20, %s3440_s13 }
  0x88   : > { %p3437_p1 = pnand %p3435_p12, %p4243_p9  ;;  %p3443_p7 = scmp.lt.s32.totalorder %s3441_s1, %s3434_s29 }
  0x8a   : > { %p3438_p4 = pneg %p3437_p1  ;;  %p3444_p2 = por %p3443_p7, %p3442_p0 }
  0x8c   : > { %p3445_p13 = pnand %p3444_p2, %p3438_p4 }
  0x8e   : > { %3448 = shalt.err (!%p3445_p13)
}
  0x8f   : > { %p4244_p10 = scmp.ne.s32.totalorder %s4232_s11, 0  ;;  %s3902_s30 = scalar_lea.hbm %s4189_s2, %s3788_s9 }
  0x90   : > { %s303_s6 = scalar_lea.vmem [#allocation7], %s3775_s28  ;;  %s3449_s29 = scalar_lea.hbm %s3902_s30, 1152 }
  0x91   : > { %3163 = dma.hbm_to_vmem [thread:$0]  (!%p4244_p10), %s3864_s15, 1152, %s3867_s20, %s3871_s25, %s4238_s17, %s4238_s17, %s4237_s14  }
  0x92   : > { %s310_s21 = sshll.u32 %s303_s6, 4  ;;  %p3450_p6 = scmp.ne.s32.totalorder %s3902_s30, %s3449_s29  ;;  %s3905_s21 = int_to_ptr.vmem [resolvable:$true] %s310_s21 }
  0x93   : > { %s3454_s20 = scalar_lea.hbm %s4189_s2, 2304  ;;  %p3455_p8 = scmp.lt.u32.totalorder %s3902_s30, %s4189_s2 }
  0x94   : > { %p3452_p11 = pnand %p3450_p6, %p4243_p9  ;;  %p3456_p5 = scmp.lt.u32.totalorder %s3454_s20, %s3449_s29 }
  0x95   : > { %p3458_p1 = scmp.lt.u32.totalorder %s3449_s29, %s3902_s30 }
  0x96   : > { %p3453_p3 = pneg %p3452_p11  ;;  %p3457_p12 = por %p3456_p5, %p3455_p8 }
  0x98   : > { %p3459_p4 = por %p3458_p1, %p3457_p12 }
  0x9a   : > { %p3460_p0 = pnand %p3459_p4, %p3453_p3 }
  0x9c   : > { %3463 = shalt.err (!%p3460_p0)
}
  0x9d   : > { %s3464_s1 = scalar_lea.vmem %s3905_s21, 1152  ;;  %s3615_s18 = smov [#allocation7]  }
  0x9e   : > { %p3465_p7 = scmp.ne.s32.totalorder %s3905_s21, %s3464_s1  ;;  %s3469_s19 = sshll.u32 %s3615_s18, 4  ;;  %s3470_s19 = int_to_ptr.vmem [resolvable:$false] %s3469_s19 }
  0x9f   : > { %s3471_s6 = scalar_lea.vmem %s3470_s19, 2304  ;;  %p3472_p6 = scmp.lt.s32.totalorder %s3905_s21, %s3470_s19 }
  0xa0   : > { %p3467_p2 = pnand %p3465_p7, %p4243_p9  ;;  %p3473_p11 = scmp.lt.s32.totalorder %s3471_s6, %s3464_s1 }
  0xa2   : > { %p3468_p13 = pneg %p3467_p2  ;;  %p3474_p8 = por %p3473_p11, %p3472_p6 }
  0xa4   : > { %p3475_p5 = pnand %p3474_p8, %p3468_p13 }
  0xa6   : > { %3478 = shalt.err (!%p3475_p5)
}
  0xa7   : > { %3169 = dma.hbm_to_vmem [thread:$0]  (!%p4244_p10), %s3902_s30, 1152, %s3905_s21, %s3807_s4, %s4238_s17, %s4238_s17, %s4237_s14  }
  0xa8   : > { %s3936_s15 = scalar_lea.hbm %s4190_s3, %s3788_s9  ;;  %s324_s20 = scalar_lea.vmem [#allocation8], %s3775_s28 }
  0xa9   : > { %s331_s25 = sshll.u32 %s324_s20, 4  ;;  %s4245_s13 = sand.u32 1, %s3607_s26   ;;  %s3939_s25 = int_to_ptr.vmem [resolvable:$true] %s331_s25 }
  0xaa   : > { %s3943_s1 = scalar_lea.sflag [#allocation9], %s4245_s13  ;;  %s3479_s18 = scalar_lea.hbm %s3936_s15, 1152 }
  0xab   : > { %p3480_p3 = scmp.ne.s32.totalorder %s3936_s15, %s3479_s18  ;;  %s3484_s9 = scalar_lea.hbm %s4190_s3, 2304 }
  0xac   : > { %p3485_p4 = scmp.lt.u32.totalorder %s3936_s15, %s4190_s3  ;;  %p3486_p0 = scmp.lt.u32.totalorder %s3484_s9, %s3479_s18 }
  0xad   : > { %p3482_p12 = pnand %p3480_p3, %p4243_p9  ;;  %p3488_p2 = scmp.lt.u32.totalorder %s3479_s18, %s3936_s15 }
  0xae   : > { %p3487_p7 = por %p3486_p0, %p3485_p4 }
  0xaf   : > { %p3483_p1 = pneg %p3482_p12 }
  0xb0   : > { %p3489_p13 = por %p3488_p2, %p3487_p7 }
  0xb2   : > { %p3490_p6 = pnand %p3489_p13, %p3483_p1 }
  0xb4   : > { %3493 = shalt.err (!%p3490_p6)
}
  0xb5   : > { %s3494_s28 = scalar_lea.vmem %s3939_s25, 1152  ;;  %s3616_s6 = smov [#allocation8]  }
  0xb6   : > { %p3495_p11 = scmp.ne.s32.totalorder %s3939_s25, %s3494_s28  ;;  %s3499_s29 = sshll.u32 %s3616_s6, 4  ;;  %s3500_s29 = int_to_ptr.vmem [resolvable:$false] %s3499_s29 }
  0xb7   : > { %s3501_s12 = scalar_lea.vmem %s3500_s29, 2304  ;;  %p3502_p3 = scmp.lt.s32.totalorder %s3939_s25, %s3500_s29 }
  0xb8   : > { %p3497_p8 = pnand %p3495_p11, %p4243_p9  ;;  %p3503_p12 = scmp.lt.s32.totalorder %s3501_s12, %s3494_s28 }
  0xba   : > { %p3498_p5 = pneg %p3497_p8  ;;  %p3504_p4 = por %p3503_p12, %p3502_p3 }
  0xbc   : > { %p3505_p0 = pnand %p3504_p4, %p3498_p5 }
  0xbe   : > { %3508 = shalt.err (!%p3505_p0)
}
  0xbf   : > { %3172 = dma.hbm_to_vmem [thread:$0]  (!%p4244_p10), %s3936_s15, 1152, %s3939_s25, %s3943_s1, %s4238_s17, %s4238_s17, %s4237_s14  }
  0xc0   : > { %p4246_p9 = scmp.ne.s32.totalorder %s4226_s10, 0 }
  0xc1   : > { %s3973_s16 = sand.u32 (!%p4246_p9), 1, %s3591_s22   ;;  %p4247_p1 = scmp.ne.s32.totalorder (!%p4246_p9), %s4222_s7, 0 }
  0xc2   : > { %343 = sbr.rel (%p4246_p9) target bundleno = 615 (0x267), region = 44  ;;  %s346_s13 = scalar_lea.sflag (!%p4246_p9), [#allocation3], %s3973_s16 }
  0xc3   : > { %s3134_s20 = smul.u32 (!%p4246_p9), 72, %s3973_s16 }
  0xc5   : > { %s3977_s18 = scalar_lea.vmem (!%p4246_p9), [#allocation2], %s3134_s20 }
  0xc9   : > { %3562 = dma.done.wait (%p4247_p1), %s346_s13, 1152  }
  0xca   : > { %3564 = vsyncadd (%p4247_p1), %s346_s13, 4294966144  ;;  %s354_s11 = sand.u32 1, %s3686_s27   ;;  %s3984_s14 = scalar_lea.vmem [#allocation5], %s3134_s20 }
  0xcb   : > { %s355_s10 = scalar_lea.sflag [#allocation6], %s354_s11 }
  0xcc   : > { %3566 = dma.done.wait (%p4247_p1), %s355_s10, 2304  }
  0xcd   : > { %3568 = vsyncadd (%p4247_p1), %s355_s10, 4294964992  ;;  %s3990_s17 = scalar_lea.vmem [#allocation7], %s3134_s20  ;;  %s373_s15 = scalar_lea.sflag [#allocation9], %s354_s11 }
  0xce   : > { %s3992_s25 = scalar_lea.vmem [#allocation8], %s3134_s20 }
  0xcf   : > { %3570 = dma.done.wait (%p4247_p1), %s373_s15, 1152  }
  0xd0   : > { %3572 = vsyncadd (%p4247_p1), %s373_s15, 4294966144  ;;  %p4248_p10 = scmp.eq.s32.totalorder %s3686_s27, 0 }
  0xd2   : > { %3574 = dma.done.wait (%p4248_p10), [#allocation9], 9216   ;;  %p4249_p7 = pmov %p4248_p10 }
  0xd4   : > { %3576 = vsyncadd (%p4249_p7), [#allocation9], 4294958080  ;;  %p4250_p2 = pmov %p4249_p7 }
  0xd6   : > { %3578 = dma.done.wait (%p4250_p2), [#allocation12], 16   ;;  %p4251_p13 = pmov %p4250_p2 }
  0xd7   : > { %v3237_v0 = vld [vmem:[#allocation10 + $0x40] sm:$0xff]   ;;  %v3239_v2 = vld [vmem:[#allocation10 + $0x48] sm:$0xff]   ;;  %v3241_v4 = vld [vmem:[#allocation10 + $0x50] sm:$0xff]   ;;  %vm775_vm0 = vsmask.f32 3328  ;;  %s2551_s27 = sshll.u32 %s3973_s16, 5 }
  0xd8   : > { %3580 = vsyncadd (%p4251_p13), [#allocation12], 4294967280  ;;  %v3238_v1 = vld [vmem:[#allocation10 + $0x100] sm:$0xff]   ;;  %2830 = vmatprep.subr.bf16.mxu1 %v3237_v0  ;;  %v3240_v3 = vld [vmem:[#allocation10 + $0x108] sm:$0xff]   ;;  %vm776_vm1 = vsmask.f32 7440 }
  0xd9   : > { %2926 = vmatprep.subr.bf16.mxu0 %v3238_v1  ;;  %2831 = vmatpush3.bf16.msra.mxu1 %v3237_v0  ;;  %v3242_v5 = vld [vmem:[#allocation10 + $0x110] sm:$0xff]   ;;  %v3243_v6 = vld [vmem:[#allocation10 + $0x58] sm:$0xff]   ;;  %v3245_v8 = vld [vmem:[#allocation10 + $0x60] sm:$0xff]   ;;  %s427_s7 = scalar_lea.vmem [#allocation13], %s2551_s27  ;;  %s2698_s4 = sshll.u32 %s3599_s24, 9 }
  0xda   : > { %2927 = vmatpush3.bf16.msra.mxu0 %v3238_v1  ;;  %2832 = vmatprep.subr.bf16.mxu1 %v3239_v2  ;;  %v3244_v7 = vld [vmem:[#allocation10 + $0x118] sm:$0xff]   ;;  %v3246_v9 = vld [vmem:[#allocation10 + $0x120] sm:$0xff]   ;;  %v3247_v10 = vld [vmem:[#allocation10 + $0x68] sm:$0xff]   ;;  %s2353_s1 = sshll.u32 %s427_s7, 4  ;;  %s4254_s21 = sld [smem:[#allocation27_spill]]  ;;  %s4133_s1 = int_to_ptr.vmem [resolvable:$true] %s2353_s1 }
  0xdb   : > { %2928 = vmatprep.subr.bf16.mxu0 %v3240_v3  ;;  %v3253_v11 = vld [vmem:[%s3984_s14] ss:$8 sps:$4 sm:$0xff]   ;;  %v3248_v12 = vld [vmem:[#allocation10 + $0x128] sm:$0xff]   ;;  %v1393_v54 = vld [vmem:[%s3990_s17 + $0x14] sm:$0x1]  ;;  %s2338_s28 = scalar_lea.sflag [#allocation4], %s3973_s16 }
  0xdc   : > { %2846 = vmatprep.mubr.bf16.mxu1 %v3253_v11  ;;  %v3255_v13 = vld [vmem:[%s3992_s25] ss:$8 sps:$4 sm:$0xff]   ;;  %v3257_v20 = vld [vmem:[%s3984_s14 + $0x10] ss:$8 sps:$4 sm:$0xff]   ;;  %v1389_v35 = vld [vmem:[%s3990_s17 + $0x4] sm:$0x1] }
  0xdd   : > { %2833 = vmatpush3.bf16.msra.mxu1 %v3239_v2  ;;  %v3249_v14 = vld [vmem:[#allocation10 + $0x70] sm:$0xff]   ;;  %2942 = vmatprep.mubr.bf16.mxu0 %v3255_v13  ;;  %v3251_v16 = vld [vmem:[#allocation10 + $0x78] sm:$0xff]   ;;  %v3254_v18 = vld [vmem:[#allocation10] sm:$0xff]   ;;  %v1414_v40 = vshll.u32 %v1389_v35, 16  ;;  %s3509_s6 = scalar_lea.vmem %s4133_s1, 512  ;;  %p4256_p11 = scmp.ne.s32.totalorder %s4223_s8, 0 }
  0xde   : > { %2929 = vmatpush3.bf16.msra.mxu0 %v3240_v3  ;;  %2834 = vmatprep.subr.bf16.mxu1 %v3241_v4  ;;  %v3250_v15 = vld [vmem:[#allocation10 + $0x130] sm:$0xff]   ;;  %v3252_v17 = vld [vmem:[#allocation10 + $0x138] sm:$0xff]   ;;  %v3256_v19 = vld [vmem:[#allocation10 + $0x140] sm:$0xff]   ;;  %p3510_p6 = scmp.ne.s32.totalorder %s4133_s1, %s3509_s6  ;;  %s3617_s29 = smov [#allocation13]  }
  0xdf   : > { %2930 = vmatprep.subr.bf16.mxu0 %v3242_v5  ;;  %v3258_v21 = vld [vmem:[%s3992_s25 + $0x10] ss:$8 sps:$4 sm:$0xff]   ;;  %v3269_v24 = vld [vmem:[%s3984_s14 + $0x20] ss:$8 sps:$4 sm:$0xff]   ;;  %v1391_v37 = vld [vmem:[%s3990_s17 + $0xc] sm:$0x1] }
  0xe0   : > { %v3259_v22 = vld [vmem:[#allocation10 + $0x8] sm:$0xff]   ;;  %v3271_v25 = vld [vmem:[%s3992_s25 + $0x20] ss:$8 sps:$4 sm:$0xff]   ;;  %v1428_v43 = vshll.u32 %v1391_v37, 16  ;;  %v1416_v51 = vrot.slane %v1414_v40, 5  ;;  %vm4022_vm2 = vmor %vm775_vm0, %vm776_vm1  ;;  %s4255_s19 = smov %s4254_s21  ;;  %s4138_s24 = scalar_lea.hbm %s4254_s21, %s2698_s4 }
  0xe1   : > { %2835 = vmatpush3.bf16.msra.mxu1 %v3241_v4  ;;  %v3260_v23 = vld [vmem:[#allocation10 + $0x148] sm:$0xff]   ;;  %v3261_v26 = vld [vmem:[#allocation10 + $0x10] sm:$0xff]   ;;  %v3263_v28 = vld [vmem:[#allocation10 + $0x18] sm:$0xff]   ;;  %v1442_v4 = vshll.u32 %v1393_v54, 16  ;;  %p3511_p8 = pnand %p3510_p6, %p4256_p11  ;;  %s3513_s12 = sshll.u32 %s3617_s29, 4  ;;  %s3514_s12 = int_to_ptr.vmem [resolvable:$false] %s3513_s12 }
  0xe2   : > { %2931 = vmatpush3.bf16.msra.mxu0 %v3242_v5  ;;  %2836 = vmatprep.subr.bf16.mxu1 %v3243_v6  ;;  %v3262_v27 = vld [vmem:[#allocation10 + $0x150] sm:$0xff]   ;;  %v3264_v31 = vld [vmem:[#allocation10 + $0x158] sm:$0xff]   ;;  %v3265_v33 = vld [vmem:[#allocation10 + $0x20] sm:$0xff]   ;;  %v1430_v52 = vrot.slane %v1428_v43, 5  ;;  %s3515_s20 = scalar_lea.vmem %s3514_s12, 1024  ;;  %p3516_p3 = scmp.lt.s32.totalorder %s4133_s1, %s3514_s12 }
  0xe3   : > { %2932 = vmatprep.subr.bf16.mxu0 %v3244_v7  ;;  %v3273_v29 = vld [vmem:[%s3984_s14 + $0x30] ss:$8 sps:$4 sm:$0xff]   ;;  %v1392_v53 = vld [vmem:[%s3990_s17 + $0x10] sm:$0xf]  ;;  %v1394_v57 = vld [vmem:[%s3990_s17 + $0x18] sm:$0xf]  ;;  %p3512_p5 = pneg %p3511_p8  ;;  %p3517_p12 = scmp.lt.s32.totalorder %s3515_s20, %s3509_s6 }
  0xe4   : > { %v3274_v30 = vld [vmem:[%s3992_s25 + $0x30] ss:$8 sps:$4 sm:$0xff]   ;;  %v1395_v58 = vld [vmem:[%s3990_s17 + $0x1c] sm:$0x1]  ;;  %v1433_v59 = vshrl.u32 %v1392_v53, 16  ;;  %v1436_v60 = vshll.u32 %v1392_v53, 16 }
  0xe5   : > { %2837 = vmatpush3.bf16.msra.mxu1 %v3243_v6  ;;  %v3277_v32 = vld [vmem:[%s3977_s18] ss:$8 sps:$4 sm:$0xff]   ;;  %v1447_v63 = vshrl.u32 %v1394_v57, 16  ;;  %v1450_v0 = vshll.u32 %v1394_v57, 16  ;;  %v1402_v53 = vld [vmem:[%s3990_s17 + $0x38] sm:$0xf]  ;;  %p3518_p4 = por %p3517_p12, %p3516_p3 }
  0xe6   : > { %2933 = vmatpush3.bf16.msra.mxu0 %v3244_v7  ;;  %2838 = vmatprep.subr.bf16.mxu1 %v3245_v8  ;;  %v1388_v34 = vld [vmem:[%s3990_s17] sm:$0xf]  ;;  %v1390_v36 = vld [vmem:[%s3990_s17 + $0x8] sm:$0xf]  ;;  %v1435_v2 = vrot.slane %v1433_v59, 4  ;;  %v1438_v3 = vrot.slane %v1436_v60, 5 }
  0xe7   : > { %2934 = vmatprep.subr.bf16.mxu0 %v3246_v9  ;;  %v1405_v38 = vshrl.u32 %v1388_v34, 16  ;;  %v1408_v39 = vshll.u32 %v1388_v34, 16  ;;  %v1419_v41 = vshrl.u32 %v1390_v36, 16  ;;  %v1422_v42 = vshll.u32 %v1390_v36, 16  ;;  %v3266_v44 = vld [vmem:[#allocation10 + $0x160] sm:$0xff]   ;;  %v3267_v48 = vld [vmem:[#allocation10 + $0x28] sm:$0xff]   ;;  %p3519_p0 = pnand %p3518_p4, %p3512_p5 }
  0xe8   : > { %v3268_v61 = vld [vmem:[#allocation10 + $0x168] sm:$0xff]   ;;  %v3270_v5 = vld [vmem:[#allocation10 + $0x30] sm:$0xff]   ;;  %v1449_v7 = vrot.slane %v1447_v63, 4  ;;  %v1403_v54 = vld [vmem:[%s3990_s17 + $0x3c] sm:$0x1] }
  0xe9   : > { %2839 = vmatpush3.bf16.msra.mxu1 %v3245_v8  ;;  %v1407_v45 = vrot.slane %v1405_v38, 4  ;;  %v1410_v46 = vrot.slane %v1408_v39, 5  ;;  %v1421_v47 = vrot.slane %v1419_v41, 4  ;;  %v1424_v49 = vrot.slane %v1422_v42, 5  ;;  %v3291_v39 = vld [vmem:[%s3977_s18 + $0x20] ss:$8 sps:$4 sm:$0xff]  }
  0xea   : > { %2935 = vmatpush3.bf16.msra.mxu0 %v3246_v9  ;;  %2840 = vmatprep.subr.bf16.mxu1 %v3247_v10  ;;  %v1452_v8 = vrot.slane %v1450_v0, 5  ;;  %v1456_v9 = vshll.u32 %v1395_v58, 16  ;;  %v3283_v42 = vld [vmem:[#allocation10 + $0x90] sm:$0xff]   ;;  %v1512_v63 = vshll.u32 %v1403_v54, 16  ;;  %v3285_v0 = vld [vmem:[#allocation10 + $0x98] sm:$0xff]  }
  0xeb   : > { %2936 = vmatprep.subr.bf16.mxu0 %v3248_v12  ;;  %v1411_v50 = vor.u32 %v1410_v46, %v1407_v45  ;;  %v1425_v56 = vor.u32 %v1424_v49, %v1421_v47  ;;  %v3284_v45 = vld [vmem:[#allocation10 + $0x190] sm:$0xff]  }
  0xec   : > { %v1400_v49 = vld [vmem:[%s3990_s17 + $0x30] sm:$0xf] }
  0xed   : > { %2841 = vmatpush3.bf16.msra.mxu1 %v3247_v10  ;;  %v1412_v62 = vrot.slane %v1411_v50, 4  ;;  %v1426_v1 = vrot.slane %v1425_v56, 4  ;;  %v3272_v10 = vld [vmem:[#allocation10 + $0x170] sm:$0xff]   ;;  %v1489_v57 = vshrl.u32 %v1400_v49, 16  ;;  %v1492_v58 = vshll.u32 %v1400_v49, 16 }
  0xee   : > { %2937 = vmatpush3.bf16.msra.mxu0 %v3248_v12  ;;  %2842 = vmatprep.subr.bf16.mxu1 %v3249_v14  ;;  %v1439_v12 = vor.u32 %v1438_v3, %v1435_v2  ;;  %v3292_v54 = vld [vmem:[#allocation10 + $0xb0] sm:$0xff]  }
  0xef   : > { %2938 = vmatprep.subr.bf16.mxu0 %v3250_v15  ;;  %v1417_v6 = vsel %vm4022_vm2, %v1412_v62, %v1416_v51  ;;  %v1431_v11 = vsel %vm4022_vm2, %v1426_v1, %v1430_v52  ;;  %v3294_v51 = vld [vmem:[%s3977_s18 + $0x30] ss:$8 sps:$4 sm:$0xff]   ;;  %v1401_v52 = vld [vmem:[%s3990_s17 + $0x34] sm:$0x1]  ;;  %v1506_v62 = vshll.u32 %v1402_v53, 16  ;;  %v1491_v2 = vrot.slane %v1489_v57, 4 }
  0xf0   : > { %v2612_v13 = vcombine.low %v1417_v6, %v1431_v11  ;;  %v1498_v59 = vshll.u32 %v1401_v52, 16  ;;  %v1494_v3 = vrot.slane %v1492_v58, 5 }
  0xf1   : > { %2843 = vmatpush3.bf16.msra.mxu1 %v3249_v14  ;;  %v1453_v14 = vor.u32 %v1452_v8, %v1449_v7  ;;  %v1508_v8 = vrot.slane %v1506_v62, 5 }
  0xf2   : > { %2939 = vmatpush3.bf16.msra.mxu0 %v3250_v15  ;;  %2844 = vmatprep.subr.bf16.mxu1 %v3251_v16  ;;  %v3275_v15 = vld [vmem:[#allocation10 + $0x38] sm:$0xff]   ;;  %v1495_v11 = vor.u32 %v1494_v3, %v1491_v2 }
  0xf3   : > { %2940 = vmatprep.subr.bf16.mxu0 %v3252_v17 }
  0xf5   : > { %2845 = vmatpush3.bf16.msra.mxu1 %v3251_v16  ;;  %v1444_v16 = vrot.slane %v1442_v4, 5  ;;  %v1500_v4 = vrot.slane %v1498_v59, 5 }
  0xf6   : > { %2941 = vmatpush3.bf16.msra.mxu0 %v3252_v17  ;;  %2854 = vmatprep.subr.bf16.mxu1 %v3254_v18  ;;  %v1458_v17 = vrot.slane %v1456_v9, 5  ;;  %v1514_v9 = vrot.slane %v1512_v63, 5 }
  0xf7   : > { %2950 = vmatprep.subr.bf16.mxu0 %v3256_v19 }
  0xf8   : > { %2847 = vmatmul.mubr.bf16.vlgmr.msra.gmra.mrb[0].mxu1 %v3257_v20  ;;  %v3276_v20 = vld [vmem:[#allocation10 + $0x178] sm:$0xff]  }
  0xf9   : > { %2855 = vmatpush3.bf16.msra.mxu1 %v3254_v18  ;;  %2943 = vmatmul.mubr.bf16.vlgmr.msra.gmra.mrb[0].mxu0 %v3258_v21  ;;  %v1440_v18 = vrot.slane %v1439_v12, 4  ;;  %v3278_v21 = vld [vmem:[#allocation10 + $0x80] sm:$0xff]  }
  0xfa   : > { %2951 = vmatpush3.bf16.msra.mxu0 %v3256_v19  ;;  %2856 = vmatprep.subr.bf16.mxu1 %v3259_v22  ;;  %v1454_v19 = vrot.slane %v1453_v14, 4  ;;  %v759_v12 = vld [vmem:[%s3977_s18] sm:$0xf]  ;;  %v761_v14 = vld [vmem:[%s3977_s18 + $0x8] sm:$0xf] }
  0xfb   : > { %2952 = vmatprep.subr.bf16.mxu0 %v3260_v23  ;;  %2850 = vmatprep.mubr.bf16.mxu1 %v3269_v24  ;;  %v3279_v24 = vld [vmem:[#allocation10 + $0x180] sm:$0xff]  }
  0xfc   : > { %2946 = vmatprep.mubr.bf16.mxu0 %v3271_v25  ;;  %v3280_v25 = vld [vmem:[%s3977_s18 + $0x10] ss:$8 sps:$4 sm:$0xff]  }
  0xfd   : > { %2857 = vmatpush3.bf16.msra.mxu1 %v3259_v22  ;;  %v1445_v22 = vsel %vm4022_vm2, %v1440_v18, %v1444_v16  ;;  %v779_v18 = vshrl.u32 %v759_v12, 16 }
  0xfe   : > { %2953 = vmatpush3.bf16.msra.mxu0 %v3260_v23  ;;  %2858 = vmatprep.subr.bf16.mxu1 %v3261_v26  ;;  %v1459_v23 = vsel %vm4022_vm2, %v1454_v19, %v1458_v17  ;;  %v762_v17 = vld [vmem:[%s3977_s18 + $0xc] sm:$0x1]  ;;  %v782_v19 = vshll.u32 %v759_v12, 16  ;;  %v767_v12 = vld [vmem:[%s3977_s18 + $0x20] sm:$0xf] }
  0xff   : > { %2954 = vmatprep.subr.bf16.mxu0 %v3262_v27 }
 0x100   : > { %2851 = vmatmul.mubr.bf16.gmra.mrb[4].mxu1 %v3273_v29  ;;  %v2613_v29 = vcombine.low %v1445_v22, %v1459_v23  ;;  %v793_v22 = vshrl.u32 %v761_v14, 16  ;;  %v796_v23 = vshll.u32 %v761_v14, 16 }
 0x101   : > { %2859 = vmatpush3.bf16.msra.mxu1 %v3261_v26  ;;  %2947 = vmatmul.mubr.bf16.gmra.mrb[4].mxu0 %v3274_v30  ;;  %v3281_v26 = vld [vmem:[#allocation10 + $0x88] sm:$0xff]  }
 0x102   : > { %2955 = vmatpush3.bf16.msra.mxu0 %v3262_v27  ;;  %2860 = vmatprep.subr.bf16.mxu1 %v3263_v28  ;;  %v1396_v27 = vld [vmem:[%s3990_s17 + $0x20] sm:$0xf] }
 0x103   : > { %2956 = vmatprep.subr.bf16.mxu0 %v3264_v31  ;;  %2870 = vmatprep.mubr.bf16.mxu1 %v3277_v32  ;;  %v3282_v30 = vld [vmem:[#allocation10 + $0x188] sm:$0xff]   ;;  %v1464_v34 = vshll.u32 %v1396_v27, 16 }
 0x104   : > { %2966 = vmatprep.mubr.bf16.mxu0 %v2612_v13  ;;  %v1399_v32 = vld [vmem:[%s3990_s17 + $0x2c] sm:$0x1]  ;;  %v760_v13 = vld [vmem:[%s3977_s18 + $0x4] sm:$0x1] }
 0x105   : > { %2861 = vmatpush3.bf16.msra.mxu1 %v3263_v28  ;;  %v1397_v28 = vld [vmem:[%s3990_s17 + $0x24] sm:$0x1]  ;;  %v1484_v38 = vshll.u32 %v1399_v32, 16  ;;  %v1466_v41 = vrot.slane %v1464_v34, 5  ;;  %v798_v32 = vrot.slane %v796_v23, 5 }
 0x106   : > { %2957 = vmatpush3.bf16.msra.mxu0 %v3264_v31  ;;  %2862 = vmatprep.subr.bf16.mxu1 %v3265_v33  ;;  %v1398_v31 = vld [vmem:[%s3990_s17 + $0x28] sm:$0xf]  ;;  %v1470_v35 = vshll.u32 %v1397_v28, 16 }
 0x107   : > { %2958 = vmatprep.subr.bf16.mxu0 %v3266_v44  ;;  %v1475_v36 = vshrl.u32 %v1398_v31, 16  ;;  %v1478_v37 = vshll.u32 %v1398_v31, 16  ;;  %v795_v31 = vrot.slane %v793_v22, 4  ;;  %v3289_v34 = vld [vmem:[#allocation10 + $0xa8] sm:$0xff]  }
 0x108   : > { %v1472_v47 = vrot.slane %v1470_v35, 5 }
 0x109   : > { %2863 = vmatpush3.bf16.msra.mxu1 %v3265_v33  ;;  %v1461_v33 = vshrl.u32 %v1396_v27, 16  ;;  %v1477_v43 = vrot.slane %v1475_v36, 4  ;;  %v784_v27 = vrot.slane %v782_v19, 5  ;;  %v838_v19 = vshll.u32 %v767_v12, 16 }
 0x10a   : > { %2959 = vmatpush3.bf16.msra.mxu0 %v3266_v44  ;;  %2864 = vmatprep.subr.bf16.mxu1 %v3267_v48  ;;  %v1480_v44 = vrot.slane %v1478_v37, 5  ;;  %v3298_v37 = vld [vmem:[%s3977_s18 + $0x8] ss:$8 sps:$4 sm:$0xff]  }
 0x10b   : > { %2960 = vmatprep.subr.bf16.mxu0 %v3268_v61  ;;  %v1463_v40 = vrot.slane %v1461_v33, 4 }
 0x10c   : > { %v1481_v50 = vor.u32 %v1480_v44, %v1477_v43  ;;  %v765_v44 = vld [vmem:[%s3977_s18 + $0x18] sm:$0xf] }
 0x10d   : > { %2865 = vmatpush3.bf16.msra.mxu1 %v3267_v48  ;;  %v1467_v46 = vor.u32 %v1466_v41, %v1463_v40  ;;  %v1486_v48 = vrot.slane %v1484_v38, 5  ;;  %v3290_v38 = vld [vmem:[#allocation10 + $0x1a8] sm:$0xff]   ;;  %v799_v40 = vor.u32 %v798_v32, %v795_v31  ;;  %v763_v41 = vld [vmem:[%s3977_s18 + $0x10] sm:$0xf] }
 0x10e   : > { %2961 = vmatpush3.bf16.msra.mxu0 %v3268_v61  ;;  %2866 = vmatprep.subr.bf16.mxu1 %v3270_v5  ;;  %v1482_v60 = vrot.slane %v1481_v50, 4  ;;  %v1503_v61 = vshrl.u32 %v1402_v53, 16  ;;  %v821_v50 = vshrl.u32 %v765_v44, 16  ;;  %v824_v53 = vshll.u32 %v765_v44, 16  ;;  %v771_v32 = vld [vmem:[%s3977_s18 + $0x30] sm:$0xf] }
 0x10f   : > { %2962 = vmatprep.subr.bf16.mxu0 %v3272_v10  ;;  %v1468_v56 = vrot.slane %v1467_v46, 4  ;;  %v807_v46 = vshrl.u32 %v763_v41, 16 }
 0x110   : > { %v1487_v6 = vsel %vm4022_vm2, %v1482_v60, %v1486_v48  ;;  %v1505_v7 = vrot.slane %v1503_v61, 4  ;;  %v810_v48 = vshll.u32 %v763_v41, 16  ;;  %v823_v59 = vrot.slane %v821_v50, 4 }
 0x111   : > { %2867 = vmatpush3.bf16.msra.mxu1 %v3270_v5  ;;  %v1473_v1 = vsel %vm4022_vm2, %v1468_v56, %v1472_v47  ;;  %v3286_v5 = vld [vmem:[#allocation10 + $0x198] sm:$0xff]   ;;  %v800_v47 = vrot.slane %v799_v40, 4  ;;  %v809_v52 = vrot.slane %v807_v46, 4  ;;  %v3293_v56 = vld [vmem:[#allocation10 + $0x1b0] sm:$0xff]   ;;  %v826_v63 = vrot.slane %v824_v53, 5 }
 0x112   : > { %2963 = vmatpush3.bf16.msra.mxu0 %v3272_v10  ;;  %2868 = vmatprep.subr.bf16.mxu1 %v3275_v15  ;;  %v2614_v10 = vcombine.low %v1473_v1, %v1487_v6  ;;  %v1509_v16 = vor.u32 %v1508_v8, %v1505_v7  ;;  %v812_v58 = vrot.slane %v810_v48, 5  ;;  %v3296_v6 = vld [vmem:[#allocation10 + $0x1b8] sm:$0xff]   ;;  %v3297_v7 = vld [vmem:[#allocation10 + $0xc0] sm:$0xff]   ;;  %v866_v40 = vshll.u32 %v771_v32, 16  ;;  %v3304_v46 = vld [vmem:[#allocation10 + $0x1d0] sm:$0xff]  }
 0x113   : > { %2964 = vmatprep.subr.bf16.mxu0 %v3276_v20  ;;  %v827_v1 = vor.u32 %v826_v63, %v823_v59 }
 0x115   : > { %2869 = vmatpush3.bf16.msra.mxu1 %v3275_v15  ;;  %v3287_v15 = vld [vmem:[#allocation10 + $0xa0] sm:$0xff]  }
 0x116   : > { %2965 = vmatpush3.bf16.msra.mxu0 %v3276_v20  ;;  %2878 = vmatprep.subr.bf16.mxu1 %v3278_v21  ;;  %v788_v20 = vshll.u32 %v760_v13, 16  ;;  %v768_v13 = vld [vmem:[%s3977_s18 + $0x24] sm:$0x1] }
 0x117   : > { %2974 = vmatprep.subr.bf16.mxu0 %v3279_v24 }
 0x118   : > { %2871 = vmatmul.mubr.bf16.vlgmr.msra.gmra.mrb[0].mxu1 %v3280_v25  ;;  %v1510_v25 = vrot.slane %v1509_v16, 4  ;;  %v790_v28 = vrot.slane %v788_v20, 5  ;;  %v769_v16 = vld [vmem:[%s3977_s18 + $0x28] sm:$0xf] }
 0x119   : > { %2879 = vmatpush3.bf16.msra.mxu1 %v3278_v21  ;;  %2967 = vmatmul.mubr.bf16.vlgmr.msra.gmra.mrb[0].mxu0 %v2613_v29  ;;  %v1496_v21 = vrot.slane %v1495_v11, 4  ;;  %v3288_v29 = vld [vmem:[#allocation10 + $0x1a0] sm:$0xff]   ;;  %v3302_v20 = vld [vmem:[#allocation10 + $0x1c8] sm:$0xff]   ;;  %v849_v22 = vshrl.u32 %v769_v16, 16  ;;  %v852_v23 = vshll.u32 %v769_v16, 16 }
 0x11a   : > { %2975 = vmatpush3.bf16.msra.mxu0 %v3279_v24  ;;  %2880 = vmatprep.subr.bf16.mxu1 %v3281_v26  ;;  %v802_v24 = vshll.u32 %v762_v17, 16  ;;  %v1515_v35 = vsel %vm4022_vm2, %v1510_v25, %v1514_v9  ;;  %v3300_v11 = vld [vmem:[%s3977_s18 + $0x18] ss:$8 sps:$4 sm:$0xff]   ;;  %v770_v17 = vld [vmem:[%s3977_s18 + $0x2c] sm:$0x1] }
 0x11b   : > { %2976 = vmatprep.subr.bf16.mxu0 %v3282_v30  ;;  %2874 = vmatprep.mubr.bf16.mxu1 %v3291_v39  ;;  %v2666_v16 = vld [vmem:[%s3977_s18 + $0x10] sm:$0xf] }
 0x11c   : > { %2970 = vmatprep.mubr.bf16.mxu0 %v2614_v10  ;;  %v804_v33 = vrot.slane %v802_v24, 5  ;;  %v3299_v10 = vld [vmem:[#allocation10 + $0x1c0] sm:$0xff]   ;;  %v858_v24 = vshll.u32 %v770_v17, 16  ;;  %v2667_v17 = vld [vmem:[%s3977_s18 + $0x14] sm:$0x1] }
 0x11d   : > { %2881 = vmatpush3.bf16.msra.mxu1 %v3281_v26  ;;  %v781_v26 = vrot.slane %v779_v18, 4  ;;  %v835_v18 = vshrl.u32 %v767_v12, 16  ;;  %v3315_v12 = vld [vmem:[#allocation10 + $0xf8] sm:$0xff]  }
 0x11e   : > { %2977 = vmatpush3.bf16.msra.mxu0 %v3282_v30  ;;  %2882 = vmatprep.subr.bf16.mxu1 %v3283_v42  ;;  %v1501_v30 = vsel %vm4022_vm2, %v1496_v21, %v1500_v4  ;;  %v805_v57 = vsel %vm4022_vm2, %v800_v47, %v804_v33  ;;  %v3295_v4 = vld [vmem:[#allocation10 + $0xb8] sm:$0xff]   ;;  %v844_v21 = vshll.u32 %v768_v13, 16  ;;  %v860_v31 = vrot.slane %v858_v24, 5  ;;  %v2672_v24 = vld [vmem:[%s3977_s18 + $0x28] sm:$0xf] }
 0x11f   : > { %2978 = vmatprep.subr.bf16.mxu0 %v3284_v45  ;;  %v785_v36 = vor.u32 %v784_v27, %v781_v26  ;;  %v2615_v39 = vcombine.low %v1501_v30, %v1515_v35  ;;  %v837_v25 = vrot.slane %v835_v18, 4  ;;  %v840_v26 = vrot.slane %v838_v19, 5  ;;  %v3311_v27 = vld [vmem:[%s3977_s18 + $0x28] ss:$8 sps:$4 sm:$0xff]   ;;  %v773_v35 = vld [vmem:[%s3977_s18 + $0x38] sm:$0xf] }
 0x120   : > { %2875 = vmatmul.mubr.bf16.gmra.mrb[4].mxu1 %v3294_v51  ;;  %v854_v30 = vrot.slane %v852_v23, 5  ;;  %v880_v44 = vshll.u32 %v773_v35, 16  ;;  %v3316_v13 = vld [vmem:[#allocation10 + $0x1f8] sm:$0xff]   ;;  %v2050_v23 = vshll.u32 %v2666_v16, 16 }
 0x121   : > { %2883 = vmatpush3.bf16.msra.mxu1 %v3283_v42  ;;  %v764_v42 = vld [vmem:[%s3977_s18 + $0x14] sm:$0x1]  ;;  %v786_v43 = vrot.slane %v785_v36, 4  ;;  %2971 = vmatmul.mubr.bf16.gmra.mrb[4].mxu0 %v2615_v39  ;;  %v841_v33 = vor.u32 %v840_v26, %v837_v25  ;;  %v774_v36 = vld [vmem:[%s3977_s18 + $0x3c] sm:$0x1]  ;;  %v863_v39 = vshrl.u32 %v771_v32, 16 }
 0x122   : > { %2979 = vmatpush3.bf16.msra.mxu0 %v3284_v45  ;;  %2884 = vmatprep.subr.bf16.mxu1 %v3285_v0  ;;  %v766_v45 = vld [vmem:[%s3977_s18 + $0x1c] sm:$0x1]  ;;  %v816_v49 = vshll.u32 %v764_v42, 16  ;;  %v882_v53 = vrot.slane %v880_v44, 5  ;;  %v2673_v25 = vld [vmem:[%s3977_s18 + $0x2c] sm:$0x1] }
 0x123   : > { %2980 = vmatprep.subr.bf16.mxu0 %v3286_v5  ;;  %v791_v51 = vsel %vm4022_vm2, %v786_v43, %v790_v28  ;;  %2990 = vmatprep.mubr.bf16.mxu0 %v3298_v37  ;;  %v830_v60 = vshll.u32 %v766_v45, 16  ;;  %v846_v28 = vrot.slane %v844_v21, 5  ;;  %v3303_v37 = vld [vmem:[#allocation10 + $0xd0] sm:$0xff]   ;;  %v842_v42 = vrot.slane %v841_v33, 4 }
 0x124   : > { %v2576_v61 = vcombine.low %v791_v51, %v805_v57  ;;  %v818_v62 = vrot.slane %v816_v49, 5  ;;  %v877_v43 = vshrl.u32 %v773_v35, 16  ;;  %v886_v45 = vshll.u32 %v774_v36, 16  ;;  %v3313_v57 = vld [vmem:[%s3977_s18 + $0x38] ss:$8 sps:$4 sm:$0xff]  }
 0x125   : > { %2885 = vmatpush3.bf16.msra.mxu1 %v3285_v0  ;;  %v813_v0 = vor.u32 %v812_v58, %v809_v52  ;;  %v832_v3 = vrot.slane %v830_v60, 5  ;;  %v865_v48 = vrot.slane %v863_v39, 4  ;;  %v868_v49 = vrot.slane %v866_v40, 5  ;;  %v3305_v58 = vld [vmem:[#allocation10 + $0xd8] sm:$0xff]  }
 0x126   : > { %2981 = vmatpush3.bf16.msra.mxu0 %v3286_v5  ;;  %2886 = vmatprep.subr.bf16.mxu1 %v3287_v15  ;;  %v828_v5 = vrot.slane %v827_v1, 4  ;;  %v847_v50 = vsel %vm4022_vm2, %v842_v42, %v846_v28  ;;  %v879_v52 = vrot.slane %v877_v43, 4  ;;  %v3307_v1 = vld [vmem:[#allocation10 + $0xe0] sm:$0xff]   ;;  %v2056_v32 = vshll.u32 %v2667_v17, 16  ;;  %v2675_v33 = vld [vmem:[%s3977_s18 + $0x34] sm:$0x1] }
 0x127   : > { %2982 = vmatprep.subr.bf16.mxu0 %v3288_v29  ;;  %2894 = vmatprep.mubr.bf16.mxu1 %v2576_v61  ;;  %v814_v2 = vrot.slane %v813_v0, 4  ;;  %v888_v61 = vrot.slane %v886_v45, 5  ;;  %v3319_v21 = vld [vmem:[%s3990_s17 + $0x10] ss:$8 sps:$4 sm:$0xff]   ;;  %v2092_v35 = vshll.u32 %v2672_v24, 16  ;;  %v2112_v45 = vshll.u32 %v2675_v33, 16 }
 0x128   : > { %v833_v9 = vsel %vm4022_vm2, %v828_v5, %v832_v3  ;;  %v883_v60 = vor.u32 %v882_v53, %v879_v52  ;;  %v3308_v5 = vld [vmem:[#allocation10 + $0x1e0] sm:$0xff]   ;;  %v3320_v36 = vld [vmem:[%s3984_s14 + $0x18] ss:$8 sps:$4 sm:$0xff]   ;;  %v2058_v53 = vrot.slane %v2056_v32, 5 }
 0x129   : > { %2887 = vmatpush3.bf16.msra.mxu1 %v3287_v15  ;;  %v819_v8 = vsel %vm4022_vm2, %v814_v2, %v818_v62  ;;  %v3301_v15 = vld [vmem:[#allocation10 + $0xc8] sm:$0xff]   ;;  %v3306_v62 = vld [vmem:[#allocation10 + $0x1d8] sm:$0xff]   ;;  %v2094_v44 = vrot.slane %v2092_v35, 5 }
 0x12a   : > { %2983 = vmatpush3.bf16.msra.mxu0 %v3288_v29  ;;  %2888 = vmatprep.subr.bf16.mxu1 %v3289_v34  ;;  %v2577_v14 = vcombine.low %v819_v8, %v833_v9  ;;  %v851_v29 = vrot.slane %v849_v22, 4  ;;  %v884_v0 = vrot.slane %v883_v60, 4  ;;  %v3309_v8 = vld [vmem:[#allocation10 + $0xe8] sm:$0xff]   ;;  %v3321_v22 = vld [vmem:[#allocation10 + $0x200] sm:$0xff]  }
 0x12b   : > { %2984 = vmatprep.subr.bf16.mxu0 %v3290_v38  ;;  %v3310_v9 = vld [vmem:[#allocation10 + $0x1e8] sm:$0xff]  }
 0x12c   : > { %v889_v3 = vsel %vm4022_vm2, %v884_v0, %v888_v61  ;;  %v2671_v32 = vld [vmem:[%s3977_s18 + $0x24] sm:$0x1] }
 0x12d   : > { %2889 = vmatpush3.bf16.msra.mxu1 %v3289_v34  ;;  %v772_v34 = vld [vmem:[%s3977_s18 + $0x34] sm:$0x1] }
 0x12e   : > { %2985 = vmatpush3.bf16.msra.mxu0 %v3290_v38  ;;  %2890 = vmatprep.subr.bf16.mxu1 %v3292_v54  ;;  %v855_v38 = vor.u32 %v854_v30, %v851_v29  ;;  %v872_v41 = vshll.u32 %v772_v34, 16  ;;  %v2674_v30 = vld [vmem:[%s3977_s18 + $0x30] sm:$0xf]  ;;  %v2089_v34 = vshrl.u32 %v2672_v24, 16 }
 0x12f   : > { %2986 = vmatprep.subr.bf16.mxu0 %v3293_v56  ;;  %v2103_v39 = vshrl.u32 %v2674_v30, 16  ;;  %v2106_v40 = vshll.u32 %v2674_v30, 16  ;;  %v2679_v30 = vld [vmem:[%s3977_s18 + $0x44] sm:$0x1] }
 0x130   : > { %v856_v47 = vrot.slane %v855_v38, 4  ;;  %v874_v51 = vrot.slane %v872_v41, 5  ;;  %v2098_v38 = vshll.u32 %v2673_v25, 16  ;;  %v3322_v41 = vld [vmem:[#allocation10 + $0x208] sm:$0xff]   ;;  %v2091_v43 = vrot.slane %v2089_v34, 4 }
 0x131   : > { %2891 = vmatpush3.bf16.msra.mxu1 %v3292_v54 }
 0x132   : > { %2987 = vmatpush3.bf16.msra.mxu0 %v3293_v56  ;;  %2892 = vmatprep.subr.bf16.mxu1 %v3295_v4  ;;  %v861_v54 = vsel %vm4022_vm2, %v856_v47, %v860_v31  ;;  %v869_v56 = vor.u32 %v868_v49, %v865_v48  ;;  %v2052_v31 = vrot.slane %v2050_v23, 5  ;;  %v2105_v48 = vrot.slane %v2103_v39, 4 }
 0x133   : > { %2988 = vmatprep.subr.bf16.mxu0 %v3296_v6  ;;  %v2578_v59 = vcombine.low %v847_v50, %v861_v54  ;;  %v2108_v49 = vrot.slane %v2106_v40, 5  ;;  %v3324_v50 = vld [vmem:[%s3984_s14 + $0x28] ss:$8 sps:$4 sm:$0xff]   ;;  %v2095_v54 = vor.u32 %v2094_v44, %v2091_v43 }
 0x134   : > { %v870_v63 = vrot.slane %v869_v56, 4  ;;  %v2100_v56 = vrot.slane %v2098_v38, 5 }
 0x135   : > { %2893 = vmatpush3.bf16.msra.mxu1 %v3295_v4  ;;  %v3318_v4 = vld [vmem:[%s3984_s14 + $0x8] ss:$8 sps:$4 sm:$0xff]   ;;  %v2096_v60 = vrot.slane %v2095_v54, 4 }
 0x136   : > { %2989 = vmatpush3.bf16.msra.mxu0 %v3296_v6  ;;  %2902 = vmatprep.subr.bf16.mxu1 %v3297_v7  ;;  %v875_v2 = vsel %vm4022_vm2, %v870_v63, %v874_v51 }
 0x137   : > { %2998 = vmatprep.subr.bf16.mxu0 %v3299_v10  ;;  %v2579_v6 = vcombine.low %v875_v2, %v889_v3  ;;  %v2101_v2 = vsel %vm4022_vm2, %v2096_v60, %v2100_v56 }
 0x138   : > { %2895 = vmatmul.mubr.bf16.vlgmr.msra.gmra.mrb[0].mxu1 %v2577_v14  ;;  %v2664_v14 = vld [vmem:[%s3977_s18 + $0x8] sm:$0xf] }
 0x139   : > { %2903 = vmatpush3.bf16.msra.mxu1 %v3297_v7  ;;  %2991 = vmatmul.mubr.bf16.vlgmr.msra.gmra.mrb[0].mxu0 %v3300_v11  ;;  %v3317_v7 = vld [vmem:[%s3990_s17] ss:$8 sps:$4 sm:$0xff]   ;;  %v2033_v18 = vshrl.u32 %v2664_v14, 16  ;;  %v2036_v19 = vshll.u32 %v2664_v14, 16 }
 0x13a   : > { %2999 = vmatpush3.bf16.msra.mxu0 %v3299_v10  ;;  %2904 = vmatprep.subr.bf16.mxu1 %v3301_v15  ;;  %v3312_v10 = vld [vmem:[#allocation10 + $0xf0] sm:$0xff]  }
 0x13b   : > { %3000 = vmatprep.subr.bf16.mxu0 %v3302_v20  ;;  %2994 = vmatprep.mubr.bf16.mxu0 %v3311_v27  ;;  %v3314_v11 = vld [vmem:[#allocation10 + $0x1f0] sm:$0xff]   ;;  %v2035_v26 = vrot.slane %v2033_v18, 4  ;;  %v2038_v27 = vrot.slane %v2036_v19, 5 }
 0x13c   : > { %2898 = vmatprep.mubr.bf16.mxu1 %v2578_v59  ;;  %v3327_v59 = vld [vmem:[#allocation10 + $0x210] sm:$0xff]  }
 0x13d   : > { %2905 = vmatpush3.bf16.msra.mxu1 %v3301_v15  ;;  %v2665_v15 = vld [vmem:[%s3977_s18 + $0xc] sm:$0x1] }
 0x13e   : > { %3001 = vmatpush3.bf16.msra.mxu0 %v3302_v20  ;;  %2906 = vmatprep.subr.bf16.mxu1 %v3303_v37  ;;  %v2047_v20 = vshrl.u32 %v2666_v16, 16  ;;  %v2042_v28 = vshll.u32 %v2665_v15, 16  ;;  %v3329_v15 = vld [vmem:[#allocation10 + $0x220] sm:$0xff]  }
 0x13f   : > { %3002 = vmatprep.subr.bf16.mxu0 %v3304_v46 }
 0x140   : > { %2899 = vmatmul.mubr.bf16.gmra.mrb[4].mxu1 %v2579_v6  ;;  %v2049_v29 = vrot.slane %v2047_v20, 4  ;;  %v2044_v47 = vrot.slane %v2042_v28, 5  ;;  %v2678_v6 = vld [vmem:[%s3977_s18 + $0x40] sm:$0xf] }
 0x141   : > { %2907 = vmatpush3.bf16.msra.mxu1 %v3303_v37  ;;  %2995 = vmatmul.mubr.bf16.gmra.mrb[4].mxu0 %v3313_v57  ;;  %v2039_v37 = vor.u32 %v2038_v27, %v2035_v26  ;;  %v2109_v57 = vor.u32 %v2108_v49, %v2105_v48  ;;  %v2134_v14 = vshll.u32 %v2678_v6, 16  ;;  %v3330_v20 = vld [vmem:[#allocation10 + $0x228] sm:$0xff]  }
 0x142   : > { %3003 = vmatpush3.bf16.msra.mxu0 %v3304_v46  ;;  %2908 = vmatprep.subr.bf16.mxu1 %v3305_v58  ;;  %v2053_v42 = vor.u32 %v2052_v31, %v2049_v29  ;;  %v3323_v46 = vld [vmem:[%s3990_s17 + $0x20] ss:$8 sps:$4 sm:$0xff]   ;;  %v2669_v31 = vld [vmem:[%s3977_s18 + $0x1c] sm:$0x1] }
 0x143   : > { %3004 = vmatprep.subr.bf16.mxu0 %v3306_v62  ;;  %3014 = vmatprep.mubr.bf16.mxu0 %v3318_v4  ;;  %v2040_v51 = vrot.slane %v2039_v37, 4  ;;  %v2110_v61 = vrot.slane %v2109_v57, 4  ;;  %v3328_v4 = vld [vmem:[#allocation10 + $0x218] sm:$0xff]   ;;  %v2136_v25 = vrot.slane %v2134_v14, 5  ;;  %v3331_v37 = vld [vmem:[#allocation10 + $0x230] sm:$0xff]   ;;  %v2070_v39 = vshll.u32 %v2669_v31, 16 }
 0x144   : > { %2918 = vmatprep.mubr.bf16.mxu1 %v3317_v7  ;;  %v2054_v52 = vrot.slane %v2053_v42, 4 }
 0x145   : > { %2909 = vmatpush3.bf16.msra.mxu1 %v3305_v58  ;;  %v2114_v58 = vrot.slane %v2112_v45, 5  ;;  %v2045_v63 = vsel %vm4022_vm2, %v2040_v51, %v2044_v47  ;;  %v2072_v48 = vrot.slane %v2070_v39, 5 }
 0x146   : > { %3005 = vmatpush3.bf16.msra.mxu0 %v3306_v62  ;;  %2910 = vmatprep.subr.bf16.mxu1 %v3307_v1  ;;  %v3325_v62 = vld [vmem:[%s3990_s17 + $0x30] ss:$8 sps:$4 sm:$0xff]   ;;  %v2059_v0 = vsel %vm4022_vm2, %v2054_v52, %v2058_v53 }
 0x147   : > { %3006 = vmatprep.subr.bf16.mxu0 %v3308_v5  ;;  %v2115_v3 = vsel %vm4022_vm2, %v2110_v61, %v2114_v58  ;;  %v2680_v7 = vcombine.low %v2045_v63, %v2059_v0 }
 0x149   : > { %2911 = vmatpush3.bf16.msra.mxu1 %v3307_v1  ;;  %v3326_v1 = vld [vmem:[%s3984_s14 + $0x38] ss:$8 sps:$4 sm:$0xff]  }
 0x14a   : > { %3007 = vmatpush3.bf16.msra.mxu0 %v3308_v5  ;;  %2912 = vmatprep.subr.bf16.mxu1 %v3309_v8  ;;  %v2676_v5 = vld [vmem:[%s3977_s18 + $0x38] sm:$0xf] }
 0x14b   : > { %3008 = vmatprep.subr.bf16.mxu0 %v3310_v9 }
 0x14d   : > { %2913 = vmatpush3.bf16.msra.mxu1 %v3309_v8  ;;  %v2668_v8 = vld [vmem:[%s3977_s18 + $0x18] sm:$0xf] }
 0x14e   : > { %3009 = vmatpush3.bf16.msra.mxu0 %v3310_v9  ;;  %2914 = vmatprep.subr.bf16.mxu1 %v3312_v10  ;;  %v2670_v9 = vld [vmem:[%s3977_s18 + $0x20] sm:$0xf]  ;;  %v2061_v16 = vshrl.u32 %v2668_v8, 16  ;;  %v2064_v17 = vshll.u32 %v2668_v8, 16 }
 0x14f   : > { %3010 = vmatprep.subr.bf16.mxu0 %v3314_v11  ;;  %v2075_v18 = vshrl.u32 %v2670_v9, 16  ;;  %v2078_v19 = vshll.u32 %v2670_v9, 16  ;;  %v2692_v9 = vld [vmem:[#allocation11] ss:$0 sm:$0xff] }
 0x150   : > { %v2063_v26 = vrot.slane %v2061_v16, 4  ;;  %v2066_v27 = vrot.slane %v2064_v17, 5 }
 0x151   : > { %2915 = vmatpush3.bf16.msra.mxu1 %v3312_v10  ;;  %v2682_v10 = vcombine.low %v2101_v2, %v2115_v3  ;;  %v2077_v28 = vrot.slane %v2075_v18, 4  ;;  %v2080_v29 = vrot.slane %v2078_v19, 5 }
 0x152   : > { %3011 = vmatpush3.bf16.msra.mxu0 %v3314_v11  ;;  %2916 = vmatprep.subr.bf16.mxu1 %v3315_v12  ;;  %v2117_v11 = vshrl.u32 %v2676_v5, 16  ;;  %v2067_v38 = vor.u32 %v2066_v27, %v2063_v26 }
 0x153   : > { %3012 = vmatprep.subr.bf16.mxu0 %v3316_v13  ;;  %v2081_v40 = vor.u32 %v2080_v29, %v2077_v28 }
 0x154   : > { %v2068_v47 = vrot.slane %v2067_v38, 4 }
 0x155   : > { %2917 = vmatpush3.bf16.msra.mxu1 %v3315_v12  ;;  %v2120_v12 = vshll.u32 %v2676_v5, 16  ;;  %v2082_v49 = vrot.slane %v2081_v40, 4 }
 0x156   : > { %3013 = vmatpush3.bf16.msra.mxu0 %v3316_v13  ;;  %3046 = vmatprep.subr.bf16.mxu1 %v3321_v22  ;;  %v2131_v13 = vshrl.u32 %v2678_v6, 16  ;;  %v2073_v53 = vsel %vm4022_vm2, %v2068_v47, %v2072_v48 }
 0x157   : > { %3022 = vmatprep.subr.bf16.mxu0 %v3321_v22  ;;  %v2122_v23 = vrot.slane %v2120_v12, 5 }
 0x158   : > { %2919 = vmatmul.mubr.bf16.vlgmr.msra.gmra.mrb[0].mxu1 %v3319_v21  ;;  %v2677_v21 = vld [vmem:[%s3977_s18 + $0x3c] sm:$0x1]  ;;  %v2133_v24 = vrot.slane %v2131_v13, 4 }
 0x159   : > { %3015 = vmatmul.mubr.bf16.vlgmr.msra.gmra.mrb[0].mxu0 %v3320_v36  ;;  %3054 = vmatpush3.bf16.msra.mxu1 %v3321_v22  ;;  %v2126_v34 = vshll.u32 %v2677_v21, 16  ;;  %v2140_v36 = vshll.u32 %v2679_v30, 16 }
 0x15a   : > { %3023 = vmatpush3.bf16.msra.mxu0 %v3321_v22  ;;  %3047 = vmatprep.subr.bf16.mxu1 %v3322_v41  ;;  %v2119_v22 = vrot.slane %v2117_v11, 4  ;;  %v2137_v35 = vor.u32 %v2136_v25, %v2133_v24 }
 0x15b   : > { %3024 = vmatprep.subr.bf16.mxu0 %v3322_v41  ;;  %2922 = vmatprep.mubr.bf16.mxu1 %v3323_v46  ;;  %v2128_v43 = vrot.slane %v2126_v34, 5  ;;  %v2142_v45 = vrot.slane %v2140_v36, 5  ;;  %v3332_v46 = vld [vmem:[#allocation10 + $0x238] sm:$0xff]  }
 0x15c   : > { %3018 = vmatprep.mubr.bf16.mxu0 %v3324_v50  ;;  %v2123_v33 = vor.u32 %v2122_v23, %v2119_v22  ;;  %v2138_v44 = vrot.slane %v2137_v35, 4 }
 0x15d   : > { %3055 = vmatpush3.bf16.msra.mxu1 %v3322_v41 }
 0x15e   : > { %3025 = vmatpush3.bf16.msra.mxu0 %v3322_v41  ;;  %3048 = vmatprep.subr.bf16.mxu1 %v3327_v59  ;;  %v2084_v41 = vshll.u32 %v2671_v32, 16  ;;  %v2124_v42 = vrot.slane %v2123_v33, 4  ;;  %v2143_v52 = vsel %vm4022_vm2, %v2138_v44, %v2142_v45 }
 0x15f   : > { %3026 = vmatprep.subr.bf16.mxu0 %v3327_v59 }
 0x160   : > { %2923 = vmatmul.mubr.bf16.gmra.mrb[4].mxu1 %v3325_v62  ;;  %v2086_v50 = vrot.slane %v2084_v41, 5  ;;  %v2129_v51 = vsel %vm4022_vm2, %v2124_v42, %v2128_v43 }
 0x161   : > { %3019 = vmatmul.mubr.bf16.gmra.mrb[4].mxu0 %v3326_v1  ;;  %3056 = vmatpush3.bf16.msra.mxu1 %v3327_v59  ;;  %v2683_v56 = vcombine.low %v2129_v51, %v2143_v52 }
 0x162   : > { %3027 = vmatpush3.bf16.msra.mxu0 %v3327_v59  ;;  %3049 = vmatprep.subr.bf16.mxu1 %v3328_v4  ;;  %v2087_v54 = vsel %vm4022_vm2, %v2082_v49, %v2086_v50 }
 0x163   : > { %3028 = vmatprep.subr.bf16.mxu0 %v3328_v4  ;;  %3038 = vmatprep.mubr.bf16.mxu0 %v2680_v7  ;;  %v2681_v57 = vcombine.low %v2073_v53, %v2087_v54 }
 0x164   : > { %3042 = vmatprep.mubr.bf16.mxu1 %v2682_v10 }
 0x165   : > { %3057 = vmatpush3.bf16.msra.mxu1 %v3328_v4 }
 0x166   : > { %3029 = vmatpush3.bf16.msra.mxu0 %v3328_v4  ;;  %3050 = vmatprep.subr.bf16.mxu1 %v3329_v15 }
 0x167   : > { %3030 = vmatprep.subr.bf16.mxu0 %v3329_v15 }
 0x169   : > { %3058 = vmatpush3.bf16.msra.mxu1 %v3329_v15 }
 0x16a   : > { %3031 = vmatpush3.bf16.msra.mxu0 %v3329_v15  ;;  %3051 = vmatprep.subr.bf16.mxu1 %v3330_v20 }
 0x16b   : > { %3032 = vmatprep.subr.bf16.mxu0 %v3330_v20 }
 0x16d   : > { %3059 = vmatpush3.bf16.msra.mxu1 %v3330_v20 }
 0x16e   : > { %3033 = vmatpush3.bf16.msra.mxu0 %v3330_v20  ;;  %3052 = vmatprep.subr.bf16.mxu1 %v3331_v37 }
 0x16f   : > { %3034 = vmatprep.subr.bf16.mxu0 %v3331_v37 }
 0x171   : > { %3060 = vmatpush3.bf16.msra.mxu1 %v3331_v37 }
 0x172   : > { %3035 = vmatpush3.bf16.msra.mxu0 %v3331_v37  ;;  %3053 = vmatprep.subr.bf16.mxu1 %v3332_v46 }
 0x173   : > { %3036 = vmatprep.subr.bf16.mxu0 %v3332_v46 }
 0x175   : > { %3061 = vmatpush3.bf16.msra.mxu1 %v3332_v46 }
 0x176   : > { %3037 = vmatpush3.bf16.msra.mxu0 %v3332_v46 }
 0x178   : > { %3043 = vmatmul.mubr.bf16.vlgmr.msra.gmra.mrb[8].mxu1 %v2683_v56 }
 0x179   : > { %3039 = vmatmul.mubr.bf16.vlgmr.msra.gmra.mrb[0].mxu0 %v2681_v57 }
 0x22b   : > { %v2920_v58 = vpop.f32.mrb[0].mxu1 }
 0x22c   : > { %v1177_v59 = vpop.f32.mrb[1].mxu1 }
 0x22d   : > { %v2921_v60 = vpop.f32.mrb[2].mxu1 }
 0x22e   : > { %v1180_v61 = vpop.f32.mrb[3].mxu1 }
 0x233   : > { %v2924_v62 = vpop.f32.mrb[4].mxu1 }
 0x234   : > { %v3020_v63 = vpop.f32.mrb[4].mxu0  ;;  %v1193_v0 = vpop.f32.mrb[5].mxu1 }
 0x235   : > { %v3066_v1 = vadd.f32 %v3020_v63, %v2924_v62  ;;  %v1993_v2 = vpop.f32.mrb[5].mxu0  ;;  %v2925_v3 = vpop.f32.mrb[6].mxu1 }
 0x236   : > { %v3068_v55 = vadd.f32 %v1993_v2, %v1193_v0  ;;  %v3021_v4 = vpop.f32.mrb[6].mxu0  ;;  %v1196_v5 = vpop.f32.mrb[7].mxu1 }
 0x237   : > { %v3070_v6 = vadd.f32 %v3021_v4, %v2925_v3  ;;  %v1996_v7 = vpop.f32.mrb[7].mxu0 }
 0x238   : > { %v3072_v8 = vadd.f32 %v1996_v7, %v1196_v5 }
 0x24b   : > { %v3044_v10 = vpop.f32.mrb[8].mxu1 }
 0x24c   : > { %v3040_v11 = vpop.f32.mrb[0].mxu0  ;;  %v3067_v12 = vadd.f32 %v3066_v1, %v3044_v10  ;;  %v2275_v13 = vpop.f32.mrb[9].mxu1 }
 0x24d   : > { %v3062_v14 = vadd.f32 %v3040_v11, %v2920_v58  ;;  %v2259_v15 = vpop.f32.mrb[1].mxu0  ;;  %v3069_v16 = vadd.f32 %v3068_v55, %v2275_v13  ;;  %v3045_v17 = vpop.f32.mrb[10].mxu1 }
 0x24e   : > { %v2311_v18 = vadd.f32 %v3067_v12, %v2692_v9  ;;  %v3063_v19 = vadd.f32 %v2259_v15, %v1177_v59  ;;  %v3041_v20 = vpop.f32.mrb[2].mxu0  ;;  %v3071_v21 = vadd.f32 %v3070_v6, %v3045_v17  ;;  %v2278_v22 = vpop.f32.mrb[11].mxu1 }
 0x24f   : > { %v2307_v23 = vadd.f32 %v3062_v14, %v2692_v9  ;;  %v2309_v24 = vadd.f32 %v3069_v16, %v2692_v9  ;;  %v3064_v25 = vadd.f32 %v3041_v20, %v2921_v60  ;;  %v2262_v26 = vpop.f32.mrb[3].mxu0  ;;  %v3073_v27 = vadd.f32 %v3072_v8, %v2278_v22 }
 0x250   : > { %v2305_v28 = vadd.f32 %v3063_v19, %v2692_v9  ;;  %v2312_v29 = vadd.f32 %v3071_v21, %v2692_v9  ;;  %v3065_v30 = vadd.f32 %v2262_v26, %v1180_v61  ;;  %v2319_v33 = vmax.f32 %v2311_v18, 0.0 }
 0x251   : > { %v2308_v31 = vadd.f32 %v3064_v25, %v2692_v9  ;;  %v2310_v32 = vadd.f32 %v3073_v27, %v2692_v9  ;;  %v2315_v36 = vmax.f32 %v2307_v23, 0.0  ;;  %v2317_v37 = vmax.f32 %v2309_v24, 0.0 }
 0x252   : > { %v2320_v34 = vmax.f32 %v2312_v29, 0.0  ;;  %v2306_v35 = vadd.f32 %v3065_v30, %v2692_v9  ;;  %v2313_v40 = vmax.f32 %v2305_v28, 0.0 }
 0x253   : > { %v2316_v38 = vmax.f32 %v2308_v31, 0.0  ;;  %v2318_v39 = vmax.f32 %v2310_v32, 0.0 }
 0x254   : > { %v2717_v41 = vpack.c.bf16 %v2320_v34, %v2319_v33  ;;  %v2314_v42 = vmax.f32 %v2306_v35, 0.0 }
 0x255   : > { %v2707_v43 = vpack.c.bf16 %v2316_v38, %v2315_v36  ;;  %v2712_v44 = vpack.c.bf16 %v2318_v39, %v2317_v37 }
 0x256   : > { %2721 = vst [vmem:[%s427_s7 + $0x18] sm:$0xff] %v2717_v41   ;;  %v2702_v45 = vpack.c.bf16 %v2314_v42, %v2313_v40 }
 0x257   : > { %2719 = vst [vmem:[%s427_s7 + $0x8] sm:$0xff] %v2707_v43   ;;  %2720 = vst [vmem:[%s427_s7 + $0x10] sm:$0xff] %v2712_v44  }
 0x258   : > { %2703 = vst [vmem:[%s427_s7] sm:$0xff] %v2702_v45  }
 0x259   : > { %3522 = shalt.err (!%p3519_p0)
}
 0x25a   : > { %s3523_s13 = scalar_lea.hbm %s4138_s24, 512  ;;  %s3527_s10 = scalar_lea.hbm %s4255_s19, 1024 }
 0x25b   : > { %p3524_p9 = scmp.ne.s32.totalorder %s4138_s24, %s3523_s13  ;;  %p3528_p7 = scmp.lt.u32.totalorder %s4138_s24, %s4255_s19 }
 0x25c   : > { %p3529_p2 = scmp.lt.u32.totalorder %s3527_s10, %s3523_s13  ;;  %p3531_p6 = scmp.lt.u32.totalorder %s3523_s13, %s4138_s24 }
 0x25d   : > { %p3525_p1 = pnand %p3524_p9, %p4256_p11 }
 0x25e   : > { %p3530_p13 = por %p3529_p2, %p3528_p7 }
 0x25f   : > { %p3526_p10 = pneg %p3525_p1 }
 0x260   : > { %p3532_p8 = por %p3531_p6, %p3530_p13 }
 0x262   : > { %p3533_p5 = pnand %p3532_p8, %p3526_p10 }
 0x264   : > { %3536 = shalt.err (!%p3533_p5)
}
 0x265   : > { %s3618_s15 = smov 64   ;;  %s3619_s25 = smov 4  }
 0x266   : > { %3151 = dma.vmem_to_hbm [thread:$0]  (%p4256_p11), %s4133_s1, 512, %s4138_s24, %s2338_s28, %s3618_s15, %s3618_s15, %s3619_s25  }
 0x267 PF: > { %s4257_s27 = sld [smem:[#allocation20_spill]]  ;;  %s4258_s7 = sld [smem:[#allocation22_spill]] }
 0x268   : > { %p4260_p12 = scmp.ge.s32.totalorder %s3607_s26, 2 }
 0x26d   : > { %s2368_s4 = sand.u32 1, %s4257_s27   ;;  %p4259_p3 = scmp.ne.s32.totalorder %s4258_s7, 0 }
 0x26e   : > { %s2369_s30 = scalar_lea.sflag [#allocation4], %s2368_s4 }
 0x26f   : > { %p3174_p4 = pnand %p4260_p12, %p4259_p3 }
 0x271   : > { %3582 = dma.done.wait (!%p3174_p4), %s2369_s30, 512  }
 0x272   : > { %3584 = vsyncadd (!%p3174_p4), %s2369_s30, 4294966784  ;;  %s29_s26 = sadd.s32 1, %s3607_s26   ;;  %s4261_s9 = sld [smem:[#allocation24_spill]] }
 0x273   : > { %p26_p0 = scmp.ge.s32.totalorder %s29_s26, 4   ;;  %s4262_s24 = sld [smem:[#allocation21_spill]] }
 0x274   : > { %s4263_s25 = sld [smem:[#allocation23_spill]]  ;;  %s4264_s21 = smov %s3591_s22 }
 0x275   : > { %s4265_s22 = smov %s3595_s23  ;;  %28 = sbr.rel (!%p26_p0) target bundleno = 15 (0xf), region = 148 }
 0x278   : > { %s4266_s23 = smov %s4261_s9 }
 0x27c   :  { %2374 = vsyncpa [#allocation3], 1 }
 0x27d   :  { %2376 = vsyncpa [#allocation3 + $0x1], 1 }
 0x27e   :  { %2377 = vsyncpa [#allocation6], 1 }
 0x27f   :  { %2379 = vsyncpa [#allocation6 + $0x1], 1 }
 0x280   :  { %2380 = vsyncpa [#allocation9], 1 }
 0x281   :  { %2382 = vsyncpa [#allocation9 + $0x1], 1 }
 0x282   :  { %2383 = vsyncpa [#allocation12], 1 }
 0x283   :  { %2384 = vsyncpa [#allocation4], 1 }
 0x284   :  { %2386 = vsyncpa [#allocation4 + $0x1], 1 }

</bundles_post_ra>
